<compile_context>
chip_gen: v7x
topology: tpu7x:2x2x1
jax: 0.10.0
libtpu: 0.0.40
codegen_flags: <defaults>
</compile_context>

<pallas_src>
import jax
import jax.numpy as jnp
from jax.experimental import pallas as pl
from jax.experimental.pallas import tpu as pltpu


# ---------------------------------------------------------------------------
# Pallas kernels
# ---------------------------------------------------------------------------

def _layer1_kernel(p_ref, w_ref, s_ref, b_ref, o_ref):
    """Fused conv1(1->16,5x5,pad2) + BN + ReLU + maxpool(2x2).

    p_ref: (4, 25, T) bf16 pool-tap-major im2col patches, T = BBLK*196 lanes
           (lanes ordered (image-in-block, yo, xo) of the POOLED 14x14 grid).
    w_ref: (16, 25) bf16;  s_ref/b_ref: (16, 1) f32;  o_ref: (16, T) bf16.
    """
    T = o_ref.shape[-1]
    w = w_ref[...]
    # Hoist the per-channel BN broadcasts out of the 4-tap loop.
    s = jnp.broadcast_to(s_ref[...], (16, T))
    b = jnp.broadcast_to(b_ref[...], (16, T))

    def tap(t):
        # (16, 25) @ (25, T) -> (16, T), f32 accumulate on the MXU.
        c = jnp.dot(w, p_ref[t], preferred_element_type=jnp.float32)
        return jnp.maximum(c * s + b, 0.0)          # BN + ReLU (f32, VPU)

    # 2x2/stride-2 max pool == elementwise max over the 4 window taps.
    m = jnp.maximum(jnp.maximum(tap(0), tap(1)), jnp.maximum(tap(2), tap(3)))
    o_ref[...] = m.astype(o_ref.dtype)


def layer1_conv_bn_relu_pool(p1, w1, scale1, shift1):
    """p1: (NB, 4, 25, T) bf16 -> (NB, 16, T) bf16, T = BBLK*196."""
    NB, _, _, T = p1.shape
    return pl.pallas_call(
        _layer1_kernel,
        out_shape=jax.ShapeDtypeStruct((NB, 16, T), jnp.bfloat16),
        grid=(NB,),
        in_specs=[
            pl.BlockSpec((None, 4, 25, T), lambda i: (i, 0, 0, 0)),
            pl.BlockSpec((16, 25), lambda i: (0, 0)),
            pl.BlockSpec((16, 1), lambda i: (0, 0)),
            pl.BlockSpec((16, 1), lambda i: (0, 0)),
        ],
        out_specs=pl.BlockSpec((None, 16, T), lambda i: (i, 0, 0)),
        compiler_params=pltpu.CompilerParams(dimension_semantics=("parallel",)),
    )(p1, w1, scale1, shift1)


def _layer2_kernel(a_ref, w_ref, s_ref, b_ref, o_ref, p2_ref):
    """Fused in-kernel im2col + conv2(16->32,5x5,pad2) + BN + ReLU + maxpool.

    a_ref : (16, N+76) bf16 padded planar layer-1 activations; per image an
            18x18 zero-padded grid, flattened into lanes, with an extra
            38-lane zero halo on each side so every (dh,dw) shift is a static
            in-bounds lane slice.
    w_ref : (32, 400) bf16, columns ordered (dh, dw, ci).
    o_ref : (32, N) bf16, N = BBLK*324.  Pooled features live at the
            (even,even) interior grid positions; all other lanes are written
            with finite filler that the scattered fc weight zeroes out.
    p2_ref: (400, N) bf16 VMEM scratch — the in-kernel im2col matrix.
    """
    N = o_ref.shape[-1]

    # In-kernel im2col: 25 static lane-shifted copies (no HBM patch tensor).
    for k in range(25):
        dh, dw = k // 5, k % 5
        off = 38 + (dh - 2) * 18 + (dw - 2)
        p2_ref[k * 16:(k + 1) * 16, :] = a_ref[:, off:off + N]

    # Lane-dense MXU matmul: (32, 400) @ (400, N) with f32 accumulation.
    c = jnp.dot(w_ref[...], p2_ref[...], preferred_element_type=jnp.float32)
    c = jnp.maximum(c * s_ref[...] + b_ref[...], 0.0)      # BN + ReLU (f32)

    # Fused 2x2/stride-2 max pool: the 4 window taps of a valid output sit at
    # lane offsets {0, 1, 18, 19} of its (even, even) grid position.
    h = jnp.maximum(c[:, 0:N - 1], c[:, 1:N])
    m = jnp.maximum(h[:, 0:N - 19], h[:, 18:N - 1])
    o_ref[:, 0:N - 19] = m.astype(o_ref.dtype)
    o_ref[:, N - 19:N] = jnp.zeros((32, 19), o_ref.dtype)  # keep lanes finite


def layer2_conv_bn_relu_pool(a1p, w2, scale2, shift2, n_lanes):
    """a1p: (NB, 16, N+76) bf16 -> (NB, 32, N) bf16, N = BBLK*324."""
    NB = a1p.shape[0]
    N = n_lanes
    return pl.pallas_call(
        _layer2_kernel,
        out_shape=jax.ShapeDtypeStruct((NB, 32, N), jnp.bfloat16),
        grid=(NB,),
        in_specs=[
            pl.BlockSpec((None, 16, N + 76), lambda i: (i, 0, 0)),
            pl.BlockSpec((32, 400), lambda i: (0, 0)),
            pl.BlockSpec((32, 1), lambda i: (0, 0)),
            pl.BlockSpec((32, 1), lambda i: (0, 0)),
        ],
        out_specs=pl.BlockSpec((None, 32, N), lambda i: (i, 0, 0)),
        scratch_shapes=[pltpu.VMEM((400, N), jnp.bfloat16)],
        compiler_params=pltpu.CompilerParams(dimension_semantics=("parallel",)),
    )(a1p, w2, scale2, shift2)


def _fc_kernel(x_ref, w_ref, b_ref, o_ref):
    o_ref[...] = (jnp.dot(x_ref[...], w_ref[...],
                          preferred_element_type=jnp.float32) + b_ref[...])


def fc(x, w, b):
    """x: (B, F) bf16, w: (F, 10) bf16, b: (1, 10) f32 -> (B, 10) f32."""
    B = x.shape[0]
    N = w.shape[1]
    return pl.pallas_call(
        _fc_kernel,
        out_shape=jax.ShapeDtypeStruct((B, N), jnp.float32),
    )(x, w, b)


# ---------------------------------------------------------------------------
# XLA glue: layer-1 patch construction, inter-layer layout, parameters
# ---------------------------------------------------------------------------

def _pick_bblk(batch):
    """Images per grid step.  32 makes the lane extents exact multiples of
    128 (32*196 = 49*128, 32*324 = 81*128); otherwise fall back to 8 / B."""
    if batch % 32 == 0:
        return 32
    if batch >= 8:
        return 8
    return batch


def _layer1_patches(x_nhw, bblk):
    """(Bp, 28, 28) f32 -> (NB, 4, 25, bblk*196) bf16 tap-major patches.

    Patch value [i, t=(ty,tx), k=(dh,dw), bb*196 + yo*14 + xo] =
        x_pad[i*bblk+bb, 2*yo+ty+dh, 2*xo+tx+dw]   (pad = 2).
    """
    Bp = x_nhw.shape[0]
    NB = Bp // bblk
    xp = jnp.pad(x_nhw, ((0, 0), (2, 2), (2, 2)))            # (Bp, 32, 32)
    taps = []
    for ty in range(2):
        for tx in range(2):
            ks = []
            for dh in range(5):
                for dw in range(5):
                    ks.append(xp[:, ty + dh:ty + dh + 28:2,
                                    tx + dw:tx + dw + 28:2])  # (Bp, 14, 14)
            taps.append(jnp.stack(ks, axis=1))                # (Bp, 25, 14, 14)
    p = jnp.stack(taps, axis=1)                               # (Bp, 4, 25, 14, 14)
    p = p.reshape(NB, bblk, 4, 25, 196)
    p = p.transpose(0, 2, 3, 1, 4).reshape(NB, 4, 25, bblk * 196)
    return p.astype(jnp.bfloat16)


def _pad_to_planar18(o1t, bblk):
    """(NB, 16, bblk*196) bf16 -> (NB, 16, bblk*324 + 76) bf16 (18x18 grid +
    38-lane halo) for the layer-2 in-kernel im2col."""
    NB = o1t.shape[0]
    a = o1t.reshape(NB, 16, bblk, 14, 14)
    a = jnp.pad(a, ((0, 0), (0, 0), (0, 0), (2, 2), (2, 2)))  # conv padding
    a = a.reshape(NB, 16, bblk * 324)
    a = jnp.pad(a, ((0, 0), (0, 0), (38, 38)))                # shift halo
    return a


def _gather_features(o2t, bblk, batch):
    """(NB, 32, bblk*324) bf16 -> (batch, 32*324) bf16 per-image rows."""
    NB = o2t.shape[0]
    f = o2t.reshape(NB, 32, bblk, 324).transpose(0, 2, 1, 3)
    return f.reshape(NB * bblk, 32 * 324)[:batch]


def init_params(key):
    ks = jax.random.split(key, 16)
    eps = 1e-5

    # layer1: Conv2d(1, 16, 5, 1, 2) + BN(16)
    conv1_w = jax.random.normal(ks[0], (16, 1, 5, 5), jnp.float32) * 0.1
    conv1_b = jax.random.normal(ks[1], (16,), jnp.float32) * 0.1
    bn1_g = 1.0 + 0.1 * jax.random.normal(ks[2], (16,), jnp.float32)
    bn1_b = 0.1 * jax.random.normal(ks[3], (16,), jnp.float32)
    bn1_m = 0.1 * jax.random.normal(ks[4], (16,), jnp.float32)
    bn1_v = jax.random.uniform(ks[5], (16,), jnp.float32, 0.5, 1.5)

    # layer2: Conv2d(16, 32, 5, 1, 2) + BN(32)
    conv2_w = jax.random.normal(ks[6], (32, 16, 5, 5), jnp.float32) * 0.05
    conv2_b = jax.random.normal(ks[7], (32,), jnp.float32) * 0.1
    bn2_g = 1.0 + 0.1 * jax.random.normal(ks[8], (32,), jnp.float32)
    bn2_b = 0.1 * jax.random.normal(ks[9], (32,), jnp.float32)
    bn2_m = 0.1 * jax.random.normal(ks[10], (32,), jnp.float32)
    bn2_v = jax.random.uniform(ks[11], (32,), jnp.float32, 0.5, 1.5)

    # fc: Linear(7*7*32, 10)
    fc_w = jax.random.normal(ks[12], (10, 7 * 7 * 32), jnp.float32) * 0.02
    fc_b = jax.random.normal(ks[13], (10,), jnp.float32) * 0.1

    # Fold conv bias + eval-mode BN into per-channel scale/shift (f32).
    s1 = bn1_g / jnp.sqrt(bn1_v + eps)
    s2 = bn2_g / jnp.sqrt(bn2_v + eps)

    # Scatter the fc weight onto the 18x18 padded grid the layer-2 kernel
    # emits: per-image feature (co, yo, xo) lives at lane (2*yo+2)*18+(2*xo+2)
    # of channel-row co; every other lane gets weight 0.
    ws = jnp.zeros((32, 18, 18, 10), jnp.float32)
    ws = ws.at[:, 2:16:2, 2:16:2, :].set(
        fc_w.reshape(10, 32, 7, 7).transpose(1, 2, 3, 0))
    ws = ws.reshape(32 * 324, 10)

    return {
        "w1": conv1_w.reshape(16, 25).astype(jnp.bfloat16),        # (16, 25)
        "scale1": s1.reshape(16, 1),
        "shift1": ((conv1_b - bn1_m) * s1 + bn1_b).reshape(16, 1),
        # columns ordered (dh, dw, ci) to match the in-kernel im2col rows.
        "w2": conv2_w.transpose(0, 2, 3, 1).reshape(32, 400).astype(jnp.bfloat16),
        "scale2": s2.reshape(32, 1),
        "shift2": ((conv2_b - bn2_m) * s2 + bn2_b).reshape(32, 1),
        "fc_w": ws.astype(jnp.bfloat16),                           # (10368, 10)
        "fc_b": fc_b.reshape(1, 10),
    }


def convnet_forward(x_nchw, params):
    B = x_nchw.shape[0]
    bblk = _pick_bblk(B)                          # images per grid step
    Bp = ((B + bblk - 1) // bblk) * bblk
    x = x_nchw[:, 0, :, :]                        # Cin == 1 -> (B, 28, 28)
    if Bp != B:
        x = jnp.pad(x, ((0, Bp - B), (0, 0), (0, 0)))

    # layer 1: conv + BN + ReLU + maxpool, fused.
    p1 = _layer1_patches(x, bblk)                             # (NB,4,25,T)
    o1 = layer1_conv_bn_relu_pool(p1, params["w1"],
                                  params["scale1"], params["shift1"])

    # layer 2: in-kernel im2col + conv + BN + ReLU + maxpool, fused.
    a1p = _pad_to_planar18(o1, bblk)                          # (NB,16,N+76)
    o2 = layer2_conv_bn_relu_pool(a1p, params["w2"], params["scale2"],
                                  params["shift2"], n_lanes=bblk * 324)

    # fc on the scattered (zero-padded) feature layout.
    feat = _gather_features(o2, bblk, B)                      # (B, 10368)
    return fc(feat, params["fc_w"], params["fc_b"])           # (B, 10)


if __name__ == "__main__":
    key = jax.random.PRNGKey(0)
    k_x, k_p = jax.random.split(key)
    # MNIST-shaped input (spatial 28x28 is required by the 7*7*32 fc layer).
    x = jax.random.normal(k_x, (2, 1, 28, 28), jnp.float32)
    params = init_params(k_p)

    fwd = jax.jit(convnet_forward)
    out = jax.block_until_ready(fwd(x, params))
    assert out.shape == (2, 10) and out.dtype == jnp.float32
    print("KERNEL_OK")
</pallas_src>

<mosaic_0001>
module attributes {stable_mosaic.version = 11 : i64} {
  func.func @_layer1_kernel(%arg0: i32, %arg1: memref<1x4x25x392xbf16, #tpu.memory_space<vmem>>, %arg2: memref<16x25xbf16, #tpu.memory_space<vmem>>, %arg3: memref<16x1xf32, #tpu.memory_space<vmem>>, %arg4: memref<16x1xf32, #tpu.memory_space<vmem>>, %arg5: memref<1x16x392xbf16, #tpu.memory_space<vmem>>) attributes {dimension_semantics = [#tpu.dimension_semantics<parallel>], iteration_bounds = array<i64: 1>, scalar_prefetch = 0 : i64, scratch_operands = 0 : i64, tpu.core_type = #tpu.core_type<tc>, window_params = [{transform_indices = @transform_0, window_bounds = array<i64: 1, 4, 25, 392>}, {pipeline_mode = #tpu.pipeline_mode<synchronous>, transform_indices = @transform_1, window_bounds = array<i64: 16, 25>}, {pipeline_mode = #tpu.pipeline_mode<synchronous>, transform_indices = @transform_2, window_bounds = array<i64: 16, 1>}, {pipeline_mode = #tpu.pipeline_mode<synchronous>, transform_indices = @transform_3, window_bounds = array<i64: 16, 1>}, {transform_indices = @transform_4, window_bounds = array<i64: 1, 16, 392>}]} {
    %c0 = arith.constant 0 : index
    %c0_0 = arith.constant 0 : index
    %0 = vector.load %arg2[%c0, %c0_0] : memref<16x25xbf16, #tpu.memory_space<vmem>>, vector<16x25xbf16>
    %c0_1 = arith.constant 0 : index
    %c0_2 = arith.constant 0 : index
    %1 = vector.load %arg3[%c0_1, %c0_2] : memref<16x1xf32, #tpu.memory_space<vmem>>, vector<16x1xf32>
    %2 = vector.shape_cast %1 : vector<16x1xf32> to vector<16x1xf32>
    %3 = vector.broadcast %2 : vector<16x1xf32> to vector<16x392xf32>
    %c0_3 = arith.constant 0 : index
    %c0_4 = arith.constant 0 : index
    %4 = vector.load %arg4[%c0_3, %c0_4] : memref<16x1xf32, #tpu.memory_space<vmem>>, vector<16x1xf32>
    %5 = vector.shape_cast %4 : vector<16x1xf32> to vector<16x1xf32>
    %6 = vector.broadcast %5 : vector<16x1xf32> to vector<16x392xf32>
    %c0_5 = arith.constant 0 : index
    %c0_6 = arith.constant 0 : index
    %c0_7 = arith.constant 0 : index
    %c0_8 = arith.constant 0 : index
    %7 = vector.load %arg1[%c0_5, %c0_6, %c0_7, %c0_8] : memref<1x4x25x392xbf16, #tpu.memory_space<vmem>>, vector<1x1x25x392xbf16>
    %8 = vector.shape_cast %7 : vector<1x1x25x392xbf16> to vector<25x392xbf16>
    %cst = arith.constant dense<0.000000e+00> : vector<16x392xf32>
    %9 = tpu.matmul %0, %8, %cst {dimension_numbers = #tpu.dot_dimension_numbers<[1], [0], [0], [1], [0, 0, 1, 1], [], []>} : vector<16x25xbf16>, vector<25x392xbf16>, vector<16x392xf32> -> vector<16x392xf32>
    %10 = arith.mulf %9, %3 : vector<16x392xf32>
    %11 = arith.addf %10, %6 : vector<16x392xf32>
    %cst_9 = arith.constant 0.000000e+00 : f32
    %12 = vector.broadcast %cst_9 : f32 to vector<16x392xf32>
    %13 = arith.maximumf %11, %12 : vector<16x392xf32>
    %c0_10 = arith.constant 0 : index
    %c1 = arith.constant 1 : index
    %c0_11 = arith.constant 0 : index
    %c0_12 = arith.constant 0 : index
    %14 = vector.load %arg1[%c0_10, %c1, %c0_11, %c0_12] : memref<1x4x25x392xbf16, #tpu.memory_space<vmem>>, vector<1x1x25x392xbf16>
    %15 = vector.shape_cast %14 : vector<1x1x25x392xbf16> to vector<25x392xbf16>
    %cst_13 = arith.constant dense<0.000000e+00> : vector<16x392xf32>
    %16 = tpu.matmul %0, %15, %cst_13 {dimension_numbers = #tpu.dot_dimension_numbers<[1], [0], [0], [1], [0, 0, 1, 1], [], []>} : vector<16x25xbf16>, vector<25x392xbf16>, vector<16x392xf32> -> vector<16x392xf32>
    %17 = arith.mulf %16, %3 : vector<16x392xf32>
    %18 = arith.addf %17, %6 : vector<16x392xf32>
    %cst_14 = arith.constant 0.000000e+00 : f32
    %19 = vector.broadcast %cst_14 : f32 to vector<16x392xf32>
    %20 = arith.maximumf %18, %19 : vector<16x392xf32>
    %21 = arith.maximumf %13, %20 : vector<16x392xf32>
    %c0_15 = arith.constant 0 : index
    %c2 = arith.constant 2 : index
    %c0_16 = arith.constant 0 : index
    %c0_17 = arith.constant 0 : index
    %22 = vector.load %arg1[%c0_15, %c2, %c0_16, %c0_17] : memref<1x4x25x392xbf16, #tpu.memory_space<vmem>>, vector<1x1x25x392xbf16>
    %23 = vector.shape_cast %22 : vector<1x1x25x392xbf16> to vector<25x392xbf16>
    %cst_18 = arith.constant dense<0.000000e+00> : vector<16x392xf32>
    %24 = tpu.matmul %0, %23, %cst_18 {dimension_numbers = #tpu.dot_dimension_numbers<[1], [0], [0], [1], [0, 0, 1, 1], [], []>} : vector<16x25xbf16>, vector<25x392xbf16>, vector<16x392xf32> -> vector<16x392xf32>
    %25 = arith.mulf %24, %3 : vector<16x392xf32>
    %26 = arith.addf %25, %6 : vector<16x392xf32>
    %cst_19 = arith.constant 0.000000e+00 : f32
    %27 = vector.broadcast %cst_19 : f32 to vector<16x392xf32>
    %28 = arith.maximumf %26, %27 : vector<16x392xf32>
    %c0_20 = arith.constant 0 : index
    %c3 = arith.constant 3 : index
    %c0_21 = arith.constant 0 : index
    %c0_22 = arith.constant 0 : index
    %29 = vector.load %arg1[%c0_20, %c3, %c0_21, %c0_22] : memref<1x4x25x392xbf16, #tpu.memory_space<vmem>>, vector<1x1x25x392xbf16>
    %30 = vector.shape_cast %29 : vector<1x1x25x392xbf16> to vector<25x392xbf16>
    %cst_23 = arith.constant dense<0.000000e+00> : vector<16x392xf32>
    %31 = tpu.matmul %0, %30, %cst_23 {dimension_numbers = #tpu.dot_dimension_numbers<[1], [0], [0], [1], [0, 0, 1, 1], [], []>} : vector<16x25xbf16>, vector<25x392xbf16>, vector<16x392xf32> -> vector<16x392xf32>
    %32 = arith.mulf %31, %3 : vector<16x392xf32>
    %33 = arith.addf %32, %6 : vector<16x392xf32>
    %cst_24 = arith.constant 0.000000e+00 : f32
    %34 = vector.broadcast %cst_24 : f32 to vector<16x392xf32>
    %35 = arith.maximumf %33, %34 : vector<16x392xf32>
    %36 = arith.maximumf %28, %35 : vector<16x392xf32>
    %37 = arith.maximumf %21, %36 : vector<16x392xf32>
    %38 = arith.truncf %37 : vector<16x392xf32> to vector<16x392xbf16>
    %c0_25 = arith.constant 0 : index
    %c0_26 = arith.constant 0 : index
    %c0_27 = arith.constant 0 : index
    %39 = vector.load %arg5[%c0_25, %c0_26, %c0_27] : memref<1x16x392xbf16, #tpu.memory_space<vmem>>, vector<1x16x392xbf16>
    %40 = vector.shape_cast %39 : vector<1x16x392xbf16> to vector<16x392xbf16>
    %41 = vector.shape_cast %38 : vector<16x392xbf16> to vector<1x16x392xbf16>
    tpu.vector_store %arg5[%c0_25, %c0_26, %c0_27], %41 {strides = array<i32>} : memref<1x16x392xbf16, #tpu.memory_space<vmem>>, vector<1x16x392xbf16>,
    return
  }
  func.func @transform_0(%arg0: i32) -> (i32, i32, i32, i32) {
    %c0_i32 = arith.constant 0 : i32
    %c0_i32_0 = arith.constant 0 : i32
    %c0_i32_1 = arith.constant 0 : i32
    %c0_i32_2 = arith.constant 0 : i32
    return %arg0, %c0_i32, %c0_i32_0, %c0_i32_1 : i32, i32, i32, i32
  }
  func.func @transform_1(%arg0: i32) -> (i32, i32) {
    %c0_i32 = arith.constant 0 : i32
    %c0_i32_0 = arith.constant 0 : i32
    %c0_i32_1 = arith.constant 0 : i32
    return %c0_i32, %c0_i32_0 : i32, i32
  }
  func.func @transform_2(%arg0: i32) -> (i32, i32) {
    %c0_i32 = arith.constant 0 : i32
    %c0_i32_0 = arith.constant 0 : i32
    %c0_i32_1 = arith.constant 0 : i32
    return %c0_i32, %c0_i32_0 : i32, i32
  }
  func.func @transform_3(%arg0: i32) -> (i32, i32) {
    %c0_i32 = arith.constant 0 : i32
    %c0_i32_0 = arith.constant 0 : i32
    %c0_i32_1 = arith.constant 0 : i32
    return %c0_i32, %c0_i32_0 : i32, i32
  }
  func.func @transform_4(%arg0: i32) -> (i32, i32, i32) {
    %c0_i32 = arith.constant 0 : i32
    %c0_i32_0 = arith.constant 0 : i32
    %c0_i32_1 = arith.constant 0 : i32
    return %arg0, %c0_i32, %c0_i32_0 : i32, i32, i32
  }
}

module attributes {stable_mosaic.version = 11 : i64} {
  func.func @_layer2_kernel(%arg0: i32, %arg1: memref<1x16x724xbf16, #tpu.memory_space<vmem>>, %arg2: memref<32x400xbf16, #tpu.memory_space<vmem>>, %arg3: memref<32x1xf32, #tpu.memory_space<vmem>>, %arg4: memref<32x1xf32, #tpu.memory_space<vmem>>, %arg5: memref<1x32x648xbf16, #tpu.memory_space<vmem>>, %arg6: memref<400x648xbf16, #tpu.memory_space<vmem>>) attributes {dimension_semantics = [#tpu.dimension_semantics<parallel>], iteration_bounds = array<i64: 1>, scalar_prefetch = 0 : i64, scratch_operands = 1 : i64, tpu.core_type = #tpu.core_type<tc>, window_params = [{transform_indices = @transform_0, window_bounds = array<i64: 1, 16, 724>}, {pipeline_mode = #tpu.pipeline_mode<synchronous>, transform_indices = @transform_1, window_bounds = array<i64: 32, 400>}, {pipeline_mode = #tpu.pipeline_mode<synchronous>, transform_indices = @transform_2, window_bounds = array<i64: 32, 1>}, {pipeline_mode = #tpu.pipeline_mode<synchronous>, transform_indices = @transform_3, window_bounds = array<i64: 32, 1>}, {transform_indices = @transform_4, window_bounds = array<i64: 1, 32, 648>}]} {
    %c0 = arith.constant 0 : index
    %c0_0 = arith.constant 0 : index
    %c0_1 = arith.constant 0 : index
    %0 = vector.load %arg1[%c0, %c0_0, %c0_1] : memref<1x16x724xbf16, #tpu.memory_space<vmem>>, vector<1x16x648xbf16>
    %1 = vector.shape_cast %0 : vector<1x16x648xbf16> to vector<16x648xbf16>
    %c0_2 = arith.constant 0 : index
    %c0_3 = arith.constant 0 : index
    %2 = vector.load %arg6[%c0_2, %c0_3] : memref<400x648xbf16, #tpu.memory_space<vmem>>, vector<16x648xbf16>
    tpu.vector_store %arg6[%c0_2, %c0_3], %1 {strides = array<i32>} : memref<400x648xbf16, #tpu.memory_space<vmem>>, vector<16x648xbf16>,
    %c0_4 = arith.constant 0 : index
    %c0_5 = arith.constant 0 : index
    %c1 = arith.constant 1 : index
    %3 = vector.load %arg1[%c0_4, %c0_5, %c1] : memref<1x16x724xbf16, #tpu.memory_space<vmem>>, vector<1x16x648xbf16>
    %4 = vector.shape_cast %3 : vector<1x16x648xbf16> to vector<16x648xbf16>
    %c16 = arith.constant 16 : index
    %c0_6 = arith.constant 0 : index
    %5 = vector.load %arg6[%c16, %c0_6] : memref<400x648xbf16, #tpu.memory_space<vmem>>, vector<16x648xbf16>
    tpu.vector_store %arg6[%c16, %c0_6], %4 {strides = array<i32>} : memref<400x648xbf16, #tpu.memory_space<vmem>>, vector<16x648xbf16>,
    %c0_7 = arith.constant 0 : index
    %c0_8 = arith.constant 0 : index
    %c2 = arith.constant 2 : index
    %6 = vector.load %arg1[%c0_7, %c0_8, %c2] : memref<1x16x724xbf16, #tpu.memory_space<vmem>>, vector<1x16x648xbf16>
    %7 = vector.shape_cast %6 : vector<1x16x648xbf16> to vector<16x648xbf16>
    %c32 = arith.constant 32 : index
    %c0_9 = arith.constant 0 : index
    %8 = vector.load %arg6[%c32, %c0_9] : memref<400x648xbf16, #tpu.memory_space<vmem>>, vector<16x648xbf16>
    tpu.vector_store %arg6[%c32, %c0_9], %7 {strides = array<i32>} : memref<400x648xbf16, #tpu.memory_space<vmem>>, vector<16x648xbf16>,
    %c0_10 = arith.constant 0 : index
    %c0_11 = arith.constant 0 : index
    %c3 = arith.constant 3 : index
    %9 = vector.load %arg1[%c0_10, %c0_11, %c3] : memref<1x16x724xbf16, #tpu.memory_space<vmem>>, vector<1x16x648xbf16>
    %10 = vector.shape_cast %9 : vector<1x16x648xbf16> to vector<16x648xbf16>
    %c48 = arith.constant 48 : index
    %c0_12 = arith.constant 0 : index
    %11 = vector.load %arg6[%c48, %c0_12] : memref<400x648xbf16, #tpu.memory_space<vmem>>, vector<16x648xbf16>
    tpu.vector_store %arg6[%c48, %c0_12], %10 {strides = array<i32>} : memref<400x648xbf16, #tpu.memory_space<vmem>>, vector<16x648xbf16>,
    %c0_13 = arith.constant 0 : index
    %c0_14 = arith.constant 0 : index
    %c4 = arith.constant 4 : index
    %12 = vector.load %arg1[%c0_13, %c0_14, %c4] : memref<1x16x724xbf16, #tpu.memory_space<vmem>>, vector<1x16x648xbf16>
    %13 = vector.shape_cast %12 : vector<1x16x648xbf16> to vector<16x648xbf16>
    %c64 = arith.constant 64 : index
    %c0_15 = arith.constant 0 : index
    %14 = vector.load %arg6[%c64, %c0_15] : memref<400x648xbf16, #tpu.memory_space<vmem>>, vector<16x648xbf16>
    tpu.vector_store %arg6[%c64, %c0_15], %13 {strides = array<i32>} : memref<400x648xbf16, #tpu.memory_space<vmem>>, vector<16x648xbf16>,
    %c0_16 = arith.constant 0 : index
    %c0_17 = arith.constant 0 : index
    %c18 = arith.constant 18 : index
    %15 = vector.load %arg1[%c0_16, %c0_17, %c18] : memref<1x16x724xbf16, #tpu.memory_space<vmem>>, vector<1x16x648xbf16>
    %16 = vector.shape_cast %15 : vector<1x16x648xbf16> to vector<16x648xbf16>
    %c80 = arith.constant 80 : index
    %c0_18 = arith.constant 0 : index
    %17 = vector.load %arg6[%c80, %c0_18] : memref<400x648xbf16, #tpu.memory_space<vmem>>, vector<16x648xbf16>
    tpu.vector_store %arg6[%c80, %c0_18], %16 {strides = array<i32>} : memref<400x648xbf16, #tpu.memory_space<vmem>>, vector<16x648xbf16>,
    %c0_19 = arith.constant 0 : index
    %c0_20 = arith.constant 0 : index
    %c19 = arith.constant 19 : index
    %18 = vector.load %arg1[%c0_19, %c0_20, %c19] : memref<1x16x724xbf16, #tpu.memory_space<vmem>>, vector<1x16x648xbf16>
    %19 = vector.shape_cast %18 : vector<1x16x648xbf16> to vector<16x648xbf16>
    %c96 = arith.constant 96 : index
    %c0_21 = arith.constant 0 : index
    %20 = vector.load %arg6[%c96, %c0_21] : memref<400x648xbf16, #tpu.memory_space<vmem>>, vector<16x648xbf16>
    tpu.vector_store %arg6[%c96, %c0_21], %19 {strides = array<i32>} : memref<400x648xbf16, #tpu.memory_space<vmem>>, vector<16x648xbf16>,
    %c0_22 = arith.constant 0 : index
    %c0_23 = arith.constant 0 : index
    %c20 = arith.constant 20 : index
    %21 = vector.load %arg1[%c0_22, %c0_23, %c20] : memref<1x16x724xbf16, #tpu.memory_space<vmem>>, vector<1x16x648xbf16>
    %22 = vector.shape_cast %21 : vector<1x16x648xbf16> to vector<16x648xbf16>
    %c112 = arith.constant 112 : index
    %c0_24 = arith.constant 0 : index
    %23 = vector.load %arg6[%c112, %c0_24] : memref<400x648xbf16, #tpu.memory_space<vmem>>, vector<16x648xbf16>
    tpu.vector_store %arg6[%c112, %c0_24], %22 {strides = array<i32>} : memref<400x648xbf16, #tpu.memory_space<vmem>>, vector<16x648xbf16>,
    %c0_25 = arith.constant 0 : index
    %c0_26 = arith.constant 0 : index
    %c21 = arith.constant 21 : index
    %24 = vector.load %arg1[%c0_25, %c0_26, %c21] : memref<1x16x724xbf16, #tpu.memory_space<vmem>>, vector<1x16x648xbf16>
    %25 = vector.shape_cast %24 : vector<1x16x648xbf16> to vector<16x648xbf16>
    %c128 = arith.constant 128 : index
    %c0_27 = arith.constant 0 : index
    %26 = vector.load %arg6[%c128, %c0_27] : memref<400x648xbf16, #tpu.memory_space<vmem>>, vector<16x648xbf16>
    tpu.vector_store %arg6[%c128, %c0_27], %25 {strides = array<i32>} : memref<400x648xbf16, #tpu.memory_space<vmem>>, vector<16x648xbf16>,
    %c0_28 = arith.constant 0 : index
    %c0_29 = arith.constant 0 : index
    %c22 = arith.constant 22 : index
    %27 = vector.load %arg1[%c0_28, %c0_29, %c22] : memref<1x16x724xbf16, #tpu.memory_space<vmem>>, vector<1x16x648xbf16>
    %28 = vector.shape_cast %27 : vector<1x16x648xbf16> to vector<16x648xbf16>
    %c144 = arith.constant 144 : index
    %c0_30 = arith.constant 0 : index
    %29 = vector.load %arg6[%c144, %c0_30] : memref<400x648xbf16, #tpu.memory_space<vmem>>, vector<16x648xbf16>
    tpu.vector_store %arg6[%c144, %c0_30], %28 {strides = array<i32>} : memref<400x648xbf16, #tpu.memory_space<vmem>>, vector<16x648xbf16>,
    %c0_31 = arith.constant 0 : index
    %c0_32 = arith.constant 0 : index
    %c36 = arith.constant 36 : index
    %30 = vector.load %arg1[%c0_31, %c0_32, %c36] : memref<1x16x724xbf16, #tpu.memory_space<vmem>>, vector<1x16x648xbf16>
    %31 = vector.shape_cast %30 : vector<1x16x648xbf16> to vector<16x648xbf16>
    %c160 = arith.constant 160 : index
    %c0_33 = arith.constant 0 : index
    %32 = vector.load %arg6[%c160, %c0_33] : memref<400x648xbf16, #tpu.memory_space<vmem>>, vector<16x648xbf16>
    tpu.vector_store %arg6[%c160, %c0_33], %31 {strides = array<i32>} : memref<400x648xbf16, #tpu.memory_space<vmem>>, vector<16x648xbf16>,
    %c0_34 = arith.constant 0 : index
    %c0_35 = arith.constant 0 : index
    %c37 = arith.constant 37 : index
    %33 = vector.load %arg1[%c0_34, %c0_35, %c37] : memref<1x16x724xbf16, #tpu.memory_space<vmem>>, vector<1x16x648xbf16>
    %34 = vector.shape_cast %33 : vector<1x16x648xbf16> to vector<16x648xbf16>
    %c176 = arith.constant 176 : index
    %c0_36 = arith.constant 0 : index
    %35 = vector.load %arg6[%c176, %c0_36] : memref<400x648xbf16, #tpu.memory_space<vmem>>, vector<16x648xbf16>
    tpu.vector_store %arg6[%c176, %c0_36], %34 {strides = array<i32>} : memref<400x648xbf16, #tpu.memory_space<vmem>>, vector<16x648xbf16>,
    %c0_37 = arith.constant 0 : index
    %c0_38 = arith.constant 0 : index
    %c38 = arith.constant 38 : index
    %36 = vector.load %arg1[%c0_37, %c0_38, %c38] : memref<1x16x724xbf16, #tpu.memory_space<vmem>>, vector<1x16x648xbf16>
    %37 = vector.shape_cast %36 : vector<1x16x648xbf16> to vector<16x648xbf16>
    %c192 = arith.constant 192 : index
    %c0_39 = arith.constant 0 : index
    %38 = vector.load %arg6[%c192, %c0_39] : memref<400x648xbf16, #tpu.memory_space<vmem>>, vector<16x648xbf16>
    tpu.vector_store %arg6[%c192, %c0_39], %37 {strides = array<i32>} : memref<400x648xbf16, #tpu.memory_space<vmem>>, vector<16x648xbf16>,
    %c0_40 = arith.constant 0 : index
    %c0_41 = arith.constant 0 : index
    %c39 = arith.constant 39 : index
    %39 = vector.load %arg1[%c0_40, %c0_41, %c39] : memref<1x16x724xbf16, #tpu.memory_space<vmem>>, vector<1x16x648xbf16>
    %40 = vector.shape_cast %39 : vector<1x16x648xbf16> to vector<16x648xbf16>
    %c208 = arith.constant 208 : index
    %c0_42 = arith.constant 0 : index
    %41 = vector.load %arg6[%c208, %c0_42] : memref<400x648xbf16, #tpu.memory_space<vmem>>, vector<16x648xbf16>
    tpu.vector_store %arg6[%c208, %c0_42], %40 {strides = array<i32>} : memref<400x648xbf16, #tpu.memory_space<vmem>>, vector<16x648xbf16>,
    %c0_43 = arith.constant 0 : index
    %c0_44 = arith.constant 0 : index
    %c40 = arith.constant 40 : index
    %42 = vector.load %arg1[%c0_43, %c0_44, %c40] : memref<1x16x724xbf16, #tpu.memory_space<vmem>>, vector<1x16x648xbf16>
    %43 = vector.shape_cast %42 : vector<1x16x648xbf16> to vector<16x648xbf16>
    %c224 = arith.constant 224 : index
    %c0_45 = arith.constant 0 : index
    %44 = vector.load %arg6[%c224, %c0_45] : memref<400x648xbf16, #tpu.memory_space<vmem>>, vector<16x648xbf16>
    tpu.vector_store %arg6[%c224, %c0_45], %43 {strides = array<i32>} : memref<400x648xbf16, #tpu.memory_space<vmem>>, vector<16x648xbf16>,
    %c0_46 = arith.constant 0 : index
    %c0_47 = arith.constant 0 : index
    %c54 = arith.constant 54 : index
    %45 = vector.load %arg1[%c0_46, %c0_47, %c54] : memref<1x16x724xbf16, #tpu.memory_space<vmem>>, vector<1x16x648xbf16>
    %46 = vector.shape_cast %45 : vector<1x16x648xbf16> to vector<16x648xbf16>
    %c240 = arith.constant 240 : index
    %c0_48 = arith.constant 0 : index
    %47 = vector.load %arg6[%c240, %c0_48] : memref<400x648xbf16, #tpu.memory_space<vmem>>, vector<16x648xbf16>
    tpu.vector_store %arg6[%c240, %c0_48], %46 {strides = array<i32>} : memref<400x648xbf16, #tpu.memory_space<vmem>>, vector<16x648xbf16>,
    %c0_49 = arith.constant 0 : index
    %c0_50 = arith.constant 0 : index
    %c55 = arith.constant 55 : index
    %48 = vector.load %arg1[%c0_49, %c0_50, %c55] : memref<1x16x724xbf16, #tpu.memory_space<vmem>>, vector<1x16x648xbf16>
    %49 = vector.shape_cast %48 : vector<1x16x648xbf16> to vector<16x648xbf16>
    %c256 = arith.constant 256 : index
    %c0_51 = arith.constant 0 : index
    %50 = vector.load %arg6[%c256, %c0_51] : memref<400x648xbf16, #tpu.memory_space<vmem>>, vector<16x648xbf16>
    tpu.vector_store %arg6[%c256, %c0_51], %49 {strides = array<i32>} : memref<400x648xbf16, #tpu.memory_space<vmem>>, vector<16x648xbf16>,
    %c0_52 = arith.constant 0 : index
    %c0_53 = arith.constant 0 : index
    %c56 = arith.constant 56 : index
    %51 = vector.load %arg1[%c0_52, %c0_53, %c56] : memref<1x16x724xbf16, #tpu.memory_space<vmem>>, vector<1x16x648xbf16>
    %52 = vector.shape_cast %51 : vector<1x16x648xbf16> to vector<16x648xbf16>
    %c272 = arith.constant 272 : index
    %c0_54 = arith.constant 0 : index
    %53 = vector.load %arg6[%c272, %c0_54] : memref<400x648xbf16, #tpu.memory_space<vmem>>, vector<16x648xbf16>
    tpu.vector_store %arg6[%c272, %c0_54], %52 {strides = array<i32>} : memref<400x648xbf16, #tpu.memory_space<vmem>>, vector<16x648xbf16>,
    %c0_55 = arith.constant 0 : index
    %c0_56 = arith.constant 0 : index
    %c57 = arith.constant 57 : index
    %54 = vector.load %arg1[%c0_55, %c0_56, %c57] : memref<1x16x724xbf16, #tpu.memory_space<vmem>>, vector<1x16x648xbf16>
    %55 = vector.shape_cast %54 : vector<1x16x648xbf16> to vector<16x648xbf16>
    %c288 = arith.constant 288 : index
    %c0_57 = arith.constant 0 : index
    %56 = vector.load %arg6[%c288, %c0_57] : memref<400x648xbf16, #tpu.memory_space<vmem>>, vector<16x648xbf16>
    tpu.vector_store %arg6[%c288, %c0_57], %55 {strides = array<i32>} : memref<400x648xbf16, #tpu.memory_space<vmem>>, vector<16x648xbf16>,
    %c0_58 = arith.constant 0 : index
    %c0_59 = arith.constant 0 : index
    %c58 = arith.constant 58 : index
    %57 = vector.load %arg1[%c0_58, %c0_59, %c58] : memref<1x16x724xbf16, #tpu.memory_space<vmem>>, vector<1x16x648xbf16>
    %58 = vector.shape_cast %57 : vector<1x16x648xbf16> to vector<16x648xbf16>
    %c304 = arith.constant 304 : index
    %c0_60 = arith.constant 0 : index
    %59 = vector.load %arg6[%c304, %c0_60] : memref<400x648xbf16, #tpu.memory_space<vmem>>, vector<16x648xbf16>
    tpu.vector_store %arg6[%c304, %c0_60], %58 {strides = array<i32>} : memref<400x648xbf16, #tpu.memory_space<vmem>>, vector<16x648xbf16>,
    %c0_61 = arith.constant 0 : index
    %c0_62 = arith.constant 0 : index
    %c72 = arith.constant 72 : index
    %60 = vector.load %arg1[%c0_61, %c0_62, %c72] : memref<1x16x724xbf16, #tpu.memory_space<vmem>>, vector<1x16x648xbf16>
    %61 = vector.shape_cast %60 : vector<1x16x648xbf16> to vector<16x648xbf16>
    %c320 = arith.constant 320 : index
    %c0_63 = arith.constant 0 : index
    %62 = vector.load %arg6[%c320, %c0_63] : memref<400x648xbf16, #tpu.memory_space<vmem>>, vector<16x648xbf16>
    tpu.vector_store %arg6[%c320, %c0_63], %61 {strides = array<i32>} : memref<400x648xbf16, #tpu.memory_space<vmem>>, vector<16x648xbf16>,
    %c0_64 = arith.constant 0 : index
    %c0_65 = arith.constant 0 : index
    %c73 = arith.constant 73 : index
    %63 = vector.load %arg1[%c0_64, %c0_65, %c73] : memref<1x16x724xbf16, #tpu.memory_space<vmem>>, vector<1x16x648xbf16>
    %64 = vector.shape_cast %63 : vector<1x16x648xbf16> to vector<16x648xbf16>
    %c336 = arith.constant 336 : index
    %c0_66 = arith.constant 0 : index
    %65 = vector.load %arg6[%c336, %c0_66] : memref<400x648xbf16, #tpu.memory_space<vmem>>, vector<16x648xbf16>
    tpu.vector_store %arg6[%c336, %c0_66], %64 {strides = array<i32>} : memref<400x648xbf16, #tpu.memory_space<vmem>>, vector<16x648xbf16>,
    %c0_67 = arith.constant 0 : index
    %c0_68 = arith.constant 0 : index
    %c74 = arith.constant 74 : index
    %66 = vector.load %arg1[%c0_67, %c0_68, %c74] : memref<1x16x724xbf16, #tpu.memory_space<vmem>>, vector<1x16x648xbf16>
    %67 = vector.shape_cast %66 : vector<1x16x648xbf16> to vector<16x648xbf16>
    %c352 = arith.constant 352 : index
    %c0_69 = arith.constant 0 : index
    %68 = vector.load %arg6[%c352, %c0_69] : memref<400x648xbf16, #tpu.memory_space<vmem>>, vector<16x648xbf16>
    tpu.vector_store %arg6[%c352, %c0_69], %67 {strides = array<i32>} : memref<400x648xbf16, #tpu.memory_space<vmem>>, vector<16x648xbf16>,
    %c0_70 = arith.constant 0 : index
    %c0_71 = arith.constant 0 : index
    %c75 = arith.constant 75 : index
    %69 = vector.load %arg1[%c0_70, %c0_71, %c75] : memref<1x16x724xbf16, #tpu.memory_space<vmem>>, vector<1x16x648xbf16>
    %70 = vector.shape_cast %69 : vector<1x16x648xbf16> to vector<16x648xbf16>
    %c368 = arith.constant 368 : index
    %c0_72 = arith.constant 0 : index
    %71 = vector.load %arg6[%c368, %c0_72] : memref<400x648xbf16, #tpu.memory_space<vmem>>, vector<16x648xbf16>
    tpu.vector_store %arg6[%c368, %c0_72], %70 {strides = array<i32>} : memref<400x648xbf16, #tpu.memory_space<vmem>>, vector<16x648xbf16>,
    %c0_73 = arith.constant 0 : index
    %c0_74 = arith.constant 0 : index
    %c76 = arith.constant 76 : index
    %72 = vector.load %arg1[%c0_73, %c0_74, %c76] : memref<1x16x724xbf16, #tpu.memory_space<vmem>>, vector<1x16x648xbf16>
    %73 = vector.shape_cast %72 : vector<1x16x648xbf16> to vector<16x648xbf16>
    %c384 = arith.constant 384 : index
    %c0_75 = arith.constant 0 : index
    %74 = vector.load %arg6[%c384, %c0_75] : memref<400x648xbf16, #tpu.memory_space<vmem>>, vector<16x648xbf16>
    tpu.vector_store %arg6[%c384, %c0_75], %73 {strides = array<i32>} : memref<400x648xbf16, #tpu.memory_space<vmem>>, vector<16x648xbf16>,
    %c0_76 = arith.constant 0 : index
    %c0_77 = arith.constant 0 : index
    %75 = vector.load %arg2[%c0_76, %c0_77] : memref<32x400xbf16, #tpu.memory_space<vmem>>, vector<32x400xbf16>
    %c0_78 = arith.constant 0 : index
    %c0_79 = arith.constant 0 : index
    %76 = vector.load %arg6[%c0_78, %c0_79] : memref<400x648xbf16, #tpu.memory_space<vmem>>, vector<400x648xbf16>
    %cst = arith.constant dense<0.000000e+00> : vector<32x648xf32>
    %77 = tpu.matmul %75, %76, %cst {dimension_numbers = #tpu.dot_dimension_numbers<[1], [0], [0], [1], [0, 0, 1, 1], [], []>} : vector<32x400xbf16>, vector<400x648xbf16>, vector<32x648xf32> -> vector<32x648xf32>
    %c0_80 = arith.constant 0 : index
    %c0_81 = arith.constant 0 : index
    %78 = vector.load %arg3[%c0_80, %c0_81] : memref<32x1xf32, #tpu.memory_space<vmem>>, vector<32x1xf32>
    %79 = vector.broadcast %78 : vector<32x1xf32> to vector<32x648xf32>
    %80 = arith.mulf %77, %79 : vector<32x648xf32>
    %c0_82 = arith.constant 0 : index
    %c0_83 = arith.constant 0 : index
    %81 = vector.load %arg4[%c0_82, %c0_83] : memref<32x1xf32, #tpu.memory_space<vmem>>, vector<32x1xf32>
    %82 = vector.broadcast %81 : vector<32x1xf32> to vector<32x648xf32>
    %83 = arith.addf %80, %82 : vector<32x648xf32>
    %cst_84 = arith.constant 0.000000e+00 : f32
    %84 = vector.broadcast %cst_84 : f32 to vector<32x648xf32>
    %85 = arith.maximumf %83, %84 : vector<32x648xf32>
    %86 = vector.extract_strided_slice %85 {offsets = [0, 0], sizes = [32, 647], strides = [1, 1]} : vector<32x648xf32> to vector<32x647xf32>
    %87 = vector.extract_strided_slice %85 {offsets = [0, 1], sizes = [32, 647], strides = [1, 1]} : vector<32x648xf32> to vector<32x647xf32>
    %88 = arith.maximumf %86, %87 : vector<32x647xf32>
    %89 = vector.extract_strided_slice %88 {offsets = [0, 0], sizes = [32, 629], strides = [1, 1]} : vector<32x647xf32> to vector<32x629xf32>
    %90 = vector.extract_strided_slice %88 {offsets = [0, 18], sizes = [32, 629], strides = [1, 1]} : vector<32x647xf32> to vector<32x629xf32>
    %91 = arith.maximumf %89, %90 : vector<32x629xf32>
    %92 = arith.truncf %91 : vector<32x629xf32> to vector<32x629xbf16>
    %c0_85 = arith.constant 0 : index
    %c0_86 = arith.constant 0 : index
    %c0_87 = arith.constant 0 : index
    %93 = vector.load %arg5[%c0_85, %c0_86, %c0_87] : memref<1x32x648xbf16, #tpu.memory_space<vmem>>, vector<1x32x629xbf16>
    %94 = vector.shape_cast %93 : vector<1x32x629xbf16> to vector<32x629xbf16>
    %95 = vector.shape_cast %92 : vector<32x629xbf16> to vector<1x32x629xbf16>
    tpu.vector_store %arg5[%c0_85, %c0_86, %c0_87], %95 {strides = array<i32>} : memref<1x32x648xbf16, #tpu.memory_space<vmem>>, vector<1x32x629xbf16>,
    %cst_88 = arith.constant 0.000000e+00 : bf16
    %96 = vector.broadcast %cst_88 : bf16 to vector<32x19xbf16>
    %c0_89 = arith.constant 0 : index
    %c0_90 = arith.constant 0 : index
    %c629 = arith.constant 629 : index
    %97 = vector.load %arg5[%c0_89, %c0_90, %c629] : memref<1x32x648xbf16, #tpu.memory_space<vmem>>, vector<1x32x19xbf16>
    %98 = vector.shape_cast %97 : vector<1x32x19xbf16> to vector<32x19xbf16>
    %99 = vector.shape_cast %96 : vector<32x19xbf16> to vector<1x32x19xbf16>
    tpu.vector_store %arg5[%c0_89, %c0_90, %c629], %99 {strides = array<i32>} : memref<1x32x648xbf16, #tpu.memory_space<vmem>>, vector<1x32x19xbf16>,
    return
  }
  func.func @transform_0(%arg0: i32) -> (i32, i32, i32) {
    %c0_i32 = arith.constant 0 : i32
    %c0_i32_0 = arith.constant 0 : i32
    %c0_i32_1 = arith.constant 0 : i32
    return %arg0, %c0_i32, %c0_i32_0 : i32, i32, i32
  }
  func.func @transform_1(%arg0: i32) -> (i32, i32) {
    %c0_i32 = arith.constant 0 : i32
    %c0_i32_0 = arith.constant 0 : i32
    %c0_i32_1 = arith.constant 0 : i32
    return %c0_i32, %c0_i32_0 : i32, i32
  }
  func.func @transform_2(%arg0: i32) -> (i32, i32) {
    %c0_i32 = arith.constant 0 : i32
    %c0_i32_0 = arith.constant 0 : i32
    %c0_i32_1 = arith.constant 0 : i32
    return %c0_i32, %c0_i32_0 : i32, i32
  }
  func.func @transform_3(%arg0: i32) -> (i32, i32) {
    %c0_i32 = arith.constant 0 : i32
    %c0_i32_0 = arith.constant 0 : i32
    %c0_i32_1 = arith.constant 0 : i32
    return %c0_i32, %c0_i32_0 : i32, i32
  }
  func.func @transform_4(%arg0: i32) -> (i32, i32, i32) {
    %c0_i32 = arith.constant 0 : i32
    %c0_i32_0 = arith.constant 0 : i32
    %c0_i32_1 = arith.constant 0 : i32
    return %arg0, %c0_i32, %c0_i32_0 : i32, i32, i32
  }
}

module attributes {stable_mosaic.version = 11 : i64} {
  func.func @_fc_kernel(%arg0: memref<2x10368xbf16, #tpu.memory_space<vmem>>, %arg1: memref<10368x10xbf16, #tpu.memory_space<vmem>>, %arg2: memref<1x10xf32, #tpu.memory_space<vmem>>, %arg3: memref<2x10xf32, #tpu.memory_space<vmem>>) attributes {dimension_semantics = [], scalar_prefetch = 0 : i64, scratch_operands = 0 : i64, tpu.core_type = #tpu.core_type<tc>} {
    %c0 = arith.constant 0 : index
    %c0_0 = arith.constant 0 : index
    %0 = vector.load %arg0[%c0, %c0_0] : memref<2x10368xbf16, #tpu.memory_space<vmem>>, vector<2x10368xbf16>
    %c0_1 = arith.constant 0 : index
    %c0_2 = arith.constant 0 : index
    %1 = vector.load %arg1[%c0_1, %c0_2] : memref<10368x10xbf16, #tpu.memory_space<vmem>>, vector<10368x10xbf16>
    %cst = arith.constant dense<0.000000e+00> : vector<2x10xf32>
    %2 = tpu.matmul %0, %1, %cst {dimension_numbers = #tpu.dot_dimension_numbers<[1], [0], [0], [1], [0, 0, 1, 1], [], []>} : vector<2x10368xbf16>, vector<10368x10xbf16>, vector<2x10xf32> -> vector<2x10xf32>
    %c0_3 = arith.constant 0 : index
    %c0_4 = arith.constant 0 : index
    %3 = vector.load %arg2[%c0_3, %c0_4] : memref<1x10xf32, #tpu.memory_space<vmem>>, vector<1x10xf32>
    %4 = vector.broadcast %3 : vector<1x10xf32> to vector<2x10xf32>
    %5 = arith.addf %2, %4 : vector<2x10xf32>
    %c0_5 = arith.constant 0 : index
    %c0_6 = arith.constant 0 : index
    %6 = vector.load %arg3[%c0_5, %c0_6] : memref<2x10xf32, #tpu.memory_space<vmem>>, vector<2x10xf32>
    tpu.vector_store %arg3[%c0_5, %c0_6], %5 {strides = array<i32>} : memref<2x10xf32, #tpu.memory_space<vmem>>, vector<2x10xf32>,
    return
  }
}

</mosaic_0001>

<bundles_post_ra>
// kernel: convnet_forward.3
= control target key start
LH: loop header
LB: loop body
LE: loop exit
PB: predicated region body
PF: predicated region fallthrough
CT: control target
= control target key end

     0   :  { %9 = vsyncpa [#allocation3], 0  ;;  %s950_s15 = smov [#allocation2]   ;;  %s1257_s0 = inlined_call_operand.vmem [shape: bf16[1,4,25,392], index: 0, kind: input, shape index: {}]   ;;  %s1258_s1 = inlined_call_operand.hbm [shape: bf16[16,25], index: 1, kind: input, shape index: {}]   ;;  %s1259_s2 = inlined_call_operand.vmem [shape: f32[16,1], index: 2, kind: input, shape index: {}]   ;;  %s1260_s3 = inlined_call_operand.vmem [shape: f32[16,1], index: 3, kind: input, shape index: {}]   ;;  %s1261_s4 = inlined_call_operand.vmem [shape: bf16[1,16,392], index: 4, kind: output, shape index: {}]  }
   0x1   :  { %s17_s16 = sshll.u32 %s950_s15, 4  ;;  %s926_s19 = scalar_lea.hbm %s1258_s1, 128  ;;  %s18_s16 = int_to_ptr.vmem [resolvable:$true] %s17_s16 }
   0x2   :  { %p927_p0 = scmp.ne.s32.totalorder %s1258_s1, %s926_s19  ;;  %p930_p1 = scmp.lt.u32.totalorder %s926_s19, %s1258_s1 }
   0x4   :  { %p932_p2 = pnand %p930_p1, %p927_p0 }
   0x6   :  { %935 = shalt.err (!%p932_p2)
}
   0x7   :  { %s936_s24 = scalar_lea.vmem %s18_s16, 128  ;;  %p941_p4 = scmp.lt.s32.totalorder %s18_s16, %s18_s16 }
   0x8   :  { %p937_p3 = scmp.ne.s32.totalorder %s18_s16, %s936_s24  ;;  %p942_p5 = scmp.lt.s32.totalorder %s936_s24, %s936_s24 }
   0xa   :  { %p943_p6 = por %p942_p5, %p941_p4 }
   0xc   :  { %p944_p7 = pnand %p943_p6, %p937_p3 }
   0xe   :  { %947 = shalt.err (!%p944_p7)
}
   0xf   :  { %s951_s25 = smov 64   ;;  %s952_s26 = smov 4  }
  0x10   :  { %23 = dma.hbm_to_vmem [thread:$0]  %s1258_s1, 128, %s18_s16, [#allocation3], %s951_s25, %s951_s25, %s952_s26  }
  0x11   :  { %948 = dma.done.wait [#allocation3], 128  }
  0x12   :  { %949 = vsyncadd [#allocation3], 4294967168  ;;  %v953_v0 = vmov 0   ;;  %vm111_vm0 = vcmask 1043456   ;;  %vm112_vm1 = vcmask 1044480   ;;  %v954_v1 = vmov 65535  }
  0x13   :  { %159 = vmatprep.mubr.bf16.mxu0 %v953_v0  ;;  %202 = vmatprep.mubr.bf16.mxu1 %v953_v0  ;;  %v113_v2 = vsel %vm111_vm0, 4294967295, %v954_v1  ;;  %v877_v3 = vld [vmem:[%s1257_s0 + $0x4] ss:$16 sps:$4 sm:$0xff]   ;;  %v879_v4 = vld [vmem:[%s1257_s0 + $0xc] ss:$16 sps:$4 sm:$0xff]   ;;  %vm107_vm2 = vcmask 203776  }
  0x14   :  { %875 = vset.pattern.permute.xlu0 %v953_v0  ;;  %876 = vset.pattern.permute.xlu1 %v953_v0  ;;  %v881_v5 = vld [vmem:[%s1257_s0] ss:$16 sps:$4 sm:$0xff]   ;;  %v882_v6 = vld [vmem:[%s1257_s0 + $0x8] ss:$16 sps:$4 sm:$0xff]   ;;  %v1009_v7 = vsel %vm112_vm1, %v113_v2, 0  ;;  %vm787_vm3 = vcmask 64516  }
  0x15   :  { %127 = vmatprep.subr.bf16.mxu0 %v877_v3  ;;  %170 = vmatprep.subr.bf16.mxu1 %v879_v4  ;;  %v883_v8 = vld [vmem:[%s1257_s0 + $0x24] ss:$16 sps:$4 sm:$0x1f]   ;;  %v885_v9 = vld [vmem:[%s1257_s0 + $0x2c] ss:$16 sps:$4 sm:$0x1f]   ;;  %vm788_vm4 = vmor %vm787_vm3, %vm111_vm0 }
  0x16   :  { %128 = vmatpush1.bf16.msra.mxu0 %v881_v5  ;;  %171 = vmatpush1.bf16.msra.mxu1 %v882_v6  ;;  %v119_v10 = vand.u32 %v883_v8, %v1009_v7  ;;  %v887_v11 = vld [vmem:[%s1257_s0 + $0x20] ss:$16 sps:$4 sm:$0x1f]   ;;  %v888_v12 = vld [vmem:[%s1257_s0 + $0x28] ss:$16 sps:$4 sm:$0x1f]   ;;  %v125_v13 = vand.u32 %v885_v9, %v1009_v7 }
  0x17   :  { %v1025_v14 = vld [vmem:[#allocation2] sm:$0xff]   ;;  %v116_v15 = vand.u32 %v887_v11, %v1009_v7  ;;  %v122_v16 = vand.u32 %v888_v12, %v1009_v7  ;;  %v893_v19 = vld [vmem:[%s1257_s0 + $0x48] ss:$16 sps:$4 sm:$0xff]   ;;  %v895_v20 = vld [vmem:[%s1257_s0 + $0x4c] ss:$16 sps:$4 sm:$0xff]  }
  0x18   :  { %129 = vmatprep.subr.bf16.mxu0 %v119_v10  ;;  %v890_v17 = vld [vmem:[%s1257_s0 + $0x40] ss:$16 sps:$4 sm:$0xff]   ;;  %v892_v18 = vld [vmem:[%s1257_s0 + $0x44] ss:$16 sps:$4 sm:$0xff]   ;;  %172 = vmatprep.subr.bf16.mxu1 %v125_v13  ;;  %v907_v30 = vld [vmem:[%s1257_s0 + $0x8c] ss:$16 sps:$4 sm:$0xff]  }
  0x19   :  { %v896_v21 = vld [vmem:[%s1257_s0 + $0x60] ss:$16 sps:$4 sm:$0x1f]   ;;  %v898_v22 = vld [vmem:[%s1257_s0 + $0x64] ss:$16 sps:$4 sm:$0x1f]  }
  0x1a   :  { %130 = vmatpush1.bf16.msra.mxu0 %v116_v15  ;;  %173 = vmatpush1.bf16.msra.mxu1 %v122_v16  ;;  %v899_v23 = vld [vmem:[%s1257_s0 + $0x68] ss:$16 sps:$4 sm:$0x1f]   ;;  %v286_v24 = vand.u32 %v898_v22, %v1009_v7  ;;  %v901_v25 = vld [vmem:[%s1257_s0 + $0x6c] ss:$16 sps:$4 sm:$0x1f]   ;;  %v283_v26 = vand.u32 %v896_v21, %v1009_v7 }
  0x1b   :  { %294 = vmatprep.subr.bf16.mxu0 %v892_v18  ;;  %337 = vmatprep.subr.bf16.mxu1 %v895_v20  ;;  %v289_v27 = vand.u32 %v899_v23, %v1009_v7  ;;  %v292_v28 = vand.u32 %v901_v25, %v1009_v7  ;;  %v904_v29 = vld [vmem:[%s1257_s0 + $0x84] ss:$16 sps:$4 sm:$0xff]   ;;  %v902_v31 = vld [vmem:[%s1257_s0 + $0x80] ss:$16 sps:$4 sm:$0xff]   ;;  %v905_v32 = vld [vmem:[%s1257_s0 + $0x88] ss:$16 sps:$4 sm:$0xff]  }
  0x1c   :  { %v908_v33 = vld [vmem:[%s1257_s0 + $0xa0] ss:$16 sps:$4 sm:$0x1f]   ;;  %v910_v34 = vld [vmem:[%s1257_s0 + $0xa4] ss:$16 sps:$4 sm:$0x1f]  }
  0x1d   :  { %806 = vmatmul.mubr.msk.bf16.vlgmr.msra.gmra.mrb[0].mxu0 %vm107_vm2, %v1025_v14  ;;  %807 = vmatmul.mubr.msk.bf16.vlgmr.msra.gmra.mrb[0].mxu1 %vm107_vm2, %v1025_v14  ;;  %v911_v35 = vld [vmem:[%s1257_s0 + $0xa8] ss:$16 sps:$4 sm:$0x1f]   ;;  %v913_v36 = vld [vmem:[%s1257_s0 + $0xac] ss:$16 sps:$4 sm:$0x1f]   ;;  %v461_v37 = vand.u32 %v910_v34, %v1009_v7  ;;  %v458_v40 = vand.u32 %v908_v33, %v1009_v7 }
  0x1e   :  { %295 = vmatpush1.bf16.msra.mxu0 %v890_v17  ;;  %338 = vmatpush1.bf16.msra.mxu1 %v893_v19  ;;  %v467_v38 = vand.u32 %v913_v36, %v1009_v7  ;;  %v916_v39 = vld [vmem:[%s1257_s0 + $0xc4] ss:$16 sps:$4 sm:$0xff]   ;;  %v464_v41 = vand.u32 %v911_v35, %v1009_v7  ;;  %v919_v42 = vld [vmem:[%s1257_s0 + $0xcc] ss:$16 sps:$4 sm:$0xff]   ;;  %v914_v46 = vld [vmem:[%s1257_s0 + $0xc0] ss:$16 sps:$4 sm:$0xff]  }
  0x1f   :  { %296 = vmatprep.subr.bf16.mxu0 %v286_v24  ;;  %326 = vmatprep.mubr.bf16.mxu0 %v953_v0  ;;  %v922_v43 = vld [vmem:[%s1257_s0 + $0xe4] ss:$16 sps:$4 sm:$0x1f]   ;;  %v925_v45 = vld [vmem:[%s1257_s0 + $0xec] ss:$16 sps:$4 sm:$0x1f]  }
  0x20   :  { %369 = vmatprep.mubr.bf16.mxu1 %v953_v0  ;;  %339 = vmatprep.subr.bf16.mxu1 %v292_v28  ;;  %v34_v44 = vld [vmem:[%s1259_s2] sm:$0xff]  ;;  %v917_v47 = vld [vmem:[%s1257_s0 + $0xc8] ss:$16 sps:$4 sm:$0xff]   ;;  %v628_v51 = vand.u32 %v922_v43, %v1009_v7  ;;  %v634_v52 = vand.u32 %v925_v45, %v1009_v7 }
  0x21   :  { %38 = vperm.xlu0 %875, %v34_v44   ;;  %v46_v48 = vld [vmem:[%s1260_s3] sm:$0xff]  ;;  %v923_v50 = vld [vmem:[%s1257_s0 + $0xe8] ss:$16 sps:$4 sm:$0x1f]  }
  0x22   :  { %297 = vmatpush1.bf16.msra.mxu0 %v283_v26  ;;  %340 = vmatpush1.bf16.msra.mxu1 %v289_v27  ;;  %v920_v49 = vld [vmem:[%s1257_s0 + $0xe0] ss:$16 sps:$4 sm:$0x1f]   ;;  %v631_v54 = vand.u32 %v923_v50, %v1009_v7  ;;  %v35_v55 = vld [vmem:[%s1259_s2 + $0x8] sm:$0xff] }
  0x23   :  { %469 = vmatprep.subr.bf16.mxu0 %v904_v29  ;;  %512 = vmatprep.subr.bf16.mxu1 %v907_v30  ;;  %v625_v53 = vand.u32 %v920_v49, %v1009_v7  ;;  %v47_v56 = vld [vmem:[%s1260_s3 + $0x8] sm:$0xff] }
  0x24   :  { %50 = vperm.xlu1 %876, %v46_v48  }
  0x25   :  { %824 = vmatmul.mubr.msk.bf16.vlgmr.msra.gmra.mrb[4].mxu0 %vm107_vm2, %v1025_v14  ;;  %825 = vmatmul.mubr.msk.bf16.vlgmr.msra.gmra.mrb[4].mxu1 %vm107_vm2, %v1025_v14 }
  0x26   :  { %470 = vmatpush1.bf16.msra.mxu0 %v902_v31  ;;  %513 = vmatpush1.bf16.msra.mxu1 %v905_v32 }
  0x27   :  { %471 = vmatprep.subr.bf16.mxu0 %v461_v37  ;;  %514 = vmatprep.subr.bf16.mxu1 %v467_v38 }
  0x28   :  { %501 = vmatprep.mubr.bf16.mxu0 %v953_v0  ;;  %544 = vmatprep.mubr.bf16.mxu1 %v953_v0 }
  0x29   :  { %43 = vperm.xlu0 %875, %v35_v55   ;;  %55 = vperm.xlu1 %876, %v47_v56  }
  0x2a   :  { %472 = vmatpush1.bf16.msra.mxu0 %v458_v40  ;;  %515 = vmatpush1.bf16.msra.mxu1 %v464_v41 }
  0x2b   :  { %636 = vmatprep.subr.bf16.mxu0 %v916_v39  ;;  %679 = vmatprep.subr.bf16.mxu1 %v919_v42 }
  0x2d   :  { %842 = vmatmul.mubr.msk.bf16.vlgmr.msra.gmra.mrb[8].mxu0 %vm107_vm2, %v1025_v14  ;;  %843 = vmatmul.mubr.msk.bf16.vlgmr.msra.gmra.mrb[8].mxu1 %vm107_vm2, %v1025_v14 }
  0x2e   :  { %637 = vmatpush1.bf16.msra.mxu0 %v914_v46  ;;  %680 = vmatpush1.bf16.msra.mxu1 %v917_v47 }
  0x2f   :  { %638 = vmatprep.subr.bf16.mxu0 %v628_v51  ;;  %681 = vmatprep.subr.bf16.mxu1 %v634_v52 }
  0x30   :  { %668 = vmatprep.mubr.bf16.mxu0 %v953_v0  ;;  %711 = vmatprep.mubr.bf16.mxu1 %v953_v0 }
  0x32   :  { %639 = vmatpush1.bf16.msra.mxu0 %v625_v53  ;;  %682 = vmatpush1.bf16.msra.mxu1 %v631_v54 }
  0x35   :  { %860 = vmatmul.mubr.msk.bf16.vlgmr.msra.gmra.mrb[12].mxu0 %vm107_vm2, %v1025_v14  ;;  %861 = vmatmul.mubr.msk.bf16.vlgmr.msra.gmra.mrb[12].mxu1 %vm107_vm2, %v1025_v14 }
  0xa0   :  { %v1147_v57 = vpop.permute.xlu0 %38 }
  0xa3   :  { %v1149_v58 = vpop.permute.xlu1 %50 }
  0xa8   :  { %v1151_v59 = vpop.permute.xlu0 %43  ;;  %v1153_v60 = vpop.permute.xlu1 %55 }
  0xf0   :  { %v161_v61 = vpop.f32.mrb[0].mxu0  ;;  %v204_v62 = vpop.f32.mrb[0].mxu1 }
  0xf1   :  { %v213_v63 = vmul.f32 %v161_v61, %v1147_v57  ;;  %v215_v0 = vmul.f32 %v204_v62, %v1147_v57  ;;  %v163_v1 = vpop.f32.mrb[1].mxu0  ;;  %v206_v2 = vpop.f32.mrb[1].mxu1 }
  0xf2   :  { %v214_v3 = vmul.f32 %v163_v1, %v1147_v57  ;;  %v216_v4 = vmul.f32 %v206_v2, %v1147_v57  ;;  %v165_v5 = vpop.f32.mrb[2].mxu0  ;;  %v208_v6 = vpop.f32.mrb[2].mxu1 }
  0xf3   :  { %v221_v7 = vadd.f32 %v213_v63, %v1149_v58  ;;  %v223_v8 = vadd.f32 %v215_v0, %v1149_v58  ;;  %v217_v9 = vmul.f32 %v165_v5, %v1151_v59  ;;  %v219_v10 = vmul.f32 %v208_v6, %v1151_v59  ;;  %v167_v11 = vpop.f32.mrb[3].mxu0  ;;  %v210_v12 = vpop.f32.mrb[3].mxu1 }
  0xf4   :  { %v222_v13 = vadd.f32 %v214_v3, %v1149_v58  ;;  %v224_v14 = vadd.f32 %v216_v4, %v1149_v58  ;;  %v218_v15 = vmul.f32 %v167_v11, %v1151_v59  ;;  %v220_v16 = vmul.f32 %v210_v12, %v1151_v59 }
  0xf5   :  { %v225_v17 = vadd.f32 %v217_v9, %v1153_v60  ;;  %v227_v18 = vadd.f32 %v219_v10, %v1153_v60  ;;  %v229_v21 = vmax.f32 %v221_v7, 0.0  ;;  %v231_v22 = vmax.f32 %v223_v8, 0.0 }
  0xf6   :  { %v226_v19 = vadd.f32 %v218_v15, %v1153_v60  ;;  %v228_v20 = vadd.f32 %v220_v16, %v1153_v60  ;;  %v230_v23 = vmax.f32 %v222_v13, 0.0  ;;  %v232_v24 = vmax.f32 %v224_v14, 0.0 }
  0xf7   :  { %v233_v31 = vmax.f32 %v225_v17, 0.0  ;;  %v235_v32 = vmax.f32 %v227_v18, 0.0 }
  0xf8   :  { %v328_v25 = vpop.f32.mrb[4].mxu0  ;;  %v371_v26 = vpop.f32.mrb[4].mxu1  ;;  %v234_v37 = vmax.f32 %v226_v19, 0.0  ;;  %v236_v38 = vmax.f32 %v228_v20, 0.0 }
  0xf9   :  { %v380_v27 = vmul.f32 %v328_v25, %v1147_v57  ;;  %v382_v28 = vmul.f32 %v371_v26, %v1147_v57  ;;  %v330_v29 = vpop.f32.mrb[5].mxu0  ;;  %v373_v30 = vpop.f32.mrb[5].mxu1 }
  0xfa   :  { %v381_v33 = vmul.f32 %v330_v29, %v1147_v57  ;;  %v383_v34 = vmul.f32 %v373_v30, %v1147_v57  ;;  %v332_v35 = vpop.f32.mrb[6].mxu0  ;;  %v375_v36 = vpop.f32.mrb[6].mxu1 }
  0xfb   :  { %v388_v39 = vadd.f32 %v380_v27, %v1149_v58  ;;  %v390_v40 = vadd.f32 %v382_v28, %v1149_v58  ;;  %v384_v41 = vmul.f32 %v332_v35, %v1151_v59  ;;  %v386_v42 = vmul.f32 %v375_v36, %v1151_v59  ;;  %v334_v43 = vpop.f32.mrb[7].mxu0  ;;  %v377_v44 = vpop.f32.mrb[7].mxu1 }
  0xfc   :  { %v389_v45 = vadd.f32 %v381_v33, %v1149_v58  ;;  %v391_v46 = vadd.f32 %v383_v34, %v1149_v58  ;;  %v385_v47 = vmul.f32 %v334_v43, %v1151_v59  ;;  %v387_v48 = vmul.f32 %v377_v44, %v1151_v59 }
  0xfd   :  { %v396_v49 = vmax.f32 %v388_v39, 0.0  ;;  %v398_v50 = vmax.f32 %v390_v40, 0.0  ;;  %v392_v51 = vadd.f32 %v384_v41, %v1153_v60  ;;  %v394_v52 = vadd.f32 %v386_v42, %v1153_v60 }
  0xfe   :  { %v397_v53 = vmax.f32 %v389_v45, 0.0  ;;  %v399_v54 = vmax.f32 %v391_v46, 0.0  ;;  %v393_v55 = vadd.f32 %v385_v47, %v1153_v60  ;;  %v395_v56 = vadd.f32 %v387_v48, %v1153_v60 }
  0xff   :  { %v1187_v61 = vmax.f32 %v229_v21, %v396_v49  ;;  %v1189_v62 = vmax.f32 %v231_v22, %v398_v50  ;;  %v400_v63 = vmax.f32 %v392_v51, 0.0  ;;  %v402_v0 = vmax.f32 %v394_v52, 0.0 }
 0x100   :  { %v1191_v1 = vmax.f32 %v230_v23, %v397_v53  ;;  %v1193_v2 = vmax.f32 %v232_v24, %v399_v54  ;;  %v401_v3 = vmax.f32 %v393_v55, 0.0  ;;  %v403_v4 = vmax.f32 %v395_v56, 0.0  ;;  %v503_v5 = vpop.f32.mrb[8].mxu0  ;;  %v546_v6 = vpop.f32.mrb[8].mxu1 }
 0x101   :  { %v1195_v7 = vmax.f32 %v233_v31, %v400_v63  ;;  %v1197_v8 = vmax.f32 %v235_v32, %v402_v0  ;;  %v555_v9 = vmul.f32 %v503_v5, %v1147_v57  ;;  %v557_v10 = vmul.f32 %v546_v6, %v1147_v57  ;;  %v505_v11 = vpop.f32.mrb[9].mxu0  ;;  %v548_v12 = vpop.f32.mrb[9].mxu1 }
 0x102   :  { %v1201_v13 = vmax.f32 %v234_v37, %v401_v3  ;;  %v1203_v14 = vmax.f32 %v236_v38, %v403_v4  ;;  %v556_v15 = vmul.f32 %v505_v11, %v1147_v57  ;;  %v558_v16 = vmul.f32 %v548_v12, %v1147_v57  ;;  %v507_v17 = vpop.f32.mrb[10].mxu0  ;;  %v550_v18 = vpop.f32.mrb[10].mxu1 }
 0x103   :  { %v563_v19 = vadd.f32 %v555_v9, %v1149_v58  ;;  %v565_v20 = vadd.f32 %v557_v10, %v1149_v58  ;;  %v559_v21 = vmul.f32 %v507_v17, %v1151_v59  ;;  %v561_v22 = vmul.f32 %v550_v18, %v1151_v59  ;;  %v509_v23 = vpop.f32.mrb[11].mxu0  ;;  %v552_v24 = vpop.f32.mrb[11].mxu1 }
 0x104   :  { %v564_v25 = vadd.f32 %v556_v15, %v1149_v58  ;;  %v566_v26 = vadd.f32 %v558_v16, %v1149_v58  ;;  %v560_v27 = vmul.f32 %v509_v23, %v1151_v59  ;;  %v562_v28 = vmul.f32 %v552_v24, %v1151_v59 }
 0x105   :  { %v567_v29 = vadd.f32 %v559_v21, %v1153_v60  ;;  %v569_v30 = vadd.f32 %v561_v22, %v1153_v60  ;;  %v571_v33 = vmax.f32 %v563_v19, 0.0  ;;  %v573_v34 = vmax.f32 %v565_v20, 0.0 }
 0x106   :  { %v568_v31 = vadd.f32 %v560_v27, %v1153_v60  ;;  %v570_v32 = vadd.f32 %v562_v28, %v1153_v60  ;;  %v572_v35 = vmax.f32 %v564_v25, 0.0  ;;  %v574_v36 = vmax.f32 %v566_v26, 0.0 }
 0x107   :  { %v575_v39 = vmax.f32 %v567_v29, 0.0  ;;  %v577_v40 = vmax.f32 %v569_v30, 0.0 }
 0x108   :  { %v670_v37 = vpop.f32.mrb[12].mxu0  ;;  %v713_v38 = vpop.f32.mrb[12].mxu1  ;;  %v576_v45 = vmax.f32 %v568_v31, 0.0  ;;  %v578_v46 = vmax.f32 %v570_v32, 0.0 }
 0x109   :  { %v722_v41 = vmul.f32 %v670_v37, %v1147_v57  ;;  %v724_v42 = vmul.f32 %v713_v38, %v1147_v57  ;;  %v672_v43 = vpop.f32.mrb[13].mxu0  ;;  %v715_v44 = vpop.f32.mrb[13].mxu1 }
 0x10a   :  { %v723_v47 = vmul.f32 %v672_v43, %v1147_v57  ;;  %v725_v48 = vmul.f32 %v715_v44, %v1147_v57  ;;  %v674_v49 = vpop.f32.mrb[14].mxu0  ;;  %v717_v50 = vpop.f32.mrb[14].mxu1 }
 0x10b   :  { %v730_v51 = vadd.f32 %v722_v41, %v1149_v58  ;;  %v732_v52 = vadd.f32 %v724_v42, %v1149_v58  ;;  %v726_v53 = vmul.f32 %v674_v49, %v1151_v59  ;;  %v728_v54 = vmul.f32 %v717_v50, %v1151_v59  ;;  %v676_v55 = vpop.f32.mrb[15].mxu0  ;;  %v719_v56 = vpop.f32.mrb[15].mxu1 }
 0x10c   :  { %v731_v63 = vadd.f32 %v723_v47, %v1149_v58  ;;  %v733_v0 = vadd.f32 %v725_v48, %v1149_v58  ;;  %v727_v3 = vmul.f32 %v676_v55, %v1151_v59  ;;  %v729_v57 = vmul.f32 %v719_v56, %v1151_v59 }
 0x10d   :  { %v738_v4 = vmax.f32 %v730_v51, 0.0  ;;  %v740_v5 = vmax.f32 %v732_v52, 0.0  ;;  %v734_v6 = vadd.f32 %v726_v53, %v1153_v60  ;;  %v736_v9 = vadd.f32 %v728_v54, %v1153_v60 }
 0x10e   :  { %v739_v10 = vmax.f32 %v731_v63, 0.0  ;;  %v741_v11 = vmax.f32 %v733_v0, 0.0  ;;  %v735_v12 = vadd.f32 %v727_v3, %v1153_v60  ;;  %v737_v15 = vadd.f32 %v729_v57, %v1153_v60 }
 0x10f   :  { %v746_v16 = vmax.f32 %v571_v33, %v738_v4  ;;  %v748_v17 = vmax.f32 %v573_v34, %v740_v5  ;;  %v742_v18 = vmax.f32 %v734_v6, 0.0  ;;  %v744_v58 = vmax.f32 %v736_v9, 0.0 }
 0x110   :  { %v747_v19 = vmax.f32 %v572_v35, %v739_v10  ;;  %v749_v20 = vmax.f32 %v574_v36, %v741_v11  ;;  %v743_v21 = vmax.f32 %v735_v12, 0.0  ;;  %v745_v59 = vmax.f32 %v737_v15, 0.0 }
 0x111   :  { %v754_v22 = vmax.f32 %v1187_v61, %v746_v16  ;;  %v756_v23 = vmax.f32 %v1189_v62, %v748_v17  ;;  %v750_v24 = vmax.f32 %v575_v39, %v742_v18  ;;  %v752_v25 = vmax.f32 %v577_v40, %v744_v58 }
 0x112   :  { %v755_v26 = vmax.f32 %v1191_v1, %v747_v19  ;;  %v757_v27 = vmax.f32 %v1193_v2, %v749_v20  ;;  %v751_v28 = vmax.f32 %v576_v45, %v743_v21  ;;  %v753_v60 = vmax.f32 %v578_v46, %v745_v59 }
 0x113   :  { %v758_v29 = vmax.f32 %v1195_v7, %v750_v24  ;;  %v760_v30 = vmax.f32 %v1197_v8, %v752_v25 }
 0x114   :  { %v866_v31 = vpack.c.bf16 %v755_v26, %v754_v22  ;;  %v867_v32 = vpack.c.bf16 %v757_v27, %v756_v23  ;;  %v759_v61 = vmax.f32 %v1201_v13, %v751_v28  ;;  %v761_v62 = vmax.f32 %v1203_v14, %v753_v60 }
 0x116   :  { %786 = vst [vmem:[%s1261_s4] sm:$0xff] %v866_v31  ;;  %789 = vst.msk [vmem:[%s1261_s4 + $0x8] sm:$0xff] %vm788_vm4, %v867_v32  ;;  %v868_v1 = vpack.c.bf16 %v759_v61, %v758_v29  ;;  %v869_v2 = vpack.c.bf16 %v761_v62, %v760_v30 }
 0x118   :  { %790 = vst [vmem:[%s1261_s4 + $0x10] sm:$0xff] %v868_v1  ;;  %791 = vst.msk [vmem:[%s1261_s4 + $0x18] sm:$0xff] %vm788_vm4, %v869_v2 }
 0x119   :  { %796 = vsyncpa [#allocation3], 1 }

// kernel: convnet_forward.4
= control target key start
LH: loop header
LB: loop body
LE: loop exit
PB: predicated region body
PF: predicated region fallthrough
CT: control target
= control target key end

     0   :  { %s2888_s19 = smov 127   ;;  %s2889_s22 = smov 126   ;;  %vm103_vm0 = vcmask 1039360   ;;  %vm163_vm1 = vcmask 1031168   ;;  %vm223_vm2 = vcmask 1022976   ;;  %vm1697_vm3 = vcmask 130048   ;;  %s4090_s0 = inlined_call_operand.vmem [shape: bf16[1,16,724], index: 0, kind: input, shape index: {}]   ;;  %s4091_s1 = inlined_call_operand.vmem [shape: bf16[32,400], index: 1, kind: input, shape index: {}]   ;;  %s4092_s2 = inlined_call_operand.vmem [shape: f32[32,1], index: 2, kind: input, shape index: {}]   ;;  %s4093_s3 = inlined_call_operand.vmem [shape: f32[32,1], index: 3, kind: input, shape index: {}]   ;;  %s4094_s4 = inlined_call_operand.vmem [shape: bf16[1,32,648], index: 4, kind: output, shape index: {}]  }
   0x1   :  { %v2941_v0 = vld [vmem:[%s4090_s0 + $0x4] ss:$24 sps:$4 sm:$0xff]   ;;  %v2946_v1 = vld [vmem:[%s4090_s0] ss:$24 sps:$4 sm:$0xff]   ;;  %s2890_s23 = smov 125   ;;  %s2891_s26 = smov 124  }
   0x2   :  { %93 = vrot.lane.b32.xlu0 %v2941_v0, %s2888_s19  ;;  %v2953_v2 = vld [vmem:[%s4090_s0 + $0x8] ss:$24 sps:$4 sm:$0xff]   ;;  %1704 = vmatprep.subr.bf16.mxu1 %v2941_v0  ;;  %s2892_s27 = smov 110   ;;  %s2893_s28 = smov 109   ;;  %v3109_v17 = vld [vmem:[%s4091_s1 + $0x4] ss:$16 sps:$4 sm:$0xff]  }
   0x3   :  { %91 = vrot.lane.b32.xlu1 %v2946_v1, %s2888_s19  ;;  %1705 = vmatpush1.bf16.msra.mxu1 %v2946_v1  ;;  %v2974_v3 = vld [vmem:[%s4090_s0 + $0x10] ss:$24 sps:$4 sm:$0xff]   ;;  %s2894_s29 = smov 73   ;;  %s2895_s30 = smov 108   ;;  %v3114_v19 = vld [vmem:[%s4090_s0 + $0x14] ss:$24 sps:$4 sm:$0xff]  }
   0x4   :  { %s2896_s5 = smov 72   ;;  %s2897_s6 = smov 107   ;;  %v2874_v20 = vld [vmem:[%s4091_s1 + $0xc] ss:$16 sps:$4 sm:$0xff]   ;;  %vm59_vm4 = vcmask 64512   ;;  %1736 = vmatprep.mubr.bf16.mxu1 %v3109_v17  ;;  %v3129_v24 = vld [vmem:[%s4090_s0 + $0x20] sm:$0xff] }
   0x5   :  { %s2898_s7 = smov 71   ;;  %s2899_s8 = smov 106   ;;  %v3124_v23 = vld [vmem:[%s4090_s0 + $0x8] sm:$0xff]  ;;  %vm283_vm5 = vcmask 1014784   ;;  %60 = vst.msk [vmem:[#allocation2 + $0x28] sm:$0xff] %vm59_vm4, %v3114_v19  ;;  %2662 = vmatprep.mubr.msk.bf16.mxu0 %vm1697_vm3, %v2874_v20  ;;  %vm343_vm6 = vcmask 900096  }
   0x6   :  { %95 = vrot.lane.b32.xlu0 %v2953_v2, %s2888_s19  ;;  %s2900_s9 = smov 70   ;;  %s2901_s10 = smov 92   ;;  %v3134_v25 = vld [vmem:[%s4090_s0 + $0xc] ss:$24 sps:$4 sm:$0xff]   ;;  %v2506_v26 = vcombine.low %v3124_v23, %v3129_v24  ;;  %vm403_vm7 = vcmask 891904   ;;  %vm4105_vm8 = vcmask 596992  }
   0x7   :  { %153 = vrot.lane.b32.xlu1 %v2941_v0, %s2889_s22  ;;  %s2902_s11 = smov 56   ;;  %s2903_s12 = smov 91   ;;  %v3159_v33 = vld [vmem:[%s4090_s0 + $0xc] ss:$24 sps:$4 sm:$0xff]   ;;  %vm463_vm9 = vcmask 883712   ;;  %vm4103_vm10 = vcmask 588800  }
   0x8   :  { %s4097_s13 = smov 55   ;;  %s2905_s14 = smov 90   ;;  %vm523_vm11 = vcmask 875520   ;;  %vm4101_vm12 = vcmask 580608   ;;  %vm583_vm13 = vcmask 867328   ;;  %vm4102_vm14 = vcmask 572416  }
   0x9   :  { %s4095_s15 = smov 54   ;;  %s2907_s16 = smov 89   ;;  %vm643_vm15 = vcmask 752640   ;;  %v3438_v24 = vld [vmem:[%s4091_s1 + $0x20] ss:$16 sps:$4 sm:$0xff]  }
   0xa   :  { %155 = vrot.lane.b32.xlu0 %v2953_v2, %s2889_s22  ;;  %s4099_s17 = smov 53   ;;  %s2909_s18 = smov 88  }
   0xb   :  { %151 = vrot.lane.b32.xlu1 %v2946_v1, %s2889_s22  ;;  %s4112_s24 = smov 54   ;;  %s4113_s25 = smov 53  }
   0xe   :  { %213 = vrot.lane.b32.xlu0 %v2941_v0, %s2890_s23 }
   0xf   :  { %215 = vrot.lane.b32.xlu1 %v2953_v2, %s2890_s23 }
  0x12   :  { %211 = vrot.lane.b32.xlu0 %v2946_v1, %s2890_s23 }
  0x13   :  { %273 = vrot.lane.b32.xlu1 %v2941_v0, %s2891_s26 }
  0x16   :  { %275 = vrot.lane.b32.xlu0 %v2953_v2, %s2891_s26 }
  0x17   :  { %271 = vrot.lane.b32.xlu1 %v2946_v1, %s2891_s26 }
  0x1a   :  { %333 = vrot.lane.b32.xlu0 %v2941_v0, %s2892_s27 }
  0x1b   :  { %335 = vrot.lane.b32.xlu1 %v2953_v2, %s2892_s27 }
  0x1e   :  { %331 = vrot.lane.b32.xlu0 %v2946_v1, %s2892_s27 }
  0x1f   :  { %393 = vrot.lane.b32.xlu1 %v2941_v0, %s2893_s28 }
  0x22   :  { %395 = vrot.lane.b32.xlu0 %v2953_v2, %s2893_s28 }
  0x23   :  { %391 = vrot.lane.b32.xlu1 %v2946_v1, %s2893_s28 }
  0x26   :  { %993 = vrot.lane.b32.xlu0 %v2941_v0, %s2894_s29 }
  0x27   :  { %995 = vrot.lane.b32.xlu1 %v2953_v2, %s2894_s29 }
  0x2a   :  { %453 = vrot.lane.b32.xlu0 %v2941_v0, %s2895_s30 }
  0x2b   :  { %455 = vrot.lane.b32.xlu1 %v2953_v2, %s2895_s30 }
  0x2e   :  { %991 = vrot.lane.b32.xlu0 %v2946_v1, %s2894_s29 }
  0x2f   :  { %451 = vrot.lane.b32.xlu1 %v2946_v1, %s2895_s30 }
  0x32   :  { %1053 = vrot.lane.b32.xlu0 %v2941_v0, %s2896_s5 }
  0x33   :  { %1055 = vrot.lane.b32.xlu1 %v2953_v2, %s2896_s5 }
  0x36   :  { %513 = vrot.lane.b32.xlu0 %v2941_v0, %s2897_s6 }
  0x37   :  { %515 = vrot.lane.b32.xlu1 %v2953_v2, %s2897_s6 }
  0x3a   :  { %1051 = vrot.lane.b32.xlu0 %v2946_v1, %s2896_s5 }
  0x3b   :  { %511 = vrot.lane.b32.xlu1 %v2946_v1, %s2897_s6 }
  0x3e   :  { %1113 = vrot.lane.b32.xlu0 %v2941_v0, %s2898_s7 }
  0x3f   :  { %1115 = vrot.lane.b32.xlu1 %v2953_v2, %s2898_s7 }
  0x42   :  { %573 = vrot.lane.b32.xlu0 %v2941_v0, %s2899_s8 }
  0x43   :  { %575 = vrot.lane.b32.xlu1 %v2953_v2, %s2899_s8 }
  0x46   :  { %1111 = vrot.lane.b32.xlu0 %v2946_v1, %s2898_s7 }
  0x47   :  { %571 = vrot.lane.b32.xlu1 %v2946_v1, %s2899_s8 }
  0x4a   :  { %1173 = vrot.lane.b32.xlu0 %v2941_v0, %s2900_s9 }
  0x4b   :  { %1175 = vrot.lane.b32.xlu1 %v2953_v2, %s2900_s9 }
  0x4e   :  { %633 = vrot.lane.b32.xlu0 %v2941_v0, %s2901_s10 }
  0x4f   :  { %635 = vrot.lane.b32.xlu1 %v2953_v2, %s2901_s10 }
  0x52   :  { %1171 = vrot.lane.b32.xlu0 %v2946_v1, %s2900_s9 }
  0x53   :  { %631 = vrot.lane.b32.xlu1 %v2946_v1, %s2901_s10 }
  0x56   :  { %1233 = vrot.lane.b32.xlu0 %v2941_v0, %s2902_s11 }
  0x57   :  { %1235 = vrot.lane.b32.xlu1 %v2953_v2, %s2902_s11 }
  0x5a   :  { %693 = vrot.lane.b32.xlu0 %v2941_v0, %s2903_s12 }
  0x5b   :  { %695 = vrot.lane.b32.xlu1 %v2953_v2, %s2903_s12 }
  0x5e   :  { %1231 = vrot.lane.b32.xlu0 %v2946_v1, %s2902_s11 }
  0x5f   :  { %691 = vrot.lane.b32.xlu1 %v2946_v1, %s2903_s12 }
  0x62   :  { %1293 = vrot.lane.b32.xlu0 %v2941_v0, %s4097_s13 }
  0x63   :  { %1295 = vrot.lane.b32.xlu1 %v2953_v2, %s4097_s13 }
  0x66   :  { %753 = vrot.lane.b32.xlu0 %v2941_v0, %s2905_s14 }
  0x67   :  { %755 = vrot.lane.b32.xlu1 %v2953_v2, %s2905_s14 }
  0x6a   :  { %1291 = vrot.lane.b32.xlu0 %v2946_v1, %s4097_s13 }
  0x6b   :  { %751 = vrot.lane.b32.xlu1 %v2946_v1, %s2905_s14 }
  0x6e   :  { %1353 = vrot.lane.b32.xlu0 %v2941_v0, %s4095_s15 }
  0x6f   :  { %1355 = vrot.lane.b32.xlu1 %v2953_v2, %s4095_s15 }
  0x72   :  { %813 = vrot.lane.b32.xlu0 %v2941_v0, %s2907_s16 }
  0x73   :  { %815 = vrot.lane.b32.xlu1 %v2953_v2, %s2907_s16 }
  0x74   :  { %v94_v4 = vpop.permute.xlu0 %93 }
  0x75   :  { %v92_v5 = vpop.permute.xlu1 %91 }
  0x76   :  { %v104_v6 = vsel %vm103_vm0, %v92_v5, %v94_v4  ;;  %1351 = vrot.lane.b32.xlu0 %v2946_v1, %s4095_s15  ;;  %s2910_s15 = smov 52  }
  0x77   :  { %811 = vrot.lane.b32.xlu1 %v2946_v1, %s2907_s16 }
  0x78   :  { %v3081_v7 = vpop.permute.xlu0 %95 }
  0x79   :  { %v105_v8 = vsel %vm103_vm0, %v94_v4, %v3081_v7  ;;  %v154_v9 = vpop.permute.xlu1 %153 }
  0x7a   :  { %1413 = vrot.lane.b32.xlu0 %v2941_v0, %s4099_s17  ;;  %1706 = vmatprep.subr.bf16.mxu1 %v105_v8 }
  0x7b   :  { %1415 = vrot.lane.b32.xlu1 %v2953_v2, %s4099_s17  ;;  %1707 = vmatpush1.bf16.msra.mxu1 %v104_v6 }
  0x7c   :  { %v3089_v10 = vpop.permute.xlu0 %155 }
  0x7d   :  { %v165_v11 = vsel %vm163_vm1, %v154_v9, %v3089_v10  ;;  %v152_v12 = vpop.permute.xlu1 %151 }
  0x7e   :  { %v164_v13 = vsel %vm163_vm1, %v152_v12, %v154_v9  ;;  %873 = vrot.lane.b32.xlu0 %v2941_v0, %s2909_s18  ;;  %1708 = vmatprep.subr.bf16.mxu1 %v165_v11 }
  0x7f   :  { %875 = vrot.lane.b32.xlu1 %v2953_v2, %s2909_s18  ;;  %1709 = vmatpush1.bf16.msra.mxu1 %v164_v13 }
  0x80   :  { %v214_v14 = vpop.permute.xlu0 %213 }
  0x81   :  { %v3098_v15 = vpop.permute.xlu1 %215 }
  0x82   :  { %v225_v16 = vsel %vm223_vm2, %v214_v14, %v3098_v15  ;;  %1411 = vrot.lane.b32.xlu0 %v2946_v1, %s4099_s17  ;;  %s2911_s17 = smov 74  }
  0x83   :  { %871 = vrot.lane.b32.xlu1 %v2946_v1, %s2909_s18  ;;  %1710 = vmatprep.subr.bf16.mxu1 %v225_v16 }
  0x84   :  { %v212_v18 = vpop.permute.xlu0 %211 }
  0x85   :  { %v224_v21 = vsel %vm223_vm2, %v212_v18, %v214_v14  ;;  %v274_v22 = vpop.permute.xlu1 %273 }
  0x86   :  { %1473 = vrot.lane.b32.xlu0 %v2941_v0, %s2910_s15  ;;  %1711 = vmatpush1.bf16.msra.mxu1 %v224_v21 }
  0x87   :  { %1475 = vrot.lane.b32.xlu1 %v2953_v2, %s2910_s15 }
  0x88   :  { %v3145_v27 = vpop.permute.xlu0 %275 }
  0x89   :  { %v285_v28 = vsel %vm283_vm5, %v274_v22, %v3145_v27  ;;  %v272_v29 = vpop.permute.xlu1 %271 }
  0x8a   :  { %v284_v30 = vsel %vm283_vm5, %v272_v29, %v274_v22  ;;  %933 = vrot.lane.b32.xlu0 %v2941_v0, %s2911_s17  ;;  %1712 = vmatprep.subr.bf16.mxu1 %v285_v28 }
  0x8b   :  { %935 = vrot.lane.b32.xlu1 %v2953_v2, %s2911_s17  ;;  %1713 = vmatpush1.bf16.msra.mxu1 %v284_v30 }
  0x8c   :  { %v334_v31 = vpop.permute.xlu0 %333 }
  0x8d   :  { %v3154_v32 = vpop.permute.xlu1 %335 }
  0x8e   :  { %v345_v34 = vsel %vm343_vm6, %v334_v31, %v3154_v32  ;;  %1471 = vrot.lane.b32.xlu0 %v2946_v1, %s2910_s15 }
  0x8f   :  { %931 = vrot.lane.b32.xlu1 %v2946_v1, %s2911_s17  ;;  %1714 = vmatprep.subr.bf16.mxu1 %v345_v34 }
  0x90   :  { %v332_v35 = vpop.permute.xlu0 %331 }
  0x91   :  { %v344_v36 = vsel %vm343_vm6, %v332_v35, %v334_v31  ;;  %v394_v37 = vpop.permute.xlu1 %393 }
  0x92   :  { %97 = vrot.lane.b32.xlu0 %v3159_v33, %s2888_s19  ;;  %1715 = vmatpush1.bf16.msra.mxu1 %v344_v36 }
  0x93   :  { %99 = vrot.lane.b32.xlu1 %v2974_v3, %s2888_s19 }
  0x94   :  { %v3172_v38 = vpop.permute.xlu0 %395 }
  0x95   :  { %v405_v39 = vsel %vm403_vm7, %v394_v37, %v3172_v38  ;;  %v392_v40 = vpop.permute.xlu1 %391 }
  0x96   :  { %v404_v41 = vsel %vm403_vm7, %v392_v40, %v394_v37  ;;  %101 = vrot.lane.b32.xlu0 %v3114_v19, %s2888_s19  ;;  %1716 = vmatprep.subr.bf16.mxu1 %v405_v39 }
  0x97   :  { %157 = vrot.lane.b32.xlu1 %v3159_v33, %s2889_s22  ;;  %1717 = vmatpush1.bf16.msra.mxu1 %v404_v41 }
  0x98   :  { %v994_v42 = vpop.permute.xlu0 %993 }
  0x99   :  { %v3181_v43 = vpop.permute.xlu1 %995 }
  0x9a   :  { %v1005_v44 = vsel %vm4105_vm8, %v994_v42, %v3181_v43  ;;  %159 = vrot.lane.b32.xlu0 %v2974_v3, %s2889_s22 }
  0x9b   :  { %161 = vrot.lane.b32.xlu1 %v3114_v19, %s2889_s22  ;;  %1757 = vmatprep.subr.bf16.mxu0 %v1005_v44 }
  0x9c   :  { %v454_v45 = vpop.permute.xlu0 %453 }
  0x9d   :  { %v3189_v46 = vpop.permute.xlu1 %455 }
  0x9e   :  { %v465_v47 = vsel %vm463_vm9, %v454_v45, %v3189_v46  ;;  %217 = vrot.lane.b32.xlu0 %v3159_v33, %s2890_s23 }
  0x9f   :  { %219 = vrot.lane.b32.xlu1 %v2974_v3, %s2890_s23  ;;  %1718 = vmatprep.subr.bf16.mxu1 %v465_v47  ;;  %v2912_v47 = vmov 0  }
  0xa0   :  { %v992_v48 = vpop.permute.xlu0 %991  ;;  %2742 = vset.pattern.permute.xlu1 %v2912_v47  ;;  %2741 = vset.pattern.permute.xlu0 %v2912_v47 }
  0xa1   :  { %v1004_v49 = vsel %vm4105_vm8, %v992_v48, %v994_v42  ;;  %v452_v50 = vpop.permute.xlu1 %451  ;;  %vm4108_vm8 = vcmask 441344  }
  0xa2   :  { %v464_v51 = vsel %vm463_vm9, %v452_v50, %v454_v45  ;;  %221 = vrot.lane.b32.xlu0 %v3114_v19, %s2890_s23  ;;  %1758 = vmatpush1.bf16.msra.mxu0 %v1004_v49 }
  0xa3   :  { %277 = vrot.lane.b32.xlu1 %v3159_v33, %s2891_s26  ;;  %1719 = vmatpush1.bf16.msra.mxu1 %v464_v51 }
  0xa4   :  { %v1054_v52 = vpop.permute.xlu0 %1053 }
  0xa5   :  { %v3203_v53 = vpop.permute.xlu1 %1055 }
  0xa6   :  { %v1065_v54 = vsel %vm4103_vm10, %v1054_v52, %v3203_v53  ;;  %279 = vrot.lane.b32.xlu0 %v2974_v3, %s2891_s26 }
  0xa7   :  { %281 = vrot.lane.b32.xlu1 %v3114_v19, %s2891_s26  ;;  %1759 = vmatprep.subr.bf16.mxu0 %v1065_v54 }
  0xa8   :  { %v514_v55 = vpop.permute.xlu0 %513 }
  0xa9   :  { %v3211_v56 = vpop.permute.xlu1 %515 }
  0xaa   :  { %v525_v57 = vsel %vm523_vm11, %v514_v55, %v3211_v56  ;;  %337 = vrot.lane.b32.xlu0 %v3159_v33, %s2892_s27 }
  0xab   :  { %339 = vrot.lane.b32.xlu1 %v2974_v3, %s2892_s27  ;;  %1720 = vmatprep.subr.bf16.mxu1 %v525_v57 }
  0xac   :  { %v1052_v58 = vpop.permute.xlu0 %1051 }
  0xad   :  { %v1064_v59 = vsel %vm4103_vm10, %v1052_v58, %v1054_v52  ;;  %v512_v60 = vpop.permute.xlu1 %511  ;;  %vm4106_vm10 = vcmask 449536  }
  0xae   :  { %v524_v61 = vsel %vm523_vm11, %v512_v60, %v514_v55  ;;  %341 = vrot.lane.b32.xlu0 %v3114_v19, %s2892_s27  ;;  %1760 = vmatpush1.bf16.msra.mxu0 %v1064_v59 }
  0xaf   :  { %397 = vrot.lane.b32.xlu1 %v3159_v33, %s2893_s28  ;;  %1721 = vmatpush1.bf16.msra.mxu1 %v524_v61 }
  0xb0   :  { %v1114_v62 = vpop.permute.xlu0 %1113 }
  0xb1   :  { %v3225_v63 = vpop.permute.xlu1 %1115 }
  0xb2   :  { %v1125_v0 = vsel %vm4101_vm12, %v1114_v62, %v3225_v63  ;;  %399 = vrot.lane.b32.xlu0 %v2974_v3, %s2893_s28 }
  0xb3   :  { %401 = vrot.lane.b32.xlu1 %v3114_v19, %s2893_s28  ;;  %1761 = vmatprep.subr.bf16.mxu0 %v1125_v0 }
  0xb4   :  { %v574_v1 = vpop.permute.xlu0 %573 }
  0xb5   :  { %v3233_v2 = vpop.permute.xlu1 %575 }
  0xb6   :  { %v585_v4 = vsel %vm583_vm13, %v574_v1, %v3233_v2  ;;  %457 = vrot.lane.b32.xlu0 %v3159_v33, %s2895_s30 }
  0xb7   :  { %459 = vrot.lane.b32.xlu1 %v2974_v3, %s2895_s30  ;;  %1722 = vmatprep.subr.bf16.mxu1 %v585_v4 }
  0xb8   :  { %v1112_v5 = vpop.permute.xlu0 %1111 }
  0xb9   :  { %v1124_v6 = vsel %vm4101_vm12, %v1112_v5, %v1114_v62  ;;  %v572_v8 = vpop.permute.xlu1 %571  ;;  %vm4104_vm12 = vcmask 457728  }
  0xba   :  { %v584_v9 = vsel %vm583_vm13, %v572_v8, %v574_v1  ;;  %461 = vrot.lane.b32.xlu0 %v3114_v19, %s2895_s30  ;;  %1762 = vmatpush1.bf16.msra.mxu0 %v1124_v6 }
  0xbb   :  { %517 = vrot.lane.b32.xlu1 %v3159_v33, %s2897_s6  ;;  %1723 = vmatpush1.bf16.msra.mxu1 %v584_v9 }
  0xbc   :  { %v1174_v11 = vpop.permute.xlu0 %1173 }
  0xbd   :  { %v3247_v12 = vpop.permute.xlu1 %1175 }
  0xbe   :  { %v1185_v13 = vsel %vm4102_vm14, %v1174_v11, %v3247_v12  ;;  %519 = vrot.lane.b32.xlu0 %v2974_v3, %s2897_s6 }
  0xbf   :  { %521 = vrot.lane.b32.xlu1 %v3114_v19, %s2897_s6  ;;  %1763 = vmatprep.subr.bf16.mxu0 %v1185_v13 }
  0xc0   :  { %v634_v14 = vpop.permute.xlu0 %633 }
  0xc1   :  { %v3255_v16 = vpop.permute.xlu1 %635 }
  0xc2   :  { %v645_v18 = vsel %vm643_vm15, %v634_v14, %v3255_v16  ;;  %577 = vrot.lane.b32.xlu0 %v3159_v33, %s2899_s8 }
  0xc3   :  { %579 = vrot.lane.b32.xlu1 %v2974_v3, %s2899_s8  ;;  %1724 = vmatprep.subr.bf16.mxu1 %v645_v18 }
  0xc4   :  { %v1172_v20 = vpop.permute.xlu0 %1171 }
  0xc5   :  { %v1184_v21 = vsel %vm4102_vm14, %v1172_v20, %v1174_v11  ;;  %v632_v22 = vpop.permute.xlu1 %631  ;;  %vm703_vm14 = vcmask 744448  }
  0xc6   :  { %v644_v28 = vsel %vm643_vm15, %v632_v22, %v634_v14  ;;  %581 = vrot.lane.b32.xlu0 %v3114_v19, %s2899_s8  ;;  %1764 = vmatpush1.bf16.msra.mxu0 %v1184_v21 }
  0xc7   :  { %637 = vrot.lane.b32.xlu1 %v3159_v33, %s2901_s10  ;;  %1725 = vmatpush1.bf16.msra.mxu1 %v644_v28 }
  0xc8   :  { %v1234_v29 = vpop.permute.xlu0 %1233 }
  0xc9   :  { %v3269_v30 = vpop.permute.xlu1 %1235 }
  0xca   :  { %v1245_v31 = vsel %vm4104_vm12, %v1234_v29, %v3269_v30  ;;  %639 = vrot.lane.b32.xlu0 %v2974_v3, %s2901_s10 }
  0xcb   :  { %641 = vrot.lane.b32.xlu1 %v3114_v19, %s2901_s10  ;;  %1765 = vmatprep.subr.bf16.mxu0 %v1245_v31 }
  0xcc   :  { %v694_v34 = vpop.permute.xlu0 %693 }
  0xcd   :  { %v3277_v35 = vpop.permute.xlu1 %695 }
  0xce   :  { %v705_v36 = vsel %vm703_vm14, %v694_v34, %v3277_v35  ;;  %697 = vrot.lane.b32.xlu0 %v3159_v33, %s2903_s12 }
  0xcf   :  { %699 = vrot.lane.b32.xlu1 %v2974_v3, %s2903_s12  ;;  %1726 = vmatprep.subr.bf16.mxu1 %v705_v36 }
  0xd0   :  { %v1232_v37 = vpop.permute.xlu0 %1231 }
  0xd1   :  { %v1244_v39 = vsel %vm4104_vm12, %v1232_v37, %v1234_v29  ;;  %v692_v40 = vpop.permute.xlu1 %691  ;;  %vm4107_vm12 = vcmask 736256  }
  0xd2   :  { %v704_v41 = vsel %vm703_vm14, %v692_v40, %v694_v34  ;;  %701 = vrot.lane.b32.xlu0 %v3114_v19, %s2903_s12  ;;  %1766 = vmatpush1.bf16.msra.mxu0 %v1244_v39  ;;  %v1502_v39 = vld [vmem:[%s4091_s1 + $0x8] sm:$0xff]  ;;  %v1504_v40 = vld [vmem:[%s4091_s1 + $0x18] sm:$0xff] }
  0xd3   :  { %757 = vrot.lane.b32.xlu1 %v3159_v33, %s2905_s14  ;;  %1727 = vmatpush1.bf16.msra.mxu1 %v704_v41  ;;  %v1501_v41 = vld [vmem:[%s4091_s1] sm:$0xff] }
  0xd4   :  { %v1294_v42 = vpop.permute.xlu0 %1293 }
  0xd5   :  { %v3291_v44 = vpop.permute.xlu1 %1295 }
  0xd6   :  { %v1305_v45 = vsel %vm4106_vm10, %v1294_v42, %v3291_v44  ;;  %759 = vrot.lane.b32.xlu0 %v2974_v3, %s2905_s14 }
  0xd7   :  { %761 = vrot.lane.b32.xlu1 %v3114_v19, %s2905_s14  ;;  %1767 = vmatprep.subr.bf16.mxu0 %v1305_v45  ;;  %s4111_s14 = smov 55  }
  0xd8   :  { %v754_v48 = vpop.permute.xlu0 %753 }
  0xd9   :  { %v3301_v49 = vpop.permute.xlu1 %755 }
  0xda   :  { %v765_v50 = vsel %vm4107_vm12, %v754_v48, %v3301_v49  ;;  %817 = vrot.lane.b32.xlu0 %v3159_v33, %s2907_s16 }
  0xdb   :  { %819 = vrot.lane.b32.xlu1 %v2974_v3, %s2907_s16  ;;  %1728 = vmatprep.subr.bf16.mxu1 %v765_v50 }
  0xdc   :  { %v1292_v51 = vpop.permute.xlu0 %1291 }
  0xdd   :  { %v1304_v52 = vsel %vm4106_vm10, %v1292_v51, %v1294_v42  ;;  %v752_v54 = vpop.permute.xlu1 %751  ;;  %vm4109_vm10 = vcmask 728064   ;;  %v1503_v42 = vld [vmem:[%s4091_s1 + $0x10] sm:$0xff]  ;;  %v3388_v51 = vcombine.low %v1502_v39, %v1504_v40 }
  0xde   :  { %v764_v55 = vsel %vm4107_vm12, %v752_v54, %v754_v48  ;;  %821 = vrot.lane.b32.xlu0 %v3114_v19, %s2907_s16  ;;  %1768 = vmatpush1.bf16.msra.mxu0 %v1304_v52  ;;  %vm4110_vm12 = vcmask 433152   ;;  %v1514_v52 = vld [vmem:[#allocation2 + $0x28] sm:$0xff] }
  0xdf   :  { %877 = vrot.lane.b32.xlu1 %v3159_v33, %s2909_s18  ;;  %1729 = vmatpush1.bf16.msra.mxu1 %v764_v55  ;;  %v3393_v55 = vcombine.low %v1501_v41, %v1503_v42 }
  0xe0   :  { %v1354_v57 = vpop.permute.xlu0 %1353 }
  0xe1   :  { %v3315_v58 = vpop.permute.xlu1 %1355 }
  0xe2   :  { %v1365_v59 = vsel %vm4108_vm8, %v1354_v57, %v3315_v58  ;;  %879 = vrot.lane.b32.xlu0 %v2974_v3, %s2909_s18 }
  0xe3   :  { %881 = vrot.lane.b32.xlu1 %v3114_v19, %s2909_s18  ;;  %1769 = vmatprep.subr.bf16.mxu0 %v1365_v59 }
  0xe4   :  { %v814_v60 = vpop.permute.xlu0 %813 }
  0xe5   :  { %v3323_v61 = vpop.permute.xlu1 %815 }
  0xe6   :  { %v825_v62 = vsel %vm4109_vm10, %v814_v60, %v3323_v61  ;;  %937 = vrot.lane.b32.xlu0 %v3159_v33, %s2911_s17 }
  0xe7   :  { %939 = vrot.lane.b32.xlu1 %v2974_v3, %s2911_s17  ;;  %1730 = vmatprep.subr.bf16.mxu1 %v825_v62  ;;  %v3404_v62 = vld [vmem:[%s4091_s1 + $0x2c] ss:$16 sps:$4 sm:$0xff]  }
  0xe8   :  { %v1352_v0 = vpop.permute.xlu0 %1351 }
  0xe9   :  { %v1364_v1 = vsel %vm4108_vm8, %v1352_v0, %v1354_v57  ;;  %v812_v4 = vpop.permute.xlu1 %811  ;;  %vm883_vm8 = vcmask 719872   ;;  %v3409_v0 = vld [vmem:[%s4091_s1 + $0x24] ss:$16 sps:$4 sm:$0xff]  }
  0xea   :  { %v824_v5 = vsel %vm4109_vm10, %v812_v4, %v814_v60  ;;  %941 = vrot.lane.b32.xlu0 %v3114_v19, %s2911_s17  ;;  %1770 = vmatpush1.bf16.msra.mxu0 %v1364_v1  ;;  %vm1483_vm10 = vcmask 424960  }
  0xeb   :  { %997 = vrot.lane.b32.xlu1 %v3159_v33, %s2894_s29  ;;  %1731 = vmatpush1.bf16.msra.mxu1 %v824_v5  ;;  %v3429_v5 = vld [vmem:[%s4091_s1 + $0x28] ss:$16 sps:$4 sm:$0xff]  }
  0xec   :  { %v1414_v6 = vpop.permute.xlu0 %1413 }
  0xed   :  { %v3337_v8 = vpop.permute.xlu1 %1415 }
  0xee   :  { %v1425_v9 = vsel %vm4110_vm12, %v1414_v6, %v3337_v8  ;;  %999 = vrot.lane.b32.xlu0 %v2974_v3, %s2894_s29 }
  0xef   :  { %1001 = vrot.lane.b32.xlu1 %v3114_v19, %s2894_s29  ;;  %1771 = vmatprep.subr.bf16.mxu0 %v1425_v9 }
  0xf0   :  { %v874_v11 = vpop.permute.xlu0 %873 }
  0xf1   :  { %v3345_v13 = vpop.permute.xlu1 %875 }
  0xf2   :  { %v885_v14 = vsel %vm883_vm8, %v874_v11, %v3345_v13  ;;  %1057 = vrot.lane.b32.xlu0 %v3159_v33, %s2896_s5 }
  0xf3   :  { %1059 = vrot.lane.b32.xlu1 %v2974_v3, %s2896_s5  ;;  %1732 = vmatprep.subr.bf16.mxu1 %v885_v14 }
  0xf4   :  { %v1412_v18 = vpop.permute.xlu0 %1411 }
  0xf5   :  { %v1424_v20 = vsel %vm4110_vm12, %v1412_v18, %v1414_v6  ;;  %v872_v21 = vpop.permute.xlu1 %871  ;;  %vm943_vm12 = vcmask 605184  }
  0xf6   :  { %v884_v22 = vsel %vm883_vm8, %v872_v21, %v874_v11  ;;  %1061 = vrot.lane.b32.xlu0 %v3114_v19, %s2896_s5  ;;  %1772 = vmatpush1.bf16.msra.mxu0 %v1424_v20 }
  0xf7   :  { %1117 = vrot.lane.b32.xlu1 %v3159_v33, %s2898_s7  ;;  %1733 = vmatpush1.bf16.msra.mxu1 %v884_v22 }
  0xf8   :  { %v1474_v28 = vpop.permute.xlu0 %1473 }
  0xf9   :  { %v3359_v29 = vpop.permute.xlu1 %1475 }
  0xfa   :  { %v1485_v31 = vsel %vm1483_vm10, %v1474_v28, %v3359_v29  ;;  %1119 = vrot.lane.b32.xlu0 %v2974_v3, %s2898_s7 }
  0xfb   :  { %1121 = vrot.lane.b32.xlu1 %v3114_v19, %s2898_s7  ;;  %1773 = vmatprep.subr.bf16.mxu0 %v1485_v31 }
  0xfc   :  { %v934_v34 = vpop.permute.xlu0 %933 }
  0xfd   :  { %v3367_v36 = vpop.permute.xlu1 %935 }
  0xfe   :  { %v945_v37 = vsel %vm943_vm12, %v934_v34, %v3367_v36  ;;  %1177 = vrot.lane.b32.xlu0 %v3159_v33, %s2900_s9 }
  0xff   :  { %1179 = vrot.lane.b32.xlu1 %v2974_v3, %s2900_s9  ;;  %1734 = vmatprep.subr.bf16.mxu1 %v945_v37 }
 0x100   :  { %v1472_v45 = vpop.permute.xlu0 %1471 }
 0x101   :  { %v1484_v48 = vsel %vm1483_vm10, %v1472_v45, %v1474_v28  ;;  %v932_v50 = vpop.permute.xlu1 %931 }
 0x102   :  { %v944_v54 = vsel %vm943_vm12, %v932_v50, %v934_v34  ;;  %1181 = vrot.lane.b32.xlu0 %v3114_v19, %s2900_s9  ;;  %1774 = vmatpush1.bf16.msra.mxu0 %v1484_v48 }
 0x103   :  { %1237 = vrot.lane.b32.xlu1 %v3159_v33, %s2902_s11  ;;  %1735 = vmatpush1.bf16.msra.mxu1 %v944_v54 }
 0x104   :  { %v98_v57 = vpop.permute.xlu0 %97  ;;  %1810 = vmatprep.subr.bf16.mxu1 %v3134_v25  ;;  %1916 = vmatprep.subr.bf16.mxu0 %v1514_v52 }
 0x105   :  { %v106_v59 = vsel %vm103_vm0, %v3081_v7, %v98_v57  ;;  %v100_v60 = vpop.permute.xlu1 %99  ;;  %1790 = vmatmul.mubr.bf16.vlgmr.msra.gmra.mrb[0].mxu0 %v3388_v51 }
 0x106   :  { %v107_v1 = vsel %vm103_vm0, %v98_v57, %v100_v60  ;;  %1239 = vrot.lane.b32.xlu0 %v2974_v3, %s2902_s11  ;;  %1737 = vmatmul.mubr.bf16.vlgmr.msra.gmra.mrb[0].mxu1 %v3393_v55 }
 0x107   :  { %1241 = vrot.lane.b32.xlu1 %v3114_v19, %s2902_s11  ;;  %1811 = vmatpush1.bf16.msra.mxu1 %v2506_v26 }
 0x108   :  { %v102_v7 = vpop.permute.xlu0 %101  ;;  %1917 = vmatpush1.bf16.msra.mxu0 %v2974_v3  ;;  %1812 = vmatprep.subr.bf16.mxu1 %v107_v1 }
 0x109   :  { %v108_v25 = vsel %vm103_vm0, %v100_v60, %v102_v7  ;;  %120 = vst.msk [vmem:[#allocation2 + $0x58] sm:$0xff] %vm59_vm4, %v102_v7  ;;  %v158_v4 = vpop.permute.xlu1 %157  ;;  %2663 = vmatprep.mubr.msk.bf16.mxu0 %vm1697_vm3, %v3404_v62  ;;  %1746 = vmatprep.mubr.bf16.mxu1 %v3409_v0  ;;  %v2025_v60 = vld [vmem:[%s4092_s2 + $0x18] sm:$0xff]  ;;  %v2024_v7 = vld [vmem:[%s4092_s2 + $0x10] sm:$0xff] }
 0x10a   :  { %v166_v23 = vsel %vm163_vm1, %v3089_v10, %v158_v4  ;;  %1297 = vrot.lane.b32.xlu0 %v3159_v33, %s4111_s14 }
 0x10b   :  { %1299 = vrot.lane.b32.xlu1 %v2974_v3, %s4111_s14  ;;  %1813 = vmatpush1.bf16.msra.mxu1 %v106_v59 }
 0x10c   :  { %v160_v26 = vpop.permute.xlu0 %159 }
 0x10d   :  { %v167_v6 = vsel %vm163_vm1, %v158_v4, %v160_v26  ;;  %v162_v9 = vpop.permute.xlu1 %161  ;;  %1800 = vmatmul.mubr.bf16.gmra.mrb[4].mxu0 %v3429_v5 }
 0x10e   :  { %v168_v10 = vsel %vm163_vm1, %v160_v26, %v162_v9  ;;  %180 = vst.msk [vmem:[#allocation2 + $0x88] sm:$0xff] %vm59_vm4, %v162_v9  ;;  %1301 = vrot.lane.b32.xlu0 %v3114_v19, %s4111_s14  ;;  %1747 = vmatmul.mubr.bf16.gmra.mrb[4].mxu1 %v3438_v24  ;;  %v2070_v9 = vld [vmem:[%s4093_s3] sm:$0xff]  ;;  %vm4114_vm1 = vcmask 736256  }
 0x10f   :  { %1357 = vrot.lane.b32.xlu1 %v3159_v33, %s4112_s24  ;;  %1814 = vmatprep.subr.bf16.mxu1 %v167_v6 }
 0x110   :  { %v218_v11 = vpop.permute.xlu0 %217  ;;  %v1520_v14 = vld [vmem:[#allocation2 + $0x58] sm:$0xff]  ;;  %1815 = vmatpush1.bf16.msra.mxu1 %v166_v23  ;;  %1948 = vmatprep.mubr.bf16.mxu0 %v3109_v17 }
 0x111   :  { %v226_v18 = vsel %vm223_vm2, %v3098_v15, %v218_v11  ;;  %v220_v20 = vpop.permute.xlu1 %219  ;;  %1918 = vmatprep.subr.bf16.mxu0 %v1520_v14  ;;  %1842 = vmatprep.mubr.bf16.mxu1 %v3109_v17 }
 0x112   :  { %v227_v21 = vsel %vm223_vm2, %v218_v11, %v220_v20  ;;  %1359 = vrot.lane.b32.xlu0 %v2974_v3, %s4112_s24  ;;  %1919 = vmatpush1.bf16.msra.mxu0 %v108_v25 }
 0x113   :  { %1361 = vrot.lane.b32.xlu1 %v3114_v19, %s4112_s24  ;;  %1816 = vmatprep.subr.bf16.mxu1 %v227_v21  ;;  %v2072_v21 = vld [vmem:[%s4093_s3 + $0x10] sm:$0xff] }
 0x114   :  { %v222_v22 = vpop.permute.xlu0 %221  ;;  %1817 = vmatpush1.bf16.msra.mxu1 %v226_v18  ;;  %v2073_v18 = vld [vmem:[%s4093_s3 + $0x18] sm:$0xff] }
 0x115   :  { %v228_v28 = vsel %vm223_vm2, %v220_v20, %v222_v22  ;;  %240 = vst.msk [vmem:[#allocation2 + $0xb8] sm:$0xff] %vm59_vm4, %v222_v22  ;;  %v278_v15 = vpop.permute.xlu1 %277  ;;  %v1526_v31 = vld [vmem:[#allocation2 + $0x88] sm:$0xff]  ;;  %vm4115_vm2 = vmmov %vm4114_vm1 }
 0x116   :  { %v286_v17 = vsel %vm283_vm5, %v3145_v27, %v278_v15  ;;  %1920 = vmatprep.subr.bf16.mxu0 %v1526_v31  ;;  %1417 = vrot.lane.b32.xlu0 %v3159_v33, %s4113_s25  ;;  %v2884_v27 = vld [vmem:[%s4090_s0 + $0x10] ss:$24 sps:$4 sm:$0xff]  }
 0x117   :  { %1419 = vrot.lane.b32.xlu1 %v2974_v3, %s4113_s25  ;;  %1921 = vmatpush1.bf16.msra.mxu0 %v168_v10  ;;  %v2886_v3 = vld [vmem:[%s4090_s0 + $0x14] ss:$24 sps:$4 sm:$0xff]  }
 0x118   :  { %v280_v34 = vpop.permute.xlu0 %279 }
 0x119   :  { %v287_v37 = vsel %vm283_vm5, %v278_v15, %v280_v34  ;;  %v282_v39 = vpop.permute.xlu1 %281 }
 0x11a   :  { %v288_v40 = vsel %vm283_vm5, %v280_v34, %v282_v39  ;;  %300 = vst.msk [vmem:[#allocation2 + $0xe8] sm:$0xff] %vm59_vm4, %v282_v39  ;;  %1421 = vrot.lane.b32.xlu0 %v3114_v19, %s4113_s25  ;;  %1818 = vmatprep.subr.bf16.mxu1 %v287_v37  ;;  %vm4116_vm5 = vmmov %vm4114_vm1 }
 0x11b   :  { %1477 = vrot.lane.b32.xlu1 %v3159_v33, %s2910_s15  ;;  %1819 = vmatpush1.bf16.msra.mxu1 %v286_v17  ;;  %v2022_v33 = vld [vmem:[%s4092_s2] sm:$0xff] }
 0x11c   :  { %v338_v41 = vpop.permute.xlu0 %337  ;;  %v1532_v42 = vld [vmem:[#allocation2 + $0xb8] sm:$0xff] }
 0x11d   :  { %v346_v45 = vsel %vm343_vm6, %v3154_v32, %v338_v41  ;;  %v340_v48 = vpop.permute.xlu1 %339  ;;  %1922 = vmatprep.subr.bf16.mxu0 %v1532_v42  ;;  %v2023_v32 = vld [vmem:[%s4092_s2 + $0x8] sm:$0xff] }
 0x11e   :  { %v347_v19 = vsel %vm343_vm6, %v338_v41, %v340_v48  ;;  %1479 = vrot.lane.b32.xlu0 %v2884_v27, %s2910_s15  ;;  %1923 = vmatpush1.bf16.msra.mxu0 %v228_v28 }
 0x11f   :  { %1481 = vrot.lane.b32.xlu1 %v2886_v3, %s2910_s15  ;;  %1820 = vmatprep.subr.bf16.mxu1 %v347_v19 }
 0x120   :  { %v342_v50 = vpop.permute.xlu0 %341  ;;  %1821 = vmatpush1.bf16.msra.mxu1 %v346_v45 }
 0x121   :  { %v348_v52 = vsel %vm343_vm6, %v340_v48, %v342_v50  ;;  %360 = vst.msk [vmem:[#allocation2 + $0x118] sm:$0xff] %vm59_vm4, %v342_v50  ;;  %v398_v54 = vpop.permute.xlu1 %397  ;;  %v1538_v57 = vld [vmem:[#allocation2 + $0xe8] sm:$0xff] }
 0x122   :  { %v406_v59 = vsel %vm403_vm7, %v3172_v38, %v398_v54  ;;  %1924 = vmatprep.subr.bf16.mxu0 %v1538_v57  ;;  %2028 = vperm.xlu0 %2741, %v2022_v33   ;;  %v2071_v38 = vld [vmem:[%s4093_s3 + $0x8] sm:$0xff] }
 0x123   :  { %1925 = vmatpush1.bf16.msra.mxu0 %v288_v40  ;;  %2033 = vperm.xlu1 %2742, %v2023_v32  }
 0x124   :  { %v400_v1 = vpop.permute.xlu0 %399 }
 0x125   :  { %v407_v25 = vsel %vm403_vm7, %v398_v54, %v400_v1  ;;  %v402_v4 = vpop.permute.xlu1 %401 }
 0x126   :  { %v408_v23 = vsel %vm403_vm7, %v400_v1, %v402_v4  ;;  %420 = vst.msk [vmem:[#allocation2 + $0x148] sm:$0xff] %vm59_vm4, %v402_v4  ;;  %1822 = vmatprep.subr.bf16.mxu1 %v407_v25  ;;  %2043 = vperm.xlu0 %2741, %v2025_v60   ;;  %vm4117_vm7 = vcmask 728064  }
 0x127   :  { %1823 = vmatpush1.bf16.msra.mxu1 %v406_v59  ;;  %2038 = vperm.xlu1 %2742, %v2024_v7  }
 0x128   :  { %v458_v26 = vpop.permute.xlu0 %457  ;;  %v1544_v6 = vld [vmem:[#allocation2 + $0x118] sm:$0xff] }
 0x129   :  { %v466_v10 = vsel %vm463_vm9, %v3189_v46, %v458_v26  ;;  %v460_v11 = vpop.permute.xlu1 %459  ;;  %1926 = vmatprep.subr.bf16.mxu0 %v1544_v6 }
 0x12a   :  { %v467_v14 = vsel %vm463_vm9, %v458_v26, %v460_v11  ;;  %1927 = vmatpush1.bf16.msra.mxu0 %v348_v52  ;;  %2081 = vperm.xlu0 %2741, %v2071_v38  }
 0x12b   :  { %1824 = vmatprep.subr.bf16.mxu1 %v467_v14  ;;  %2076 = vperm.xlu1 %2742, %v2070_v9  }
 0x12c   :  { %v462_v20 = vpop.permute.xlu0 %461  ;;  %1825 = vmatpush1.bf16.msra.mxu1 %v466_v10 }
 0x12d   :  { %v468_v46 = vsel %vm463_vm9, %v460_v11, %v462_v20  ;;  %480 = vst.msk [vmem:[#allocation2 + $0x178] sm:$0xff] %vm59_vm4, %v462_v20  ;;  %v518_v22 = vpop.permute.xlu1 %517  ;;  %v1550_v28 = vld [vmem:[#allocation2 + $0x148] sm:$0xff]  ;;  %vm4118_vm9 = vmmov %vm4117_vm7 }
 0x12e   :  { %v526_v15 = vsel %vm523_vm11, %v3211_v56, %v518_v22  ;;  %1928 = vmatprep.subr.bf16.mxu0 %v1550_v28  ;;  %2091 = vperm.xlu0 %2741, %v2073_v18  }
 0x12f   :  { %1929 = vmatpush1.bf16.msra.mxu0 %v408_v23  ;;  %2086 = vperm.xlu1 %2742, %v2072_v21  }
 0x130   :  { %v520_v31 = vpop.permute.xlu0 %519 }
 0x131   :  { %v527_v17 = vsel %vm523_vm11, %v518_v22, %v520_v31  ;;  %v522_v34 = vpop.permute.xlu1 %521 }
 0x132   :  { %v528_v37 = vsel %vm523_vm11, %v520_v31, %v522_v34  ;;  %540 = vst.msk [vmem:[#allocation2 + $0x1a8] sm:$0xff] %vm59_vm4, %v522_v34  ;;  %1826 = vmatprep.subr.bf16.mxu1 %v527_v17  ;;  %vm4119_vm11 = vmmov %vm4117_vm7 }
 0x133   :  { %1827 = vmatpush1.bf16.msra.mxu1 %v526_v15 }
 0x134   :  { %v578_v39 = vpop.permute.xlu0 %577  ;;  %v1556_v40 = vld [vmem:[#allocation2 + $0x178] sm:$0xff] }
 0x135   :  { %v586_v27 = vsel %vm583_vm13, %v3233_v2, %v578_v39  ;;  %v580_v56 = vpop.permute.xlu1 %579  ;;  %1930 = vmatprep.subr.bf16.mxu0 %v1556_v40 }
 0x136   :  { %v587_v3 = vsel %vm583_vm13, %v578_v39, %v580_v56  ;;  %1931 = vmatpush1.bf16.msra.mxu0 %v468_v46 }
 0x137   :  { %1828 = vmatprep.subr.bf16.mxu1 %v587_v3 }
 0x138   :  { %v582_v41 = vpop.permute.xlu0 %581  ;;  %1829 = vmatpush1.bf16.msra.mxu1 %v586_v27 }
 0x139   :  { %v588_v42 = vsel %vm583_vm13, %v580_v56, %v582_v41  ;;  %600 = vst.msk [vmem:[#allocation2 + $0x1d8] sm:$0xff] %vm59_vm4, %v582_v41  ;;  %v638_v45 = vpop.permute.xlu1 %637  ;;  %v1562_v48 = vld [vmem:[#allocation2 + $0x1a8] sm:$0xff] }
 0x13a   :  { %v646_v19 = vsel %vm643_vm15, %v3255_v16, %v638_v45  ;;  %1932 = vmatprep.subr.bf16.mxu0 %v1562_v48 }
 0x13b   :  { %1933 = vmatpush1.bf16.msra.mxu0 %v528_v37 }
 0x13c   :  { %v640_v2 = vpop.permute.xlu0 %639 }
 0x13d   :  { %v647_v33 = vsel %vm643_vm15, %v638_v45, %v640_v2  ;;  %v642_v50 = vpop.permute.xlu1 %641 }
 0x13e   :  { %v648_v32 = vsel %vm643_vm15, %v640_v2, %v642_v50  ;;  %660 = vst.msk [vmem:[#allocation2 + $0x208] sm:$0xff] %vm59_vm4, %v642_v50  ;;  %1830 = vmatprep.subr.bf16.mxu1 %v647_v33 }
 0x13f   :  { %1831 = vmatpush1.bf16.msra.mxu1 %v646_v19 }
 0x140   :  { %v698_v52 = vpop.permute.xlu0 %697  ;;  %v1568_v54 = vld [vmem:[#allocation2 + $0x1d8] sm:$0xff] }
 0x141   :  { %v706_v57 = vsel %vm703_vm14, %v3277_v35, %v698_v52  ;;  %v700_v59 = vpop.permute.xlu1 %699  ;;  %1934 = vmatprep.subr.bf16.mxu0 %v1568_v54 }
 0x142   :  { %v707_v16 = vsel %vm703_vm14, %v698_v52, %v700_v59  ;;  %1935 = vmatpush1.bf16.msra.mxu0 %v588_v42 }
 0x143   :  { %1832 = vmatprep.subr.bf16.mxu1 %v707_v16 }
 0x144   :  { %v702_v60 = vpop.permute.xlu0 %701  ;;  %1833 = vmatpush1.bf16.msra.mxu1 %v706_v57 }
 0x145   :  { %v708_v1 = vsel %vm703_vm14, %v700_v59, %v702_v60  ;;  %720 = vst.msk [vmem:[#allocation2 + $0x238] sm:$0xff] %vm59_vm4, %v702_v60  ;;  %v758_v7 = vpop.permute.xlu1 %757  ;;  %v1574_v25 = vld [vmem:[#allocation2 + $0x208] sm:$0xff] }
 0x146   :  { %v766_v4 = vsel %vm4114_vm1, %v3301_v49, %v758_v7  ;;  %1936 = vmatprep.subr.bf16.mxu0 %v1574_v25 }
 0x147   :  { %1937 = vmatpush1.bf16.msra.mxu0 %v648_v32  ;;  %v2887_v32 = vld [vmem:[%s4091_s1 + $0xc] ss:$16 sps:$4 sm:$0xff]  }
 0x148   :  { %v760_v35 = vpop.permute.xlu0 %759 }
 0x149   :  { %v767_v23 = vsel %vm4115_vm2, %v758_v7, %v760_v35  ;;  %v762_v38 = vpop.permute.xlu1 %761  ;;  %vm4126_vm2 = vcmask 580608  }
 0x14a   :  { %v768_v26 = vsel %vm4116_vm5, %v760_v35, %v762_v38  ;;  %780 = vst.msk [vmem:[#allocation2 + $0x268] sm:$0xff] %vm59_vm4, %v762_v38  ;;  %1834 = vmatprep.subr.bf16.mxu1 %v767_v23  ;;  %vm4127_vm5 = vmmov %vm4126_vm2 }
 0x14b   :  { %1835 = vmatpush1.bf16.msra.mxu1 %v766_v4 }
 0x14c   :  { %v818_v6 = vpop.permute.xlu0 %817  ;;  %v1580_v9 = vld [vmem:[#allocation2 + $0x238] sm:$0xff] }
 0x14d   :  { %v826_v10 = vsel %vm4117_vm7, %v3323_v61, %v818_v6  ;;  %v820_v11 = vpop.permute.xlu1 %819  ;;  %1938 = vmatprep.subr.bf16.mxu0 %v1580_v9  ;;  %vm4128_vm7 = vmmov %vm4126_vm2 }
 0x14e   :  { %v827_v49 = vsel %vm4118_vm9, %v818_v6, %v820_v11  ;;  %1939 = vmatpush1.bf16.msra.mxu0 %v708_v1  ;;  %vm4129_vm9 = vcmask 572416  }
 0x14f   :  { %1836 = vmatprep.subr.bf16.mxu1 %v827_v49 }
 0x150   :  { %v822_v14 = vpop.permute.xlu0 %821  ;;  %1837 = vmatpush1.bf16.msra.mxu1 %v826_v10 }
 0x151   :  { %v828_v18 = vsel %vm4119_vm11, %v820_v11, %v822_v14  ;;  %840 = vst.msk [vmem:[#allocation2 + $0x298] sm:$0xff] %vm59_vm4, %v822_v14  ;;  %v878_v20 = vpop.permute.xlu1 %877  ;;  %v1586_v21 = vld [vmem:[#allocation2 + $0x268] sm:$0xff]  ;;  %vm4130_vm11 = vmmov %vm4129_vm9 }
 0x152   :  { %v886_v46 = vsel %vm883_vm8, %v3345_v13, %v878_v20  ;;  %1940 = vmatprep.subr.bf16.mxu0 %v1586_v21 }
 0x153   :  { %1941 = vmatpush1.bf16.msra.mxu0 %v768_v26 }
 0x154   :  { %v880_v61 = vpop.permute.xlu0 %879 }
 0x155   :  { %v887_v22 = vsel %vm883_vm8, %v878_v20, %v880_v61  ;;  %v882_v28 = vpop.permute.xlu1 %881 }
 0x156   :  { %v888_v15 = vsel %vm883_vm8, %v880_v61, %v882_v28  ;;  %900 = vst.msk [vmem:[#allocation2 + $0x2c8] sm:$0xff] %vm59_vm4, %v882_v28  ;;  %1838 = vmatprep.subr.bf16.mxu1 %v887_v22  ;;  %vm4120_vm8 = vcmask 596992  }
 0x157   :  { %1839 = vmatpush1.bf16.msra.mxu1 %v886_v46  ;;  %vm4121_vm13 = vmmov %vm4120_vm8 }
 0x158   :  { %v938_v31 = vpop.permute.xlu0 %937  ;;  %v1592_v17 = vld [vmem:[#allocation2 + $0x298] sm:$0xff]  ;;  %vm4122_vm14 = vmmov %vm4120_vm8 }
 0x159   :  { %v946_v34 = vsel %vm943_vm12, %v3367_v36, %v938_v31  ;;  %v940_v37 = vpop.permute.xlu1 %939  ;;  %1942 = vmatprep.subr.bf16.mxu0 %v1592_v17 }
 0x15a   :  { %v947_v13 = vsel %vm943_vm12, %v938_v31, %v940_v37  ;;  %1943 = vmatpush1.bf16.msra.mxu0 %v828_v18 }
 0x15b   :  { %1840 = vmatprep.subr.bf16.mxu1 %v947_v13 }
 0x15c   :  { %v942_v39 = vpop.permute.xlu0 %941  ;;  %1841 = vmatpush1.bf16.msra.mxu1 %v946_v34 }
 0x15d   :  { %v948_v40 = vsel %vm943_vm12, %v940_v37, %v942_v39  ;;  %960 = vst.msk [vmem:[#allocation2 + $0x2f8] sm:$0xff] %vm59_vm4, %v942_v39  ;;  %v998_v27 = vpop.permute.xlu1 %997  ;;  %v1598_v56 = vld [vmem:[#allocation2 + $0x2c8] sm:$0xff]  ;;  %vm4123_vm12 = vcmask 588800  }
 0x15e   :  { %v1006_v3 = vsel %vm4120_vm8, %v3181_v43, %v998_v27  ;;  %1944 = vmatprep.subr.bf16.mxu0 %v1598_v56  ;;  %vm4124_vm15 = vmmov %vm4123_vm12 }
 0x15f   :  { %1945 = vmatpush1.bf16.msra.mxu0 %v888_v15  ;;  %1843 = vmatmul.mubr.bf16.vlgmr.msra.gmra.mrb[8].mxu1 %v3393_v55  ;;  %vm4125_vm1 = vmmov %vm4123_vm12 }
 0x160   :  { %v1000_v36 = vpop.permute.xlu0 %999  ;;  %1852 = vmatprep.mubr.bf16.mxu1 %v3409_v0  ;;  %vm4131_vm8 = vmmov %vm4129_vm9 }
 0x161   :  { %v1007_v41 = vsel %vm4121_vm13, %v998_v27, %v1000_v36  ;;  %v1002_v42 = vpop.permute.xlu1 %1001  ;;  %vm4132_vm13 = vcmask 457728  }
 0x162   :  { %v1008_v45 = vsel %vm4122_vm14, %v1000_v36, %v1002_v42  ;;  %1020 = vst.msk [vmem:[#allocation2 + $0x328] sm:$0xff] %vm59_vm4, %v1002_v42  ;;  %1863 = vmatprep.subr.bf16.mxu1 %v1007_v41  ;;  %vm4133_vm14 = vmmov %vm4132_vm13 }
 0x163   :  { %1864 = vmatpush1.bf16.msra.mxu1 %v1006_v3 }
 0x164   :  { %v1058_v48 = vpop.permute.xlu0 %1057  ;;  %v1604_v19 = vld [vmem:[#allocation2 + $0x2f8] sm:$0xff] }
 0x165   :  { %v1066_v43 = vsel %vm4123_vm12, %v3203_v53, %v1058_v48  ;;  %v1060_v2 = vpop.permute.xlu1 %1059  ;;  %1946 = vmatprep.subr.bf16.mxu0 %v1604_v19  ;;  %vm4134_vm12 = vmmov %vm4132_vm13 }
 0x166   :  { %v1067_v33 = vsel %vm4124_vm15, %v1058_v48, %v1060_v2  ;;  %1947 = vmatpush1.bf16.msra.mxu0 %v948_v40  ;;  %vm4135_vm15 = vcmask 449536  }
 0x167   :  { %1865 = vmatprep.subr.bf16.mxu1 %v1067_v33  ;;  %1853 = vmatmul.mubr.bf16.gmra.mrb[12].mxu1 %v3438_v24 }
 0x168   :  { %v1062_v50 = vpop.permute.xlu0 %1061  ;;  %1866 = vmatpush1.bf16.msra.mxu1 %v1066_v43  ;;  %2664 = vmatprep.mubr.msk.bf16.mxu1 %vm1697_vm3, %v2887_v32 }
 0x169   :  { %v1068_v52 = vsel %vm4125_vm1, %v1060_v2, %v1062_v50  ;;  %1080 = vst.msk [vmem:[#allocation2 + $0x358] sm:$0xff] %vm59_vm4, %v1062_v50  ;;  %v1118_v53 = vpop.permute.xlu1 %1117  ;;  %v1610_v54 = vld [vmem:[#allocation2 + $0x328] sm:$0xff]  ;;  %1949 = vmatmul.mubr.bf16.vlgmr.msra.gmra.mrb[8].mxu0 %v3393_v55  ;;  %vm4136_vm1 = vmmov %vm4135_vm15 }
 0x16a   :  { %v1126_v57 = vsel %vm4126_vm2, %v3225_v63, %v1118_v53  ;;  %1969 = vmatprep.subr.bf16.mxu0 %v1610_v54  ;;  %1958 = vmatprep.mubr.bf16.mxu0 %v3409_v0  ;;  %vm4137_vm2 = vmmov %vm4136_vm1 }
 0x16b   :  { %1970 = vmatpush1.bf16.msra.mxu0 %v1008_v45 }
 0x16c   :  { %v1120_v59 = vpop.permute.xlu0 %1119 }
 0x16d   :  { %v1127_v16 = vsel %vm4127_vm5, %v1118_v53, %v1120_v59  ;;  %v1122_v60 = vpop.permute.xlu1 %1121  ;;  %vm4138_vm5 = vcmask 441344  }
 0x16e   :  { %v1128_v1 = vsel %vm4128_vm7, %v1120_v59, %v1122_v60  ;;  %1140 = vst.msk [vmem:[#allocation2 + $0x388] sm:$0xff] %vm59_vm4, %v1122_v60  ;;  %1867 = vmatprep.subr.bf16.mxu1 %v1127_v16  ;;  %vm4139_vm7 = vmmov %vm4138_vm5 }
 0x16f   :  { %1868 = vmatpush1.bf16.msra.mxu1 %v1126_v57 }
 0x170   :  { %v1178_v7 = vpop.permute.xlu0 %1177  ;;  %v1616_v25 = vld [vmem:[#allocation2 + $0x358] sm:$0xff] }
 0x171   :  { %v1186_v55 = vsel %vm4129_vm9, %v3247_v12, %v1178_v7  ;;  %v1180_v63 = vpop.permute.xlu1 %1179  ;;  %1971 = vmatprep.subr.bf16.mxu0 %v1616_v25  ;;  %1959 = vmatmul.mubr.bf16.gmra.mrb[12].mxu0 %v3438_v24  ;;  %vm4140_vm9 = vmmov %vm4138_vm5 }
 0x172   :  { %v1187_v0 = vsel %vm4130_vm11, %v1178_v7, %v1180_v63  ;;  %1972 = vmatpush1.bf16.msra.mxu0 %v1068_v52  ;;  %2666 = vmatprep.mubr.msk.bf16.mxu0 %vm1697_vm3, %v2887_v32  ;;  %vm4141_vm11 = vcmask 433152  }
 0x173   :  { %1869 = vmatprep.subr.bf16.mxu1 %v1187_v0 }
 0x174   :  { %v1182_v4 = vpop.permute.xlu0 %1181  ;;  %1870 = vmatpush1.bf16.msra.mxu1 %v1186_v55 }
 0x175   :  { %v1188_v35 = vsel %vm4131_vm8, %v1180_v63, %v1182_v4  ;;  %1200 = vst.msk [vmem:[#allocation2 + $0x3b8] sm:$0xff] %vm59_vm4, %v1182_v4  ;;  %v1238_v23 = vpop.permute.xlu1 %1237  ;;  %v1622_v38 = vld [vmem:[#allocation2 + $0x388] sm:$0xff]  ;;  %vm4142_vm8 = vmmov %vm4141_vm11 }
 0x176   :  { %v1246_v12 = vsel %vm4132_vm13, %v3269_v30, %v1238_v23  ;;  %1973 = vmatprep.subr.bf16.mxu0 %v1622_v38  ;;  %vm4143_vm13 = vmmov %vm4142_vm8 }
 0x177   :  { %1974 = vmatpush1.bf16.msra.mxu0 %v1128_v1 }
 0x178   :  { %v1240_v24 = vpop.permute.xlu0 %1239 }
 0x179   :  { %v1247_v26 = vsel %vm4133_vm14, %v1238_v23, %v1240_v24  ;;  %v1242_v6 = vpop.permute.xlu1 %1241 }
 0x17a   :  { %v1248_v9 = vsel %vm4134_vm12, %v1240_v24, %v1242_v6  ;;  %1260 = vst.msk [vmem:[#allocation2 + $0x3e8] sm:$0xff] %vm59_vm4, %v1242_v6  ;;  %1871 = vmatprep.subr.bf16.mxu1 %v1247_v26 }
 0x17b   :  { %1872 = vmatpush1.bf16.msra.mxu1 %v1246_v12 }
 0x17c   :  { %v1298_v10 = vpop.permute.xlu0 %1297  ;;  %v1628_v11 = vld [vmem:[#allocation2 + $0x3b8] sm:$0xff] }
 0x17d   :  { %v1306_v49 = vsel %vm4135_vm15, %v3291_v44, %v1298_v10  ;;  %v1300_v14 = vpop.permute.xlu1 %1299  ;;  %1975 = vmatprep.subr.bf16.mxu0 %v1628_v11 }
 0x17e   :  { %v1307_v30 = vsel %vm4136_vm1, %v1298_v10, %v1300_v14  ;;  %1976 = vmatpush1.bf16.msra.mxu0 %v1188_v35 }
 0x17f   :  { %1873 = vmatprep.subr.bf16.mxu1 %v1307_v30 }
 0x180   :  { %v1302_v18 = vpop.permute.xlu0 %1301  ;;  %1874 = vmatpush1.bf16.msra.mxu1 %v1306_v49 }
 0x181   :  { %v1308_v20 = vsel %vm4137_vm2, %v1300_v14, %v1302_v18  ;;  %1320 = vst.msk [vmem:[#allocation2 + $0x418] sm:$0xff] %vm59_vm4, %v1302_v18  ;;  %v1358_v21 = vpop.permute.xlu1 %1357  ;;  %v1634_v46 = vld [vmem:[#allocation2 + $0x3e8] sm:$0xff] }
 0x182   :  { %v1366_v61 = vsel %vm4138_vm5, %v3315_v58, %v1358_v21  ;;  %1977 = vmatprep.subr.bf16.mxu0 %v1634_v46 }
 0x183   :  { %1978 = vmatpush1.bf16.msra.mxu0 %v1248_v9 }
 0x184   :  { %v1360_v44 = vpop.permute.xlu0 %1359 }
 0x185   :  { %v1367_v22 = vsel %vm4139_vm7, %v1358_v21, %v1360_v44  ;;  %v1362_v28 = vpop.permute.xlu1 %1361 }
 0x186   :  { %v1368_v15 = vsel %vm4140_vm9, %v1360_v44, %v1362_v28  ;;  %1380 = vst.msk [vmem:[#allocation2 + $0x448] sm:$0xff] %vm59_vm4, %v1362_v28  ;;  %1875 = vmatprep.subr.bf16.mxu1 %v1367_v22 }
 0x187   :  { %1876 = vmatpush1.bf16.msra.mxu1 %v1366_v61 }
 0x188   :  { %v1418_v31 = vpop.permute.xlu0 %1417  ;;  %v1640_v17 = vld [vmem:[#allocation2 + $0x418] sm:$0xff] }
 0x189   :  { %v1426_v34 = vsel %vm4141_vm11, %v3337_v8, %v1418_v31  ;;  %v1420_v37 = vpop.permute.xlu1 %1419  ;;  %1979 = vmatprep.subr.bf16.mxu0 %v1640_v17 }
 0x18a   :  { %v1427_v58 = vsel %vm4142_vm8, %v1418_v31, %v1420_v37  ;;  %1980 = vmatpush1.bf16.msra.mxu0 %v1308_v20 }
 0x18b   :  { %1877 = vmatprep.subr.bf16.mxu1 %v1427_v58 }
 0x18c   :  { %v1422_v13 = vpop.permute.xlu0 %1421  ;;  %1878 = vmatpush1.bf16.msra.mxu1 %v1426_v34 }
 0x18d   :  { %v1428_v39 = vsel %vm4143_vm13, %v1420_v37, %v1422_v13  ;;  %1440 = vst.msk [vmem:[#allocation2 + $0x478] sm:$0xff] %vm59_vm4, %v1422_v13  ;;  %v1478_v40 = vpop.permute.xlu1 %1477  ;;  %v1646_v27 = vld [vmem:[#allocation2 + $0x448] sm:$0xff] }
 0x18e   :  { %v1486_v56 = vsel %vm1483_vm10, %v3359_v29, %v1478_v40  ;;  %1981 = vmatprep.subr.bf16.mxu0 %v1646_v27 }
 0x18f   :  { %1982 = vmatpush1.bf16.msra.mxu0 %v1368_v15 }
 0x190   :  { %v1480_v8 = vpop.permute.xlu0 %1479 }
 0x191   :  { %v1487_v3 = vsel %vm1483_vm10, %v1478_v40, %v1480_v8  ;;  %v1482_v36 = vpop.permute.xlu1 %1481 }
 0x192   :  { %v1488_v41 = vsel %vm1483_vm10, %v1480_v8, %v1482_v36  ;;  %1500 = vst.msk [vmem:[#allocation2 + $0x4a8] sm:$0xff] %vm59_vm4, %v1482_v36  ;;  %1879 = vmatprep.subr.bf16.mxu1 %v1487_v3  ;;  %vm2482_vm4 = vcmask 953344  }
 0x193   :  { %1880 = vmatpush1.bf16.msra.mxu1 %v1486_v56 }
 0x194   :  { %v1652_v42 = vld [vmem:[#allocation2 + $0x478] sm:$0xff] }
 0x195   :  { %1983 = vmatprep.subr.bf16.mxu0 %v1652_v42 }
 0x196   :  { %1984 = vmatpush1.bf16.msra.mxu0 %v1428_v39  ;;  %1896 = vmatmul.mubr.bf16.vlgmr.msra.gmra.mrb[8].mxu1 %v3388_v51 }
 0x197   :  { %2665 = vmatprep.mubr.msk.bf16.mxu1 %vm1697_vm3, %v3404_v62 }
 0x199   :  { %v1658_v29 = vld [vmem:[#allocation2 + $0x4a8] sm:$0xff] }
 0x19a   :  { %1985 = vmatprep.subr.bf16.mxu0 %v1658_v29 }
 0x19b   :  { %1986 = vmatpush1.bf16.msra.mxu0 %v1488_v41 }
 0x19e   :  { %2002 = vmatmul.mubr.bf16.vlgmr.msra.gmra.mrb[8].mxu0 %v3388_v51  ;;  %1906 = vmatmul.mubr.bf16.gmra.mrb[12].mxu1 %v3429_v5 }
 0x19f   :  { %2667 = vmatprep.mubr.msk.bf16.mxu0 %vm1697_vm3, %v3404_v62  ;;  %vm2494_vm3 = vcmask 64516  }
 0x1a1   :  { %v3628_v48 = vpop.permute.xlu0 %2028 }
 0x1a2   :  { %v3626_v45 = vpop.permute.xlu1 %2033 }
 0x1a5   :  { %v3632_v43 = vpop.permute.xlu0 %2043 }
 0x1a6   :  { %2012 = vmatmul.mubr.bf16.gmra.mrb[12].mxu0 %v3429_v5  ;;  %v3630_v19 = vpop.permute.xlu1 %2038 }
 0x1a9   :  { %v3638_v7 = vpop.permute.xlu0 %2081 }
 0x1aa   :  { %v3634_v33 = vpop.permute.xlu1 %2076 }
 0x1ae   :  { %v3649_v23 = vpop.permute.xlu1 %2086 }
 0x1d8   :  { %v1791_v2 = vpop.f32.mrb[0].mxu0 }
 0x1d9   :  { %v1738_v50 = vpop.f32.mrb[0].mxu1  ;;  %v1793_v51 = vpop.f32.mrb[1].mxu0 }
 0x1da   :  { %v1792_v32 = vadd.f32 %v1791_v2, %v1738_v50  ;;  %v1740_v52 = vpop.f32.mrb[1].mxu1  ;;  %v1795_v53 = vpop.f32.mrb[2].mxu0 }
 0x1db   :  { %v1794_v54 = vadd.f32 %v1793_v51, %v1740_v52  ;;  %v1742_v62 = vpop.f32.mrb[2].mxu1  ;;  %v1797_v57 = vpop.f32.mrb[3].mxu0 }
 0x1dc   :  { %v2046_v5 = vmul.f32 %v3628_v48, %v1792_v32  ;;  %v1796_v59 = vadd.f32 %v1795_v53, %v1742_v62  ;;  %v1744_v16 = vpop.f32.mrb[3].mxu1 }
 0x1dd   :  { %v2047_v60 = vmul.f32 %v3628_v48, %v1794_v54  ;;  %v1798_v1 = vadd.f32 %v1797_v57, %v1744_v16 }
 0x1de   :  { %v2052_v25 = vmul.f32 %v3626_v45, %v1796_v59  ;;  %v3642_v55 = vadd.f32 %v3634_v33, %v2046_v5 }
 0x1df   :  { %v2053_v63 = vmul.f32 %v3626_v45, %v1798_v1  ;;  %v3646_v0 = vadd.f32 %v3634_v33, %v2047_v60 }
 0x1e0   :  { %v1801_v4 = vpop.f32.mrb[4].mxu0  ;;  %v2118_v35 = vmax.f32 %v3642_v55, 0.0  ;;  %v3652_v38 = vadd.f32 %v3638_v7, %v2052_v25  ;;  %v2092_v25 = vpop.permute.xlu0 %2091 }
 0x1e1   :  { %v1748_v12 = vpop.f32.mrb[4].mxu1  ;;  %v1803_v24 = vpop.f32.mrb[5].mxu0  ;;  %v2119_v26 = vmax.f32 %v3646_v0, 0.0  ;;  %v3656_v6 = vadd.f32 %v3638_v7, %v2053_v63 }
 0x1e2   :  { %v1802_v9 = vadd.f32 %v1801_v4, %v1748_v12  ;;  %v1750_v10 = vpop.f32.mrb[5].mxu1  ;;  %v2124_v11 = vmax.f32 %v3652_v38, 0.0  ;;  %v1805_v49 = vpop.f32.mrb[6].mxu0 }
 0x1e3   :  { %v1804_v14 = vadd.f32 %v1803_v24, %v1750_v10  ;;  %v2743_v30 = vpack.i.bf16 %v2119_v26, %v2118_v35  ;;  %v2125_v18 = vmax.f32 %v3656_v6, 0.0  ;;  %v1752_v20 = vpop.f32.mrb[6].mxu1  ;;  %v1807_v21 = vpop.f32.mrb[7].mxu0 }
 0x1e4   :  { %v2058_v46 = vmul.f32 %v3630_v19, %v1802_v9  ;;  %v1806_v61 = vadd.f32 %v1805_v49, %v1752_v20  ;;  %v1754_v44 = vpop.f32.mrb[7].mxu1 }
 0x1e5   :  { %v2059_v22 = vmul.f32 %v3630_v19, %v1804_v14  ;;  %2744 = vrot.lane.b32.xlu1 %v2743_v30, %s2888_s19  ;;  %v2748_v28 = vpack.i.bf16 %v2125_v18, %v2124_v11  ;;  %v1808_v15 = vadd.f32 %v1807_v21, %v1754_v44 }
 0x1e6   :  { %v3672_v31 = vadd.f32 %v3649_v23, %v2058_v46  ;;  %v2064_v16 = vmul.f32 %v3632_v43, %v1806_v61 }
 0x1e7   :  { %v3675_v17 = vadd.f32 %v3649_v23, %v2059_v22  ;;  %v2065_v60 = vmul.f32 %v3632_v43, %v1808_v15 }
 0x1e8   :  { %v2130_v34 = vmax.f32 %v3672_v31, 0.0 }
 0x1e9   :  { %2749 = vrot.lane.b32.xlu1 %v2748_v28, %s2888_s19  ;;  %v2131_v37 = vmax.f32 %v3675_v17, 0.0  ;;  %v3726_v44 = vadd.f32 %v2092_v25, %v2065_v60 }
 0x1eb   :  { %v2753_v58 = vpack.i.bf16 %v2131_v37, %v2130_v34 }
 0x1ed   :  { %2754 = vrot.lane.b32.xlu1 %v2753_v58, %s2888_s19 }
 0x269   :  { %v1897_v13 = vpop.f32.mrb[8].mxu1 }
 0x26a   :  { %v1899_v39 = vpop.f32.mrb[9].mxu1  ;;  %v2048_v63 = vmul.f32 %v3628_v48, %v1897_v13 }
 0x26b   :  { %v1901_v40 = vpop.f32.mrb[10].mxu1  ;;  %v2049_v9 = vmul.f32 %v3628_v48, %v1899_v39 }
 0x26c   :  { %v1903_v27 = vpop.f32.mrb[11].mxu1  ;;  %v3729_v22 = vadd.f32 %v3634_v33, %v2048_v63  ;;  %v2054_v28 = vmul.f32 %v3626_v45, %v1901_v40 }
 0x26d   :  { %v3738_v13 = vadd.f32 %v3634_v33, %v2049_v9  ;;  %v2055_v39 = vmul.f32 %v3626_v45, %v1903_v27 }
 0x26e   :  { %v2120_v27 = vmax.f32 %v3729_v22, 0.0 }
 0x271   :  { %v2003_v56 = vpop.f32.mrb[8].mxu0  ;;  %v1907_v8 = vpop.f32.mrb[12].mxu1 }
 0x272   :  { %v2050_v3 = vmul.f32 %v3628_v48, %v2003_v56  ;;  %v2005_v36 = vpop.f32.mrb[9].mxu0  ;;  %v1909_v41 = vpop.f32.mrb[13].mxu1  ;;  %v2060_v60 = vmul.f32 %v3630_v19, %v1907_v8 }
 0x273   :  { %v2051_v42 = vmul.f32 %v3628_v48, %v2005_v36  ;;  %v2007_v29 = vpop.f32.mrb[10].mxu0  ;;  %v1911_v2 = vpop.f32.mrb[14].mxu1  ;;  %v3724_v48 = vadd.f32 %v2092_v25, %v2064_v16  ;;  %v3761_v16 = vadd.f32 %v3638_v7, %v2055_v39  ;;  %v2061_v63 = vmul.f32 %v3630_v19, %v1909_v41 }
 0x274   :  { %v3688_v50 = vadd.f32 %v3634_v33, %v2050_v3  ;;  %v2056_v51 = vmul.f32 %v3626_v45, %v2007_v29  ;;  %v2009_v32 = vpop.f32.mrb[11].mxu0  ;;  %v1913_v52 = vpop.f32.mrb[15].mxu1  ;;  %v3782_v41 = vadd.f32 %v3649_v23, %v2060_v60 }
 0x275   :  { %v3692_v53 = vadd.f32 %v3634_v33, %v2051_v42  ;;  %v2057_v54 = vmul.f32 %v3626_v45, %v2009_v32  ;;  %v2137_v45 = vmax.f32 %v3726_v44, 0.0  ;;  %v2121_v32 = vmax.f32 %v3738_v13, 0.0 }
 0x276   :  { %v2122_v62 = vmax.f32 %v3688_v50, 0.0  ;;  %v3697_v57 = vadd.f32 %v3638_v7, %v2056_v51  ;;  %v2136_v51 = vmax.f32 %v3724_v48, 0.0  ;;  %v2127_v8 = vmax.f32 %v3761_v16, 0.0 }
 0x277   :  { %v2123_v5 = vmax.f32 %v3692_v53, 0.0  ;;  %v3701_v59 = vadd.f32 %v3638_v7, %v2057_v54  ;;  %v3758_v54 = vadd.f32 %v3638_v7, %v2054_v28  ;;  %v2783_v7 = vpack.i.bf16 %v2121_v32, %v2120_v27 }
 0x278   :  { %v2128_v1 = vmax.f32 %v3697_v57, 0.0  ;;  %v3785_v9 = vadd.f32 %v3649_v23, %v2061_v63 }
 0x279   :  { %v2758_v4 = vpack.i.bf16 %v2123_v5, %v2122_v62  ;;  %v2129_v12 = vmax.f32 %v3701_v59, 0.0  ;;  %v2013_v24 = vpop.f32.mrb[12].mxu0 }
 0x27a   :  { %v2062_v10 = vmul.f32 %v3630_v19, %v2013_v24  ;;  %v2015_v49 = vpop.f32.mrb[13].mxu0  ;;  %v2773_v24 = vpack.i.bf16 %v2137_v45, %v2136_v51 }
 0x27b   :  { %v2763_v14 = vpack.i.bf16 %v2129_v12, %v2128_v1  ;;  %v2063_v30 = vmul.f32 %v3630_v19, %v2015_v49  ;;  %v2017_v20 = vpop.f32.mrb[14].mxu0  ;;  %2759 = vrot.lane.b32.xlu1 %v2758_v4, %s2888_s19  ;;  %v2126_v19 = vmax.f32 %v3758_v54, 0.0  ;;  %v2067_v49 = vmul.f32 %v3632_v43, %v1913_v52 }
 0x27c   :  { %v3721_v21 = vadd.f32 %v3649_v23, %v2062_v10  ;;  %v2068_v46 = vmul.f32 %v3632_v43, %v2017_v20  ;;  %v2019_v61 = vpop.f32.mrb[15].mxu0  ;;  %v2066_v10 = vmul.f32 %v3632_v43, %v1911_v2  ;;  %v2133_v20 = vmax.f32 %v3785_v9, 0.0 }
 0x27d   :  { %v3733_v15 = vadd.f32 %v3649_v23, %v2063_v30  ;;  %v2069_v58 = vmul.f32 %v3632_v43, %v2019_v61  ;;  %2764 = vrot.lane.b32.xlu0 %v2763_v14, %s2888_s19  ;;  %v2788_v14 = vpack.i.bf16 %v2127_v8, %v2126_v19  ;;  %v2132_v30 = vmax.f32 %v3782_v41, 0.0 }
 0x27e   :  { %v2134_v56 = vmax.f32 %v3721_v21, 0.0  ;;  %v3742_v3 = vadd.f32 %v2092_v25, %v2068_v46  ;;  %v3797_v46 = vadd.f32 %v2092_v25, %v2066_v10  ;;  %v3799_v23 = vadd.f32 %v2092_v25, %v2067_v49 }
 0x27f   :  { %v2135_v36 = vmax.f32 %v3733_v15, 0.0  ;;  %v3745_v42 = vadd.f32 %v2092_v25, %v2069_v58  ;;  %v2793_v43 = vpack.i.bf16 %v2133_v20, %v2132_v30  ;;  %v2745_v25 = vpop.permute.xlu1 %2744 }
 0x280   :  { %v2140_v40 = vmax.f32 %v3742_v3, 0.0  ;;  %v2138_v2 = vmax.f32 %v3797_v46, 0.0  ;;  %v2139_v52 = vmax.f32 %v3799_v23, 0.0  ;;  %v2747_v59 = vunpack.i.h.bf16 %v2745_v25 }
 0x281   :  { %v2768_v29 = vpack.i.bf16 %v2135_v36, %v2134_v56  ;;  %v2141_v33 = vmax.f32 %v3745_v42, 0.0 }
 0x282   :  { %v2798_v61 = vpack.i.bf16 %v2139_v52, %v2138_v2 }
 0x283   :  { %v2778_v4 = vpack.i.bf16 %v2141_v33, %v2140_v40  ;;  %2769 = vrot.lane.b32.xlu1 %v2768_v29, %s2888_s19  ;;  %v3814_v28 = vpop.permute.xlu1 %2749 }
 0x285   :  { %2779 = vrot.lane.b32.xlu0 %v2778_v4, %s2888_s19 }
 0x287   :  { %2774 = vrot.lane.b32.xlu1 %v2773_v24, %s2888_s19  ;;  %v3816_v58 = vpop.permute.xlu1 %2754 }
 0x288   :  { %v2757_v42 = vunpack.i.h.bf16 %v3816_v58 }
 0x289   :  { %2784 = vrot.lane.b32.xlu0 %v2783_v7, %s2888_s19 }
 0x28d   :  { %2789 = vrot.lane.b32.xlu0 %v2788_v14, %s2888_s19 }
 0x291   :  { %2794 = vrot.lane.b32.xlu0 %v2793_v43, %s2888_s19 }
 0x295   :  { %2799 = vrot.lane.b32.xlu0 %v2798_v61, %s2888_s19 }
 0x2ed   :  { %v2760_v39 = vpop.permute.xlu1 %2759 }
 0x2ee   :  { %v2762_v29 = vunpack.i.h.bf16 %v2760_v39  ;;  %v2761_v60 = vunpack.i.l.bf16 %v2760_v39 }
 0x2ef   :  { %v2765_v63 = vpop.permute.xlu0 %2764 }
 0x2f0   :  { %v2264_v4 = vmax.f32 %v2123_v5, %v2762_v29  ;;  %v2219_v24 = vsel %vm103_vm0, %v2761_v60, %v2762_v29  ;;  %v2767_v7 = vunpack.i.h.bf16 %v2765_v63  ;;  %v2766_v10 = vunpack.i.l.bf16 %v2765_v63 }
 0x2f1   :  { %v3823_v49 = vmax.f32 %v2122_v62, %v2219_v24  ;;  %v2752_v24 = vunpack.i.h.bf16 %v3814_v28 }
 0x2f2   :  { %v2270_v14 = vmax.f32 %v2129_v12, %v2767_v7  ;;  %v2224_v43 = vsel %vm103_vm0, %v2766_v10, %v2767_v7  ;;  %v2746_v12 = vunpack.i.l.bf16 %v2745_v25  ;;  %v2751_v7 = vunpack.i.l.bf16 %v3814_v28 }
 0x2f3   :  { %v2803_v61 = vpack.i.bf16 %v2264_v4, %v3823_v49  ;;  %v3831_v39 = vmax.f32 %v2128_v1, %v2224_v43 }
 0x2f4   :  { %v2215_v28 = vsel %vm103_vm0, %v2746_v12, %v2747_v59 }
 0x2f5   :  { %v2808_v53 = vpack.i.bf16 %v2270_v14, %v3831_v39  ;;  %v3834_v5 = vpop.permute.xlu1 %2769  ;;  %2804 = vrot.lane.b32.xlu1 %v2803_v61, %s2892_s27  ;;  %v3874_v12 = vmax.f32 %v2118_v35, %v2215_v28 }
 0x2f6   :  { %v2772_v50 = vunpack.i.h.bf16 %v3834_v5  ;;  %v2771_v62 = vunpack.i.l.bf16 %v3834_v5 }
 0x2f7   :  { %v3839_v29 = vpop.permute.xlu0 %2779  ;;  %2809 = vrot.lane.b32.xlu0 %v2808_v53, %s2892_s27 }
 0x2f8   :  { %v2276_v57 = vmax.f32 %v2135_v36, %v2772_v50  ;;  %v2229_v1 = vsel %vm103_vm0, %v2771_v62, %v2772_v50  ;;  %v2782_v63 = vunpack.i.h.bf16 %v3839_v29  ;;  %v2781_v4 = vunpack.i.l.bf16 %v3839_v29 }
 0x2f9   :  { %v3851_v25 = vmax.f32 %v2134_v56, %v2229_v1  ;;  %v2220_v56 = vsel %vm103_vm0, %v2751_v7, %v2752_v24  ;;  %v2775_v50 = vpop.permute.xlu1 %2774 }
 0x2fa   :  { %v2282_v14 = vmax.f32 %v2141_v33, %v2782_v63  ;;  %v2234_v15 = vsel %vm103_vm0, %v2781_v4, %v2782_v63  ;;  %v2756_v33 = vunpack.i.l.bf16 %v3816_v58  ;;  %v3891_v55 = vmax.f32 %v2124_v11, %v2220_v56 }
 0x2fb   :  { %v2813_v36 = vpack.i.bf16 %v2276_v57, %v3851_v25  ;;  %v3861_v43 = vmax.f32 %v2140_v40, %v2234_v15  ;;  %v2785_v61 = vpop.permute.xlu0 %2784  ;;  %v2776_v22 = vunpack.i.l.bf16 %v2775_v50 }
 0x2fc   :  { %v2787_v53 = vunpack.i.h.bf16 %v2785_v61  ;;  %v2786_v21 = vunpack.i.l.bf16 %v2785_v61  ;;  %v2225_v13 = vsel %vm103_vm0, %v2756_v33, %v2757_v42 }
 0x2fd   :  { %v2818_v5 = vpack.i.bf16 %v2282_v14, %v3861_v43  ;;  %2814 = vrot.lane.b32.xlu1 %v2813_v36, %s2892_s27  ;;  %v3917_v16 = vmax.f32 %v2130_v34, %v2225_v13 }
 0x2fe   :  { %v2218_v3 = vsel %vm103_vm0, %v2787_v53, %v2761_v60  ;;  %v2216_v40 = vsel %vm103_vm0, %v2747_v59, %v2786_v21  ;;  %v2217_v57 = vsel %vm103_vm0, %v2786_v21, %v2787_v53 }
 0x2ff   :  { %v3878_v1 = vmax.f32 %v2121_v32, %v2218_v3  ;;  %v3882_v58 = vmax.f32 %v2119_v26, %v2216_v40  ;;  %v3886_v63 = vmax.f32 %v2120_v27, %v2217_v57  ;;  %v2790_v60 = vpop.permute.xlu0 %2789  ;;  %2819 = vrot.lane.b32.xlu0 %v2818_v5, %s2892_s27  ;;  %v2777_v32 = vunpack.i.h.bf16 %v2775_v50 }
 0x300   :  { %v2792_v35 = vunpack.i.h.bf16 %v2790_v60  ;;  %v2791_v59 = vunpack.i.l.bf16 %v2790_v60 }
 0x301   :  { %v2828_v0 = vpack.i.bf16 %v3878_v1, %v3886_v63  ;;  %v2823_v26 = vpack.i.bf16 %v3882_v58, %v3874_v12  ;;  %v2230_v54 = vsel %vm103_vm0, %v2776_v22, %v2777_v32 }
 0x302   :  { %v2223_v27 = vsel %vm103_vm0, %v2792_v35, %v2766_v10  ;;  %v2221_v7 = vsel %vm103_vm0, %v2752_v24, %v2791_v59  ;;  %v2222_v38 = vsel %vm103_vm0, %v2791_v59, %v2792_v35  ;;  %v3947_v17 = vmax.f32 %v2136_v51, %v2230_v54 }
 0x303   :  { %v3903_v11 = vmax.f32 %v2127_v8, %v2223_v27  ;;  %v3907_v14 = vmax.f32 %v2125_v18, %v2221_v7  ;;  %v3911_v15 = vmax.f32 %v2126_v19, %v2222_v38  ;;  %v2795_v36 = vpop.permute.xlu0 %2794  ;;  %2829 = vrot.lane.b32.xlu0 %v2828_v0, %s2892_s27  ;;  %2824 = vrot.lane.b32.xlu1 %v2823_v26, %s2892_s27 }
 0x304   :  { %v2797_v10 = vunpack.i.h.bf16 %v2795_v36  ;;  %v2796_v24 = vunpack.i.l.bf16 %v2795_v36 }
 0x305   :  { %v2838_v6 = vpack.i.bf16 %v3903_v11, %v3911_v15  ;;  %v2833_v18 = vpack.i.bf16 %v3907_v14, %v3891_v55 }
 0x306   :  { %v2228_v19 = vsel %vm103_vm0, %v2797_v10, %v2771_v62  ;;  %v2226_v8 = vsel %vm103_vm0, %v2757_v42, %v2796_v24  ;;  %v2227_v61 = vsel %vm103_vm0, %v2796_v24, %v2797_v10 }
 0x307   :  { %v3929_v28 = vmax.f32 %v2133_v20, %v2228_v19  ;;  %v3933_v31 = vmax.f32 %v2131_v37, %v2226_v8  ;;  %v3937_v34 = vmax.f32 %v2132_v30, %v2227_v61  ;;  %2839 = vrot.lane.b32.xlu0 %v2838_v6, %s2892_s27  ;;  %v2800_v53 = vpop.permute.xlu0 %2799  ;;  %2834 = vrot.lane.b32.xlu1 %v2833_v18, %s2892_s27 }
 0x308   :  { %v2802_v62 = vunpack.i.h.bf16 %v2800_v53  ;;  %v2801_v21 = vunpack.i.l.bf16 %v2800_v53 }
 0x309   :  { %v2848_v9 = vpack.i.bf16 %v3929_v28, %v3937_v34  ;;  %v2843_v20 = vpack.i.bf16 %v3933_v31, %v3917_v16 }
 0x30a   :  { %v2233_v37 = vsel %vm103_vm0, %v2802_v62, %v2781_v4  ;;  %v2231_v41 = vsel %vm103_vm0, %v2777_v32, %v2801_v21  ;;  %v2232_v30 = vsel %vm103_vm0, %v2801_v21, %v2802_v62  ;;  %vm2493_vm0 = vcmask 1044392  }
 0x30b   :  { %v3956_v56 = vmax.f32 %v2139_v52, %v2233_v37  ;;  %v3960_v42 = vmax.f32 %v2137_v45, %v2231_v41  ;;  %v3964_v48 = vmax.f32 %v2138_v2, %v2232_v30  ;;  %2849 = vrot.lane.b32.xlu0 %v2848_v9, %s2892_s27  ;;  %2844 = vrot.lane.b32.xlu1 %v2843_v20, %s2892_s27  ;;  %vm3977_vm10 = vmor %vm2494_vm3, %vm2493_vm0 }
 0x30d   :  { %v2858_v51 = vpack.i.bf16 %v3956_v56, %v3964_v48  ;;  %v2853_v23 = vpack.i.bf16 %v3960_v42, %v3947_v17 }
 0x30f   :  { %2859 = vrot.lane.b32.xlu0 %v2858_v51, %s2892_s27  ;;  %2854 = vrot.lane.b32.xlu1 %v2853_v23, %s2892_s27 }
 0x367   :  { %v2805_v44 = vpop.permute.xlu1 %2804 }
 0x368   :  { %v2807_v45 = vunpack.i.h.bf16 %v2805_v44  ;;  %v2806_v52 = vunpack.i.l.bf16 %v2805_v44 }
 0x369   :  { %v2810_v46 = vpop.permute.xlu0 %2809 }
 0x36a   :  { %v2360_v2 = vsel %vm343_vm6, %v2806_v52, %v2807_v45  ;;  %v2812_v29 = vunpack.i.h.bf16 %v2810_v46  ;;  %v2811_v4 = vunpack.i.l.bf16 %v2810_v46 }
 0x36b   :  { %v2400_v33 = vmax.f32 %v3823_v49, %v2360_v2 }
 0x36c   :  { %v2365_v5 = vsel %vm343_vm6, %v2811_v4, %v2812_v29 }
 0x36d   :  { %v2682_v3 = vpack.c.bf16 %v2400_v33, %v2400_v33  ;;  %v2405_v40 = vmax.f32 %v3831_v39, %v2365_v5 }
 0x36f   :  { %2483 = vst.msk [vmem:[%s4094_s4 + $0x10] sm:$0xf] %vm2482_vm4, %v2682_v3  ;;  %v2685_v57 = vpack.c.bf16 %v2405_v40, %v2405_v40  ;;  %v2815_v60 = vpop.permute.xlu1 %2814 }
 0x370   :  { %2496 = vst.msk [vmem:[%s4094_s4 + $0x10] sm:$0xff] %vm3977_vm10, %v2912_v47  ;;  %v2817_v49 = vunpack.i.h.bf16 %v2815_v60  ;;  %v2816_v35 = vunpack.i.l.bf16 %v2815_v60 }
 0x371   :  { %2486 = vst.msk [vmem:[%s4094_s4 + $0x28] sm:$0xf] %vm2482_vm4, %v2685_v57  ;;  %v3996_v39 = vpop.permute.xlu0 %2819 }
 0x372   :  { %2497 = vst.msk [vmem:[%s4094_s4 + $0x28] sm:$0xff] %vm3977_vm10, %v2912_v47  ;;  %v2370_v59 = vsel %vm343_vm6, %v2816_v35, %v2817_v49  ;;  %v2822_v13 = vunpack.i.h.bf16 %v3996_v39  ;;  %v2821_v32 = vunpack.i.l.bf16 %v3996_v39 }
 0x373   :  { %v2410_v0 = vmax.f32 %v3851_v25, %v2370_v59 }
 0x374   :  { %v2375_v26 = vsel %vm343_vm6, %v2821_v32, %v2822_v13 }
 0x375   :  { %v2688_v22 = vpack.c.bf16 %v2410_v0, %v2410_v0  ;;  %v2415_v27 = vmax.f32 %v3861_v43, %v2375_v26  ;;  %v2830_v7 = vpop.permute.xlu0 %2829  ;;  %v2825_v38 = vpop.permute.xlu1 %2824 }
 0x376   :  { %v2832_v36 = vunpack.i.h.bf16 %v2830_v7  ;;  %v2831_v10 = vunpack.i.l.bf16 %v2830_v7  ;;  %v2827_v24 = vunpack.i.h.bf16 %v2825_v38  ;;  %v2826_v6 = vunpack.i.l.bf16 %v2825_v38 }
 0x377   :  { %2489 = vst.msk [vmem:[%s4094_s4 + $0x40] sm:$0xf] %vm2482_vm4, %v2688_v22  ;;  %v2691_v18 = vpack.c.bf16 %v2415_v27, %v2415_v27 }
 0x378   :  { %2498 = vst.msk [vmem:[%s4094_s4 + $0x40] sm:$0xff] %vm3977_vm10, %v2912_v47  ;;  %v2358_v25 = vsel %vm343_vm6, %v2831_v10, %v2832_v36  ;;  %v2359_v43 = vsel %vm343_vm6, %v2832_v36, %v2806_v52  ;;  %v2357_v54 = vsel %vm343_vm6, %v2827_v24, %v2831_v10  ;;  %v2356_v19 = vsel %vm343_vm6, %v2826_v6, %v2827_v24 }
 0x379   :  { %2492 = vst.msk [vmem:[%s4094_s4 + $0x58] sm:$0xf] %vm2482_vm4, %v2691_v18  ;;  %v2398_v8 = vmax.f32 %v3886_v63, %v2358_v25  ;;  %v2399_v61 = vmax.f32 %v3878_v1, %v2359_v43  ;;  %v2397_v53 = vmax.f32 %v3882_v58, %v2357_v54  ;;  %v2396_v62 = vmax.f32 %v3874_v12, %v2356_v19  ;;  %v2840_v21 = vpop.permute.xlu0 %2839  ;;  %v2835_v9 = vpop.permute.xlu1 %2834 }
 0x37a   :  { %2499 = vst.msk [vmem:[%s4094_s4 + $0x58] sm:$0xff] %vm3977_vm10, %v2912_v47  ;;  %v2842_v20 = vunpack.i.h.bf16 %v2840_v21  ;;  %v2841_v37 = vunpack.i.l.bf16 %v2840_v21  ;;  %v2837_v41 = vunpack.i.h.bf16 %v2835_v9  ;;  %v2836_v30 = vunpack.i.l.bf16 %v2835_v9 }
 0x37b   :  { %v2681_v63 = vpack.c.bf16 %v2399_v61, %v2398_v8  ;;  %v2680_v51 = vpack.c.bf16 %v2397_v53, %v2396_v62 }
 0x37c   :  { %v2363_v1 = vsel %vm343_vm6, %v2841_v37, %v2842_v20  ;;  %v2364_v58 = vsel %vm343_vm6, %v2842_v20, %v2811_v4  ;;  %v2362_v12 = vsel %vm343_vm6, %v2837_v41, %v2841_v37  ;;  %v2361_v23 = vsel %vm343_vm6, %v2836_v30, %v2837_v41 }
 0x37d   :  { %2481 = vst [vmem:[%s4094_s4 + $0x8] sm:$0xff] %v2681_v63  ;;  %2480 = vst [vmem:[%s4094_s4] sm:$0xff] %v2680_v51  ;;  %v2403_v47 = vmax.f32 %v3911_v15, %v2363_v1  ;;  %v2404_v44 = vmax.f32 %v3903_v11, %v2364_v58  ;;  %v2402_v45 = vmax.f32 %v3907_v14, %v2362_v12  ;;  %v2850_v46 = vpop.permute.xlu0 %2849  ;;  %v2845_v2 = vpop.permute.xlu1 %2844 }
 0x37e   :  { %v2401_v52 = vmax.f32 %v3891_v55, %v2361_v23  ;;  %v2852_v29 = vunpack.i.h.bf16 %v2850_v46  ;;  %v2851_v4 = vunpack.i.l.bf16 %v2850_v46  ;;  %v2847_v33 = vunpack.i.h.bf16 %v2845_v2 }
 0x37f   :  { %v2846_v5 = vunpack.i.l.bf16 %v2845_v2  ;;  %v2684_v50 = vpack.c.bf16 %v2404_v44, %v2403_v47 }
 0x380   :  { %v2683_v3 = vpack.c.bf16 %v2402_v45, %v2401_v52  ;;  %v2368_v40 = vsel %vm343_vm6, %v2851_v4, %v2852_v29  ;;  %v2369_v57 = vsel %vm343_vm6, %v2852_v29, %v2816_v35  ;;  %v2367_v15 = vsel %vm343_vm6, %v2847_v33, %v2851_v4 }
 0x381   :  { %v2366_v11 = vsel %vm343_vm6, %v2846_v5, %v2847_v33  ;;  %2485 = vst [vmem:[%s4094_s4 + $0x20] sm:$0xff] %v2684_v50  ;;  %v2408_v55 = vmax.f32 %v3937_v34, %v2368_v40  ;;  %v2409_v14 = vmax.f32 %v3929_v28, %v2369_v57  ;;  %v2407_v60 = vmax.f32 %v3933_v31, %v2367_v15  ;;  %v2860_v35 = vpop.permute.xlu0 %2859  ;;  %v2855_v59 = vpop.permute.xlu1 %2854 }
 0x382   :  { %2484 = vst [vmem:[%s4094_s4 + $0x18] sm:$0xff] %v2683_v3  ;;  %v2406_v49 = vmax.f32 %v3917_v16, %v2366_v11  ;;  %v2862_v13 = vunpack.i.h.bf16 %v2860_v35  ;;  %v2861_v0 = vunpack.i.l.bf16 %v2860_v35  ;;  %v2857_v26 = vunpack.i.h.bf16 %v2855_v59 }
 0x383   :  { %v2856_v22 = vunpack.i.l.bf16 %v2855_v59  ;;  %v2687_v27 = vpack.c.bf16 %v2409_v14, %v2408_v55 }
 0x384   :  { %v2686_v7 = vpack.c.bf16 %v2407_v60, %v2406_v49  ;;  %v2374_v38 = vsel %vm343_vm6, %v2862_v13, %v2821_v32  ;;  %v2373_v34 = vsel %vm343_vm6, %v2861_v0, %v2862_v13  ;;  %v2372_v28 = vsel %vm343_vm6, %v2857_v26, %v2861_v0 }
 0x385   :  { %v2371_v31 = vsel %vm343_vm6, %v2856_v22, %v2857_v26  ;;  %2488 = vst [vmem:[%s4094_s4 + $0x38] sm:$0xff] %v2687_v27  ;;  %v2414_v16 = vmax.f32 %v3956_v56, %v2374_v38  ;;  %v2413_v39 = vmax.f32 %v3964_v48, %v2373_v34  ;;  %v2412_v32 = vmax.f32 %v3960_v42, %v2372_v28 }
 0x386   :  { %2487 = vst [vmem:[%s4094_s4 + $0x30] sm:$0xff] %v2686_v7  ;;  %v2411_v36 = vmax.f32 %v3947_v17, %v2371_v31 }
 0x387   :  { %v2690_v10 = vpack.c.bf16 %v2414_v16, %v2413_v39 }
 0x388   :  { %v2689_v24 = vpack.c.bf16 %v2412_v32, %v2411_v36 }
 0x389   :  { %2491 = vst [vmem:[%s4094_s4 + $0x50] sm:$0xff] %v2690_v10 }
 0x38a   :  { %2490 = vst [vmem:[%s4094_s4 + $0x48] sm:$0xff] %v2689_v24 }

// kernel: convnet_forward.5
= control target key start
LH: loop header
LB: loop body
LE: loop exit
PB: predicated region body
PF: predicated region fallthrough
CT: control target
= control target key end

     0   :  { %v1345_v27 = vlaneseq  ;;  %v9715_v35 = vmov 1966171168   ;;  %vm9717_vm0 = vmmov 0   ;;  %s11880_s0 = inlined_call_operand.vmem [shape: bf16[2,10368], index: 0, kind: input, shape index: {}]   ;;  %s11881_s1 = inlined_call_operand.vmem [shape: bf16[10368,10], index: 1, kind: input, shape index: {}]   ;;  %s11882_s2 = inlined_call_operand.vmem [shape: f32[1,10], index: 2, kind: input, shape index: {}]   ;;  %s11883_s3 = inlined_call_operand.hbm [shape: f32[2,10], index: 3, kind: output, shape index: {}]  }
   0x1   :  { %v9033_v0 = vld [vmem:[%s11881_s1 + $0x40] sm:$0xff]   ;;  %v9037_v4 = vld [vmem:[%s11881_s1 + $0x48] sm:$0xff]   ;;  %v9041_v8 = vld [vmem:[%s11881_s1 + $0x50] sm:$0xff]   ;;  %v1343_v36 = vunpack.c.l.s4 %v9715_v35 }
   0x2   :  { %v9034_v1 = vld [vmem:[%s11881_s1] sm:$0xff]   ;;  %8120 = vmatprep.subr.bf16.mxu0 %v9033_v0  ;;  %v9038_v5 = vld [vmem:[%s11881_s1 + $0x8] sm:$0xff]   ;;  %v9042_v9 = vld [vmem:[%s11881_s1 + $0x10] sm:$0xff]   ;;  %v1346_v32 = vshrl.u32 %v1345_v27, 7 }
   0x3   :  { %v9035_v2 = vld [vmem:[%s11881_s1 + $0xc0] sm:$0xff]   ;;  %8121 = vmatpush3.bf16.msra.mxu0 %v9034_v1  ;;  %v9039_v6 = vld [vmem:[%s11881_s1 + $0xc8] sm:$0xff]   ;;  %v9043_v10 = vld [vmem:[%s11881_s1 + $0xd0] sm:$0xff]   ;;  %v1344_v39 = vunpack.c.0.s8 %v1343_v36 }
   0x4   :  { %v9036_v3 = vld [vmem:[%s11881_s1 + $0x80] sm:$0xff]   ;;  %8142 = vmatprep.subr.bf16.mxu1 %v9035_v2  ;;  %8122 = vmatprep.subr.bf16.mxu0 %v9037_v4  ;;  %v9040_v7 = vld [vmem:[%s11881_s1 + $0x88] sm:$0xff]   ;;  %v9044_v11 = vld [vmem:[%s11881_s1 + $0x90] sm:$0xff]  }
   0x5   :  { %8143 = vmatpush3.bf16.msra.mxu1 %v9036_v3  ;;  %v9045_v12 = vld [vmem:[%s11881_s1 + $0x58] sm:$0xff]   ;;  %v9049_v16 = vld [vmem:[%s11881_s1 + $0x60] sm:$0xff]   ;;  %v9053_v20 = vld [vmem:[%s11881_s1 + $0x68] sm:$0xff]   ;;  %v9844_v41 = vsub.s32 %v1344_v39, %v1346_v32 }
   0x6   :  { %8144 = vmatprep.subr.bf16.mxu1 %v9039_v6  ;;  %v9046_v13 = vld [vmem:[%s11881_s1 + $0x18] sm:$0xff]   ;;  %v9050_v17 = vld [vmem:[%s11881_s1 + $0x20] sm:$0xff]   ;;  %v9054_v21 = vld [vmem:[%s11881_s1 + $0x28] sm:$0xff]  }
   0x7   :  { %8123 = vmatpush3.bf16.msra.mxu0 %v9038_v5  ;;  %v9047_v14 = vld [vmem:[%s11881_s1 + $0xd8] sm:$0xff]   ;;  %v9051_v18 = vld [vmem:[%s11881_s1 + $0xe0] sm:$0xff]   ;;  %v9055_v22 = vld [vmem:[%s11881_s1 + $0xe8] sm:$0xff]  }
   0x8   :  { %8124 = vmatprep.subr.bf16.mxu0 %v9041_v8  ;;  %v9048_v15 = vld [vmem:[%s11881_s1 + $0x98] sm:$0xff]   ;;  %v9052_v19 = vld [vmem:[%s11881_s1 + $0xa0] sm:$0xff]   ;;  %v9056_v23 = vld [vmem:[%s11881_s1 + $0xa8] sm:$0xff]  }
   0x9   :  { %8145 = vmatpush3.bf16.msra.mxu1 %v9040_v7  ;;  %v9057_v24 = vld [vmem:[%s11881_s1 + $0x70] sm:$0xff]   ;;  %v9061_v29 = vld [vmem:[%s11881_s1 + $0x78] sm:$0xff]   ;;  %v16_v33 = vld [vmem:[%s11880_s0] sm:$0xff] }
   0xa   :  { %8146 = vmatprep.subr.bf16.mxu1 %v9043_v10  ;;  %v9058_v25 = vld [vmem:[%s11881_s1 + $0x30] sm:$0xff]   ;;  %v9062_v30 = vld [vmem:[%s11881_s1 + $0x38] sm:$0xff]   ;;  %v9066_v37 = vld [vmem:[%s11881_s1 + $0x140] sm:$0xff]   ;;  %v1341_v38 = vcombine.high %v16_v33, %v16_v33  ;;  %v1348_v42 = vrot.slane %v16_v33, %v9844_v41 }
   0xb   :  { %8125 = vmatpush3.bf16.msra.mxu0 %v9042_v9  ;;  %v9059_v26 = vld [vmem:[%s11881_s1 + $0xf0] sm:$0xff]   ;;  %v9063_v31 = vld [vmem:[%s11881_s1 + $0xf8] sm:$0xff]   ;;  %v9068_v40 = vld [vmem:[%s11881_s1 + $0x1c0] sm:$0xff]  }
   0xc   :  { %8126 = vmatprep.subr.bf16.mxu0 %v9045_v12  ;;  %v9060_v28 = vld [vmem:[%s11881_s1 + $0xb0] sm:$0xff]   ;;  %v9065_v34 = vld [vmem:[%s11881_s1 + $0xb8] sm:$0xff]   ;;  %v9848_v43 = vrot.slane %v1341_v38, %v9844_v41  ;;  %v1356_v44 = vcombine.high %v1348_v42, %v1348_v42  ;;  %v1364_v45 = vrot.slane %v1348_v42, %v9844_v41  ;;  %v9067_v47 = vld [vmem:[%s11881_s1 + $0x100] sm:$0xff]  }
   0xd   :  { %8147 = vmatpush3.bf16.msra.mxu1 %v9044_v11  ;;  %v9069_v49 = vld [vmem:[%s11881_s1 + $0x180] sm:$0xff]   ;;  %v9070_v52 = vld [vmem:[%s11881_s1 + $0x148] sm:$0xff]   ;;  %v9074_v58 = vld [vmem:[%s11881_s1 + $0x150] sm:$0xff]  }
   0xe   :  { %8148 = vmatprep.subr.bf16.mxu1 %v9047_v14  ;;  %v1357_v46 = vcombine.high %v9848_v43, %v9848_v43  ;;  %v1378_v48 = vrot.slane %v1356_v44, %v9844_v41  ;;  %v1386_v51 = vcombine.high %v1364_v45, %v1364_v45  ;;  %v9071_v54 = vld [vmem:[%s11881_s1 + $0x108] sm:$0xff]   ;;  %v9075_v59 = vld [vmem:[%s11881_s1 + $0x110] sm:$0xff]   ;;  %v9078_v62 = vld [vmem:[%s11881_s1 + $0x158] sm:$0xff]  }
   0xf   :  { %8127 = vmatpush3.bf16.msra.mxu0 %v9046_v13  ;;  %v9072_v55 = vld [vmem:[%s11881_s1 + $0x1c8] sm:$0xff]   ;;  %v9076_v60 = vld [vmem:[%s11881_s1 + $0x1d0] sm:$0xff]   ;;  %v9079_v63 = vld [vmem:[%s11881_s1 + $0x118] sm:$0xff]  }
  0x10   :  { %8128 = vmatprep.subr.bf16.mxu0 %v9049_v16  ;;  %v1385_v50 = vrot.slane %v1357_v46, %v9844_v41  ;;  %5846 = vmatprep.mubr.bf16.mxu0 %v1378_v48  ;;  %v1388_v53 = vcombine.high %v1378_v48, %v1378_v48  ;;  %v9073_v57 = vld [vmem:[%s11881_s1 + $0x188] sm:$0xff]   ;;  %v9077_v61 = vld [vmem:[%s11881_s1 + $0x190] sm:$0xff]   ;;  %v9080_v0 = vld [vmem:[%s11881_s1 + $0x1d8] sm:$0xff]  }
  0x11   :  { %8149 = vmatpush3.bf16.msra.mxu1 %v9048_v15  ;;  %v9081_v1 = vld [vmem:[%s11881_s1 + $0x198] sm:$0xff]   ;;  %v9082_v2 = vld [vmem:[%s11881_s1 + $0x160] sm:$0xff]   ;;  %v9086_v6 = vld [vmem:[%s11881_s1 + $0x168] sm:$0xff]  }
  0x12   :  { %8150 = vmatprep.subr.bf16.mxu1 %v9051_v18  ;;  %v1389_v56 = vcombine.high %v1385_v50, %v1385_v50  ;;  %5886 = vmatprep.mubr.bf16.mxu1 %v1388_v53  ;;  %v9083_v3 = vld [vmem:[%s11881_s1 + $0x120] sm:$0xff]   ;;  %v9087_v7 = vld [vmem:[%s11881_s1 + $0x128] sm:$0xff]   ;;  %v9090_v10 = vld [vmem:[%s11881_s1 + $0x170] sm:$0xff]   ;;  %v1371_v18 = vrot.slane %v9848_v43, %v9844_v41 }
  0x13   :  { %8129 = vmatpush3.bf16.msra.mxu0 %v9050_v17  ;;  %v9084_v4 = vld [vmem:[%s11881_s1 + $0x1e0] sm:$0xff]   ;;  %v9088_v8 = vld [vmem:[%s11881_s1 + $0x1e8] sm:$0xff]   ;;  %v9091_v11 = vld [vmem:[%s11881_s1 + $0x130] sm:$0xff]  }
  0x14   :  { %8130 = vmatprep.subr.bf16.mxu0 %v9053_v20  ;;  %v9085_v5 = vld [vmem:[%s11881_s1 + $0x1a0] sm:$0xff]   ;;  %v9089_v9 = vld [vmem:[%s11881_s1 + $0x1a8] sm:$0xff]   ;;  %v9092_v12 = vld [vmem:[%s11881_s1 + $0x1f0] sm:$0xff]  }
  0x15   :  { %8151 = vmatpush3.bf16.msra.mxu1 %v9052_v19  ;;  %v9093_v13 = vld [vmem:[%s11881_s1 + $0x1b0] sm:$0xff]   ;;  %v9094_v14 = vld [vmem:[%s11881_s1 + $0x178] sm:$0xff]   ;;  %v9098_v19 = vld [vmem:[%s11881_s1 + $0x240] sm:$0xff]  }
  0x16   :  { %8152 = vmatprep.subr.bf16.mxu1 %v9055_v22  ;;  %v9095_v15 = vld [vmem:[%s11881_s1 + $0x138] sm:$0xff]   ;;  %v9099_v20 = vld [vmem:[%s11881_s1 + $0x200] sm:$0xff]   ;;  %v9105_v27 = vld [vmem:[%s11881_s1 + $0x288] sm:$0xff]  }
  0x17   :  { %8131 = vmatpush3.bf16.msra.mxu0 %v9054_v21  ;;  %v9096_v16 = vld [vmem:[%s11881_s1 + $0x1f8] sm:$0xff]   ;;  %v9100_v21 = vld [vmem:[%s11881_s1 + $0x2c0] sm:$0xff]   ;;  %v9119_v42 = vld [vmem:[%s11881_s1 + $0x228] sm:$0xff]  }
  0x18   :  { %8132 = vmatprep.subr.bf16.mxu0 %v9057_v24  ;;  %v9097_v17 = vld [vmem:[%s11881_s1 + $0x1b8] sm:$0xff]   ;;  %v9101_v22 = vld [vmem:[%s11881_s1 + $0x280] sm:$0xff]   ;;  %v9102_v24 = vld [vmem:[%s11881_s1 + $0x248] sm:$0xff]  }
  0x19   :  { %8153 = vmatpush3.bf16.msra.mxu1 %v9056_v23  ;;  %v1387_v23 = vcombine.high %v1371_v18, %v1371_v18  ;;  %v9110_v32 = vld [vmem:[%s11881_s1 + $0x258] sm:$0xff]   ;;  %v9114_v36 = vld [vmem:[%s11881_s1 + $0x260] sm:$0xff]   ;;  %v9120_v43 = vld [vmem:[%s11881_s1 + $0x2e8] sm:$0xff]  }
  0x1a   :  { %8154 = vmatprep.subr.bf16.mxu1 %v9059_v26  ;;  %v9104_v26 = vld [vmem:[%s11881_s1 + $0x2c8] sm:$0xff]   ;;  %v9111_v33 = vld [vmem:[%s11881_s1 + $0x218] sm:$0xff]   ;;  %v9116_v38 = vld [vmem:[%s11881_s1 + $0x2e0] sm:$0xff]  }
  0x1b   :  { %8133 = vmatpush3.bf16.msra.mxu0 %v9058_v25  ;;  %v9103_v25 = vld [vmem:[%s11881_s1 + $0x208] sm:$0xff]   ;;  %v9113_v35 = vld [vmem:[%s11881_s1 + $0x298] sm:$0xff]   ;;  %v9117_v39 = vld [vmem:[%s11881_s1 + $0x2a0] sm:$0xff]  }
  0x1c   :  { %8134 = vmatprep.subr.bf16.mxu0 %v9061_v29  ;;  %v9107_v29 = vld [vmem:[%s11881_s1 + $0x210] sm:$0xff]   ;;  %v9121_v44 = vld [vmem:[%s11881_s1 + $0x2a8] sm:$0xff]  }
  0x1d   :  { %8155 = vmatpush3.bf16.msra.mxu1 %v9060_v28  ;;  %v9106_v28 = vld [vmem:[%s11881_s1 + $0x250] sm:$0xff]   ;;  %v17_v46 = vld [vmem:[%s11880_s0 + $0x8] sm:$0xff] }
  0x1e   :  { %8156 = vmatprep.subr.bf16.mxu1 %v9063_v31  ;;  %v9109_v31 = vld [vmem:[%s11881_s1 + $0x290] sm:$0xff]   ;;  %v1397_v48 = vrot.slane %v17_v46, %v9844_v41 }
  0x1f   :  { %8135 = vmatpush3.bf16.msra.mxu0 %v9062_v30  ;;  %v9108_v30 = vld [vmem:[%s11881_s1 + $0x2d0] sm:$0xff]  }
  0x20   :  { %8164 = vmatprep.subr.bf16.mxu0 %v9066_v37  ;;  %v9115_v37 = vld [vmem:[%s11881_s1 + $0x220] sm:$0xff]  }
  0x21   :  { %8157 = vmatpush3.bf16.msra.mxu1 %v9065_v34  ;;  %v9112_v34 = vld [vmem:[%s11881_s1 + $0x2d8] sm:$0xff]  }
  0x22   :  { %8186 = vmatprep.subr.bf16.mxu1 %v9068_v40  ;;  %5847 = vmatmul.mubr.bf16.vlgmr.msra.gmra.mrb[0].mxu0 %v1364_v45  ;;  %v9118_v40 = vld [vmem:[%s11881_s1 + $0x268] sm:$0xff]   ;;  %v9122_v45 = vld [vmem:[%s11881_s1 + $0x270] sm:$0xff]  }
  0x23   :  { %8165 = vmatpush3.bf16.msra.mxu0 %v9067_v47  ;;  %5926 = vmatprep.mubr.bf16.mxu0 %v1385_v50  ;;  %v9123_v47 = vld [vmem:[%s11881_s1 + $0x230] sm:$0xff]  }
  0x24   :  { %5887 = vmatmul.mubr.bf16.vlgmr.msra.gmra.mrb[0].mxu1 %v1386_v51  ;;  %8166 = vmatprep.subr.bf16.mxu0 %v9070_v52  ;;  %v9124_v50 = vld [vmem:[%s11881_s1 + $0x2f0] sm:$0xff]   ;;  %v1405_v52 = vcombine.high %v1397_v48, %v1397_v48 }
  0x25   :  { %8187 = vmatpush3.bf16.msra.mxu1 %v9069_v49  ;;  %5966 = vmatprep.mubr.bf16.mxu1 %v1389_v56  ;;  %v1390_v49 = vcombine.high %v17_v46, %v17_v46  ;;  %v9125_v51 = vld [vmem:[%s11881_s1 + $0x2b0] sm:$0xff]  }
  0x26   :  { %8188 = vmatprep.subr.bf16.mxu1 %v9072_v55  ;;  %v9127_v55 = vld [vmem:[%s11881_s1 + $0x238] sm:$0xff]   ;;  %v1427_v56 = vrot.slane %v1405_v52, %v9844_v41  ;;  %v9173_v46 = vld [vmem:[%s11881_s1 + $0x4d0] sm:$0xff]   ;;  %v9179_v52 = vld [vmem:[%s11881_s1 + $0x460] sm:$0xff]  }
  0x27   :  { %8167 = vmatpush3.bf16.msra.mxu0 %v9071_v54  ;;  %v10036_v53 = vrot.slane %v1390_v49, %v9844_v41  ;;  %v9126_v54 = vld [vmem:[%s11881_s1 + $0x278] sm:$0xff]  }
  0x28   :  { %8168 = vmatprep.subr.bf16.mxu0 %v9074_v58  ;;  %v9128_v58 = vld [vmem:[%s11881_s1 + $0x2f8] sm:$0xff]  }
  0x29   :  { %8189 = vmatpush3.bf16.msra.mxu1 %v9073_v57  ;;  %v1406_v57 = vcombine.high %v10036_v53, %v10036_v53  ;;  %v9176_v49 = vld [vmem:[%s11881_s1 + $0x418] sm:$0xff]  }
  0x2a   :  { %8190 = vmatprep.subr.bf16.mxu1 %v9076_v60  ;;  %v1437_v60 = vcombine.high %v1427_v56, %v1427_v56 }
  0x2b   :  { %8169 = vmatpush3.bf16.msra.mxu0 %v9075_v59  ;;  %v9129_v59 = vld [vmem:[%s11881_s1 + $0x2b8] sm:$0xff]  }
  0x2c   :  { %8170 = vmatprep.subr.bf16.mxu0 %v9078_v62  ;;  %v9130_v62 = vld [vmem:[%s11881_s1 + $0x340] sm:$0xff]  }
  0x2d   :  { %8191 = vmatpush3.bf16.msra.mxu1 %v9077_v61  ;;  %v1413_v61 = vrot.slane %v1397_v48, %v9844_v41  ;;  %v9175_v48 = vld [vmem:[%s11881_s1 + $0x458] sm:$0xff]  }
  0x2e   :  { %8192 = vmatprep.subr.bf16.mxu1 %v9080_v0  ;;  %v1434_v0 = vrot.slane %v1406_v57, %v9844_v41  ;;  %v9184_v57 = vld [vmem:[%s11881_s1 + $0x428] sm:$0xff]  }
  0x2f   :  { %8171 = vmatpush3.bf16.msra.mxu0 %v9079_v63  ;;  %v9131_v63 = vld [vmem:[%s11881_s1 + $0x300] sm:$0xff]  }
  0x30   :  { %8172 = vmatprep.subr.bf16.mxu0 %v9082_v2  ;;  %v9133_v2 = vld [vmem:[%s11881_s1 + $0x380] sm:$0xff]  }
  0x31   :  { %8193 = vmatpush3.bf16.msra.mxu1 %v9081_v1  ;;  %v9132_v1 = vld [vmem:[%s11881_s1 + $0x3c0] sm:$0xff]  }
  0x32   :  { %8194 = vmatprep.subr.bf16.mxu1 %v9084_v4  ;;  %v9134_v4 = vld [vmem:[%s11881_s1 + $0x348] sm:$0xff]  }
  0x33   :  { %8173 = vmatpush3.bf16.msra.mxu0 %v9083_v3  ;;  %v1435_v3 = vcombine.high %v1413_v61, %v1413_v61 }
  0x34   :  { %8174 = vmatprep.subr.bf16.mxu0 %v9086_v6  ;;  %v1438_v6 = vcombine.high %v1434_v0, %v1434_v0 }
  0x35   :  { %8195 = vmatpush3.bf16.msra.mxu1 %v9085_v5  ;;  %v9135_v5 = vld [vmem:[%s11881_s1 + $0x308] sm:$0xff]  }
  0x36   :  { %8196 = vmatprep.subr.bf16.mxu1 %v9088_v8  ;;  %v9137_v8 = vld [vmem:[%s11881_s1 + $0x388] sm:$0xff]  }
  0x37   :  { %8175 = vmatpush3.bf16.msra.mxu0 %v9087_v7  ;;  %v9136_v7 = vld [vmem:[%s11881_s1 + $0x3c8] sm:$0xff]  }
  0x38   :  { %8176 = vmatprep.subr.bf16.mxu0 %v9090_v10  ;;  %v9139_v10 = vld [vmem:[%s11881_s1 + $0x310] sm:$0xff]  }
  0x39   :  { %8197 = vmatpush3.bf16.msra.mxu1 %v9089_v9  ;;  %v9138_v9 = vld [vmem:[%s11881_s1 + $0x350] sm:$0xff]  }
  0x3a   :  { %8198 = vmatprep.subr.bf16.mxu1 %v9092_v12  ;;  %v9141_v12 = vld [vmem:[%s11881_s1 + $0x390] sm:$0xff]  }
  0x3b   :  { %8177 = vmatpush3.bf16.msra.mxu0 %v9091_v11  ;;  %v9140_v11 = vld [vmem:[%s11881_s1 + $0x3d0] sm:$0xff]  }
  0x3c   :  { %8178 = vmatprep.subr.bf16.mxu0 %v9094_v14  ;;  %v9143_v14 = vld [vmem:[%s11881_s1 + $0x318] sm:$0xff]  }
  0x3d   :  { %8199 = vmatpush3.bf16.msra.mxu1 %v9093_v13  ;;  %v9142_v13 = vld [vmem:[%s11881_s1 + $0x358] sm:$0xff]  }
  0x3e   :  { %8200 = vmatprep.subr.bf16.mxu1 %v9096_v16  ;;  %v9145_v16 = vld [vmem:[%s11881_s1 + $0x398] sm:$0xff]  }
  0x3f   :  { %8179 = vmatpush3.bf16.msra.mxu0 %v9095_v15  ;;  %v9144_v15 = vld [vmem:[%s11881_s1 + $0x3d8] sm:$0xff]  }
  0x40   :  { %8208 = vmatprep.subr.bf16.mxu0 %v9098_v19  ;;  %v9148_v19 = vld [vmem:[%s11881_s1 + $0x3e0] sm:$0xff]  }
  0x41   :  { %8201 = vmatpush3.bf16.msra.mxu1 %v9097_v17  ;;  %v9146_v17 = vld [vmem:[%s11881_s1 + $0x360] sm:$0xff]  }
  0x42   :  { %5927 = vmatmul.mubr.bf16.vlgmr.msra.gmra.mrb[4].mxu0 %v1371_v18  ;;  %8230 = vmatprep.subr.bf16.mxu1 %v9100_v21  ;;  %v9147_v18 = vld [vmem:[%s11881_s1 + $0x320] sm:$0xff]   ;;  %v9150_v21 = vld [vmem:[%s11881_s1 + $0x368] sm:$0xff]  }
  0x43   :  { %8209 = vmatpush3.bf16.msra.mxu0 %v9099_v20  ;;  %6006 = vmatprep.mubr.bf16.mxu0 %v1427_v56  ;;  %v9149_v20 = vld [vmem:[%s11881_s1 + $0x3a0] sm:$0xff]   ;;  %v9183_v56 = vld [vmem:[%s11881_s1 + $0x468] sm:$0xff]  }
  0x44   :  { %5967 = vmatmul.mubr.bf16.vlgmr.msra.gmra.mrb[4].mxu1 %v1387_v23  ;;  %8210 = vmatprep.subr.bf16.mxu0 %v9102_v24  ;;  %v9152_v23 = vld [vmem:[%s11881_s1 + $0x3e8] sm:$0xff]  }
  0x45   :  { %8231 = vmatpush3.bf16.msra.mxu1 %v9101_v22  ;;  %6046 = vmatprep.mubr.bf16.mxu1 %v1437_v60  ;;  %v9151_v22 = vld [vmem:[%s11881_s1 + $0x328] sm:$0xff]   ;;  %v9187_v60 = vld [vmem:[%s11881_s1 + $0x470] sm:$0xff]  }
  0x46   :  { %8232 = vmatprep.subr.bf16.mxu1 %v9104_v26  ;;  %v9153_v24 = vld [vmem:[%s11881_s1 + $0x3a8] sm:$0xff]   ;;  %v9155_v26 = vld [vmem:[%s11881_s1 + $0x330] sm:$0xff]  }
  0x47   :  { %8211 = vmatpush3.bf16.msra.mxu0 %v9103_v25  ;;  %v9154_v25 = vld [vmem:[%s11881_s1 + $0x370] sm:$0xff]  }
  0x48   :  { %8212 = vmatprep.subr.bf16.mxu0 %v9106_v28  ;;  %v9157_v28 = vld [vmem:[%s11881_s1 + $0x3b0] sm:$0xff]  }
  0x49   :  { %8233 = vmatpush3.bf16.msra.mxu1 %v9105_v27  ;;  %v9156_v27 = vld [vmem:[%s11881_s1 + $0x3f0] sm:$0xff]  }
  0x4a   :  { %8234 = vmatprep.subr.bf16.mxu1 %v9108_v30  ;;  %v9159_v30 = vld [vmem:[%s11881_s1 + $0x338] sm:$0xff]  }
  0x4b   :  { %8213 = vmatpush3.bf16.msra.mxu0 %v9107_v29  ;;  %v9158_v29 = vld [vmem:[%s11881_s1 + $0x378] sm:$0xff]  }
  0x4c   :  { %8214 = vmatprep.subr.bf16.mxu0 %v9110_v32  ;;  %v9162_v32 = vld [vmem:[%s11881_s1 + $0x3b8] sm:$0xff]  }
  0x4d   :  { %8235 = vmatpush3.bf16.msra.mxu1 %v9109_v31  ;;  %v9160_v31 = vld [vmem:[%s11881_s1 + $0x3f8] sm:$0xff]  }
  0x4e   :  { %8236 = vmatprep.subr.bf16.mxu1 %v9112_v34  ;;  %v9163_v34 = vld [vmem:[%s11881_s1 + $0x440] sm:$0xff]  }
  0x4f   :  { %8215 = vmatpush3.bf16.msra.mxu0 %v9111_v33  ;;  %v1420_v33 = vrot.slane %v10036_v53, %v9844_v41  ;;  %v9180_v53 = vld [vmem:[%s11881_s1 + $0x420] sm:$0xff]  }
  0x50   :  { %8216 = vmatprep.subr.bf16.mxu0 %v9114_v36  ;;  %v9165_v36 = vld [vmem:[%s11881_s1 + $0x4c0] sm:$0xff]  }
  0x51   :  { %8237 = vmatpush3.bf16.msra.mxu1 %v9113_v35  ;;  %v9164_v35 = vld [vmem:[%s11881_s1 + $0x400] sm:$0xff]  }
  0x52   :  { %8238 = vmatprep.subr.bf16.mxu1 %v9116_v38  ;;  %v1436_v38 = vcombine.high %v1420_v33, %v1420_v33 }
  0x53   :  { %8217 = vmatpush3.bf16.msra.mxu0 %v9115_v37  ;;  %v9166_v37 = vld [vmem:[%s11881_s1 + $0x480] sm:$0xff]  }
  0x54   :  { %8218 = vmatprep.subr.bf16.mxu0 %v9118_v40  ;;  %v9168_v40 = vld [vmem:[%s11881_s1 + $0x408] sm:$0xff]  }
  0x55   :  { %8239 = vmatpush3.bf16.msra.mxu1 %v9117_v39  ;;  %v9167_v39 = vld [vmem:[%s11881_s1 + $0x448] sm:$0xff]  }
  0x56   :  { %8240 = vmatprep.subr.bf16.mxu1 %v9120_v43  ;;  %v9170_v43 = vld [vmem:[%s11881_s1 + $0x488] sm:$0xff]  }
  0x57   :  { %8219 = vmatpush3.bf16.msra.mxu0 %v9119_v42  ;;  %v9169_v42 = vld [vmem:[%s11881_s1 + $0x4c8] sm:$0xff]  }
  0x58   :  { %8220 = vmatprep.subr.bf16.mxu0 %v9122_v45  ;;  %v9172_v45 = vld [vmem:[%s11881_s1 + $0x410] sm:$0xff]  }
  0x59   :  { %8241 = vmatpush3.bf16.msra.mxu1 %v9121_v44  ;;  %v9171_v44 = vld [vmem:[%s11881_s1 + $0x450] sm:$0xff]  }
  0x5a   :  { %8242 = vmatprep.subr.bf16.mxu1 %v9124_v50  ;;  %v9177_v50 = vld [vmem:[%s11881_s1 + $0x4d8] sm:$0xff]  }
  0x5b   :  { %8221 = vmatpush3.bf16.msra.mxu0 %v9123_v47  ;;  %v9174_v47 = vld [vmem:[%s11881_s1 + $0x490] sm:$0xff]  }
  0x5c   :  { %8222 = vmatprep.subr.bf16.mxu0 %v9126_v54  ;;  %v9181_v54 = vld [vmem:[%s11881_s1 + $0x4e0] sm:$0xff]  }
  0x5d   :  { %8243 = vmatpush3.bf16.msra.mxu1 %v9125_v51  ;;  %v9178_v51 = vld [vmem:[%s11881_s1 + $0x498] sm:$0xff]  }
  0x5e   :  { %8244 = vmatprep.subr.bf16.mxu1 %v9128_v58  ;;  %v9185_v58 = vld [vmem:[%s11881_s1 + $0x4e8] sm:$0xff]  }
  0x5f   :  { %8223 = vmatpush3.bf16.msra.mxu0 %v9127_v55  ;;  %v9182_v55 = vld [vmem:[%s11881_s1 + $0x4a0] sm:$0xff]  }
  0x60   :  { %8252 = vmatprep.subr.bf16.mxu0 %v9130_v62  ;;  %v9188_v62 = vld [vmem:[%s11881_s1 + $0x430] sm:$0xff]  }
  0x61   :  { %8245 = vmatpush3.bf16.msra.mxu1 %v9129_v59  ;;  %v9186_v59 = vld [vmem:[%s11881_s1 + $0x4a8] sm:$0xff]  }
  0x62   :  { %6007 = vmatmul.mubr.bf16.vlgmr.msra.gmra.mrb[8].mxu0 %v1413_v61  ;;  %8274 = vmatprep.subr.bf16.mxu1 %v9132_v1  ;;  %v18_v61 = vld [vmem:[%s11880_s0 + $0x10] sm:$0xff] }
  0x63   :  { %8253 = vmatpush3.bf16.msra.mxu0 %v9131_v63  ;;  %6086 = vmatprep.mubr.bf16.mxu0 %v1434_v0  ;;  %v1446_v63 = vrot.slane %v18_v61, %v9844_v41  ;;  %v1439_v0 = vcombine.high %v18_v61, %v18_v61  ;;  %v9189_v1 = vld [vmem:[%s11881_s1 + $0x4f0] sm:$0xff]  }
  0x64   :  { %6047 = vmatmul.mubr.bf16.vlgmr.msra.gmra.mrb[8].mxu1 %v1435_v3  ;;  %8254 = vmatprep.subr.bf16.mxu0 %v9134_v4  ;;  %v9238_v61 = vld [vmem:[%s11881_s1 + $0x6d0] sm:$0xff]  }
  0x65   :  { %8275 = vmatpush3.bf16.msra.mxu1 %v9133_v2  ;;  %6126 = vmatprep.mubr.bf16.mxu1 %v1438_v6  ;;  %v9190_v2 = vld [vmem:[%s11881_s1 + $0x4b0] sm:$0xff]   ;;  %v1454_v3 = vcombine.high %v1446_v63, %v1446_v63  ;;  %v10242_v4 = vrot.slane %v1439_v0, %v9844_v41  ;;  %v9192_v6 = vld [vmem:[%s11881_s1 + $0x438] sm:$0xff]  }
  0x66   :  { %8276 = vmatprep.subr.bf16.mxu1 %v9136_v7  ;;  %v9241_v0 = vld [vmem:[%s11881_s1 + $0x618] sm:$0xff]  }
  0x67   :  { %8255 = vmatpush3.bf16.msra.mxu0 %v9135_v5  ;;  %v9191_v5 = vld [vmem:[%s11881_s1 + $0x478] sm:$0xff]   ;;  %v1476_v7 = vrot.slane %v1454_v3, %v9844_v41  ;;  %v9244_v3 = vld [vmem:[%s11881_s1 + $0x660] sm:$0xff]  }
  0x68   :  { %8256 = vmatprep.subr.bf16.mxu0 %v9138_v9  ;;  %v9193_v9 = vld [vmem:[%s11881_s1 + $0x4f8] sm:$0xff]  }
  0x69   :  { %8277 = vmatpush3.bf16.msra.mxu1 %v9137_v8  ;;  %v1455_v8 = vcombine.high %v10242_v4, %v10242_v4 }
  0x6a   :  { %8278 = vmatprep.subr.bf16.mxu1 %v9140_v11  ;;  %v1486_v11 = vcombine.high %v1476_v7, %v1476_v7 }
  0x6b   :  { %8257 = vmatpush3.bf16.msra.mxu0 %v9139_v10  ;;  %v9194_v10 = vld [vmem:[%s11881_s1 + $0x4b8] sm:$0xff]  }
  0x6c   :  { %8258 = vmatprep.subr.bf16.mxu0 %v9142_v13  ;;  %v9195_v13 = vld [vmem:[%s11881_s1 + $0x540] sm:$0xff]  }
  0x6d   :  { %8279 = vmatpush3.bf16.msra.mxu1 %v9141_v12  ;;  %v1462_v12 = vrot.slane %v1446_v63, %v9844_v41  ;;  %v9240_v63 = vld [vmem:[%s11881_s1 + $0x658] sm:$0xff]  }
  0x6e   :  { %8280 = vmatprep.subr.bf16.mxu1 %v9144_v15  ;;  %v1483_v15 = vrot.slane %v1455_v8, %v9844_v41  ;;  %v9249_v8 = vld [vmem:[%s11881_s1 + $0x628] sm:$0xff]  }
  0x6f   :  { %8259 = vmatpush3.bf16.msra.mxu0 %v9143_v14  ;;  %v9196_v14 = vld [vmem:[%s11881_s1 + $0x500] sm:$0xff]  }
  0x70   :  { %8260 = vmatprep.subr.bf16.mxu0 %v9146_v17  ;;  %v9198_v17 = vld [vmem:[%s11881_s1 + $0x580] sm:$0xff]  }
  0x71   :  { %8281 = vmatpush3.bf16.msra.mxu1 %v9145_v16  ;;  %v9197_v16 = vld [vmem:[%s11881_s1 + $0x5c0] sm:$0xff]  }
  0x72   :  { %8282 = vmatprep.subr.bf16.mxu1 %v9148_v19  ;;  %v9199_v19 = vld [vmem:[%s11881_s1 + $0x548] sm:$0xff]  }
  0x73   :  { %8261 = vmatpush3.bf16.msra.mxu0 %v9147_v18  ;;  %v1484_v18 = vcombine.high %v1462_v12, %v1462_v12 }
  0x74   :  { %8262 = vmatprep.subr.bf16.mxu0 %v9150_v21  ;;  %v1487_v21 = vcombine.high %v1483_v15, %v1483_v15 }
  0x75   :  { %8283 = vmatpush3.bf16.msra.mxu1 %v9149_v20  ;;  %v9200_v20 = vld [vmem:[%s11881_s1 + $0x508] sm:$0xff]  }
  0x76   :  { %8284 = vmatprep.subr.bf16.mxu1 %v9152_v23  ;;  %v9202_v23 = vld [vmem:[%s11881_s1 + $0x588] sm:$0xff]  }
  0x77   :  { %8263 = vmatpush3.bf16.msra.mxu0 %v9151_v22  ;;  %v9201_v22 = vld [vmem:[%s11881_s1 + $0x5c8] sm:$0xff]  }
  0x78   :  { %8264 = vmatprep.subr.bf16.mxu0 %v9154_v25  ;;  %v9204_v25 = vld [vmem:[%s11881_s1 + $0x510] sm:$0xff]  }
  0x79   :  { %8285 = vmatpush3.bf16.msra.mxu1 %v9153_v24  ;;  %v9203_v24 = vld [vmem:[%s11881_s1 + $0x550] sm:$0xff]  }
  0x7a   :  { %8286 = vmatprep.subr.bf16.mxu1 %v9156_v27  ;;  %v9206_v27 = vld [vmem:[%s11881_s1 + $0x590] sm:$0xff]  }
  0x7b   :  { %8265 = vmatpush3.bf16.msra.mxu0 %v9155_v26  ;;  %v9205_v26 = vld [vmem:[%s11881_s1 + $0x5d0] sm:$0xff]  }
  0x7c   :  { %8266 = vmatprep.subr.bf16.mxu0 %v9158_v29  ;;  %v9208_v29 = vld [vmem:[%s11881_s1 + $0x518] sm:$0xff]  }
  0x7d   :  { %8287 = vmatpush3.bf16.msra.mxu1 %v9157_v28  ;;  %v9207_v28 = vld [vmem:[%s11881_s1 + $0x558] sm:$0xff]  }
  0x7e   :  { %8288 = vmatprep.subr.bf16.mxu1 %v9160_v31  ;;  %v9210_v31 = vld [vmem:[%s11881_s1 + $0x598] sm:$0xff]  }
  0x7f   :  { %8267 = vmatpush3.bf16.msra.mxu0 %v9159_v30  ;;  %v9209_v30 = vld [vmem:[%s11881_s1 + $0x5d8] sm:$0xff]  }
  0x80   :  { %8296 = vmatprep.subr.bf16.mxu0 %v9163_v34  ;;  %v9213_v34 = vld [vmem:[%s11881_s1 + $0x5e0] sm:$0xff]  }
  0x81   :  { %8289 = vmatpush3.bf16.msra.mxu1 %v9162_v32  ;;  %v9211_v32 = vld [vmem:[%s11881_s1 + $0x560] sm:$0xff]  }
  0x82   :  { %6087 = vmatmul.mubr.bf16.vlgmr.msra.gmra.mrb[12].mxu0 %v1420_v33  ;;  %8318 = vmatprep.subr.bf16.mxu1 %v9165_v36  ;;  %v9212_v33 = vld [vmem:[%s11881_s1 + $0x520] sm:$0xff]   ;;  %v9215_v36 = vld [vmem:[%s11881_s1 + $0x568] sm:$0xff]  }
  0x83   :  { %8297 = vmatpush3.bf16.msra.mxu0 %v9164_v35  ;;  %6166 = vmatprep.mubr.bf16.mxu0 %v1476_v7  ;;  %v9214_v35 = vld [vmem:[%s11881_s1 + $0x5a0] sm:$0xff]   ;;  %v9248_v7 = vld [vmem:[%s11881_s1 + $0x668] sm:$0xff]  }
  0x84   :  { %6127 = vmatmul.mubr.bf16.vlgmr.msra.gmra.mrb[12].mxu1 %v1436_v38  ;;  %8298 = vmatprep.subr.bf16.mxu0 %v9167_v39  ;;  %v9217_v38 = vld [vmem:[%s11881_s1 + $0x5e8] sm:$0xff]  }
  0x85   :  { %8319 = vmatpush3.bf16.msra.mxu1 %v9166_v37  ;;  %6206 = vmatprep.mubr.bf16.mxu1 %v1486_v11  ;;  %v9216_v37 = vld [vmem:[%s11881_s1 + $0x528] sm:$0xff]   ;;  %v9252_v11 = vld [vmem:[%s11881_s1 + $0x670] sm:$0xff]  }
  0x86   :  { %8320 = vmatprep.subr.bf16.mxu1 %v9169_v42  ;;  %v9218_v39 = vld [vmem:[%s11881_s1 + $0x5a8] sm:$0xff]   ;;  %v9220_v42 = vld [vmem:[%s11881_s1 + $0x530] sm:$0xff]  }
  0x87   :  { %8299 = vmatpush3.bf16.msra.mxu0 %v9168_v40  ;;  %v9219_v40 = vld [vmem:[%s11881_s1 + $0x570] sm:$0xff]  }
  0x88   :  { %8300 = vmatprep.subr.bf16.mxu0 %v9171_v44  ;;  %v9222_v44 = vld [vmem:[%s11881_s1 + $0x5b0] sm:$0xff]  }
  0x89   :  { %8321 = vmatpush3.bf16.msra.mxu1 %v9170_v43  ;;  %v9221_v43 = vld [vmem:[%s11881_s1 + $0x5f0] sm:$0xff]  }
  0x8a   :  { %8322 = vmatprep.subr.bf16.mxu1 %v9173_v46  ;;  %v9224_v46 = vld [vmem:[%s11881_s1 + $0x538] sm:$0xff]  }
  0x8b   :  { %8301 = vmatpush3.bf16.msra.mxu0 %v9172_v45  ;;  %v9223_v45 = vld [vmem:[%s11881_s1 + $0x578] sm:$0xff]  }
  0x8c   :  { %8302 = vmatprep.subr.bf16.mxu0 %v9175_v48  ;;  %v9227_v48 = vld [vmem:[%s11881_s1 + $0x5b8] sm:$0xff]  }
  0x8d   :  { %8323 = vmatpush3.bf16.msra.mxu1 %v9174_v47  ;;  %v9225_v47 = vld [vmem:[%s11881_s1 + $0x5f8] sm:$0xff]  }
  0x8e   :  { %8324 = vmatprep.subr.bf16.mxu1 %v9177_v50  ;;  %v9228_v50 = vld [vmem:[%s11881_s1 + $0x640] sm:$0xff]  }
  0x8f   :  { %8303 = vmatpush3.bf16.msra.mxu0 %v9176_v49  ;;  %v1469_v49 = vrot.slane %v10242_v4, %v9844_v41  ;;  %v9245_v4 = vld [vmem:[%s11881_s1 + $0x620] sm:$0xff]  }
  0x90   :  { %8304 = vmatprep.subr.bf16.mxu0 %v9179_v52  ;;  %v9230_v52 = vld [vmem:[%s11881_s1 + $0x6c0] sm:$0xff]  }
  0x91   :  { %8325 = vmatpush3.bf16.msra.mxu1 %v9178_v51  ;;  %v9229_v51 = vld [vmem:[%s11881_s1 + $0x600] sm:$0xff]  }
  0x92   :  { %8326 = vmatprep.subr.bf16.mxu1 %v9181_v54  ;;  %v1485_v54 = vcombine.high %v1469_v49, %v1469_v49 }
  0x93   :  { %8305 = vmatpush3.bf16.msra.mxu0 %v9180_v53  ;;  %v9231_v53 = vld [vmem:[%s11881_s1 + $0x680] sm:$0xff]  }
  0x94   :  { %8306 = vmatprep.subr.bf16.mxu0 %v9183_v56  ;;  %v9233_v56 = vld [vmem:[%s11881_s1 + $0x608] sm:$0xff]  }
  0x95   :  { %8327 = vmatpush3.bf16.msra.mxu1 %v9182_v55  ;;  %v9232_v55 = vld [vmem:[%s11881_s1 + $0x648] sm:$0xff]  }
  0x96   :  { %8328 = vmatprep.subr.bf16.mxu1 %v9185_v58  ;;  %v9235_v58 = vld [vmem:[%s11881_s1 + $0x688] sm:$0xff]  }
  0x97   :  { %8307 = vmatpush3.bf16.msra.mxu0 %v9184_v57  ;;  %v9234_v57 = vld [vmem:[%s11881_s1 + $0x6c8] sm:$0xff]  }
  0x98   :  { %8308 = vmatprep.subr.bf16.mxu0 %v9187_v60  ;;  %v9237_v60 = vld [vmem:[%s11881_s1 + $0x610] sm:$0xff]  }
  0x99   :  { %8329 = vmatpush3.bf16.msra.mxu1 %v9186_v59  ;;  %v9236_v59 = vld [vmem:[%s11881_s1 + $0x650] sm:$0xff]  }
  0x9a   :  { %8330 = vmatprep.subr.bf16.mxu1 %v9189_v1  ;;  %v9242_v1 = vld [vmem:[%s11881_s1 + $0x6d8] sm:$0xff]  }
  0x9b   :  { %8309 = vmatpush3.bf16.msra.mxu0 %v9188_v62  ;;  %v9239_v62 = vld [vmem:[%s11881_s1 + $0x690] sm:$0xff]  }
  0x9c   :  { %8310 = vmatprep.subr.bf16.mxu0 %v9191_v5  ;;  %v9246_v5 = vld [vmem:[%s11881_s1 + $0x6e0] sm:$0xff]  }
  0x9d   :  { %8331 = vmatpush3.bf16.msra.mxu1 %v9190_v2  ;;  %v9243_v2 = vld [vmem:[%s11881_s1 + $0x698] sm:$0xff]  }
  0x9e   :  { %8332 = vmatprep.subr.bf16.mxu1 %v9193_v9  ;;  %v9250_v9 = vld [vmem:[%s11881_s1 + $0x6e8] sm:$0xff]  }
  0x9f   :  { %8311 = vmatpush3.bf16.msra.mxu0 %v9192_v6  ;;  %v9247_v6 = vld [vmem:[%s11881_s1 + $0x6a0] sm:$0xff]  }
  0xa0   :  { %8340 = vmatprep.subr.bf16.mxu0 %v9195_v13  ;;  %v9254_v13 = vld [vmem:[%s11881_s1 + $0x6f0] sm:$0xff]  }
  0xa1   :  { %8333 = vmatpush3.bf16.msra.mxu1 %v9194_v10  ;;  %v9251_v10 = vld [vmem:[%s11881_s1 + $0x6a8] sm:$0xff]  }
  0xa2   :  { %6167 = vmatmul.mubr.bf16.vlgmr.msra.gmra.mrb[16].mxu0 %v1462_v12  ;;  %8362 = vmatprep.subr.bf16.mxu1 %v9197_v16  ;;  %v19_v12 = vld [vmem:[%s11880_s0 + $0x18] sm:$0xff]  ;;  %v9253_v16 = vld [vmem:[%s11881_s1 + $0x630] sm:$0xff]  }
  0xa3   :  { %8341 = vmatpush3.bf16.msra.mxu0 %v9196_v14  ;;  %6246 = vmatprep.mubr.bf16.mxu0 %v1483_v15  ;;  %v1495_v14 = vrot.slane %v19_v12, %v9844_v41  ;;  %v1488_v15 = vcombine.high %v19_v12, %v19_v12  ;;  %v9292_v12 = vld [vmem:[%s11881_s1 + $0x7b8] sm:$0xff]  }
  0xa4   :  { %6207 = vmatmul.mubr.bf16.vlgmr.msra.gmra.mrb[16].mxu1 %v1484_v18  ;;  %8342 = vmatprep.subr.bf16.mxu0 %v9199_v19 }
  0xa5   :  { %8363 = vmatpush3.bf16.msra.mxu1 %v9198_v17  ;;  %6286 = vmatprep.mubr.bf16.mxu1 %v1487_v21  ;;  %v9256_v17 = vld [vmem:[%s11881_s1 + $0x678] sm:$0xff]   ;;  %v1503_v18 = vcombine.high %v1495_v14, %v1495_v14  ;;  %v10448_v19 = vrot.slane %v1488_v15, %v9844_v41  ;;  %v9294_v15 = vld [vmem:[%s11881_s1 + $0x800] sm:$0xff]  }
  0xa6   :  { %8364 = vmatprep.subr.bf16.mxu1 %v9201_v22  ;;  %v9258_v21 = vld [vmem:[%s11881_s1 + $0x6f8] sm:$0xff]  }
  0xa7   :  { %8343 = vmatpush3.bf16.msra.mxu0 %v9200_v20  ;;  %v9255_v20 = vld [vmem:[%s11881_s1 + $0x6b0] sm:$0xff]   ;;  %v1525_v22 = vrot.slane %v1503_v18, %v9844_v41 }
  0xa8   :  { %8344 = vmatprep.subr.bf16.mxu0 %v9203_v24  ;;  %v9257_v24 = vld [vmem:[%s11881_s1 + $0x638] sm:$0xff]  }
  0xa9   :  { %8365 = vmatpush3.bf16.msra.mxu1 %v9202_v23  ;;  %v1504_v23 = vcombine.high %v10448_v19, %v10448_v19 }
  0xaa   :  { %8366 = vmatprep.subr.bf16.mxu1 %v9205_v26  ;;  %v9260_v26 = vld [vmem:[%s11881_s1 + $0x740] sm:$0xff]  }
  0xab   :  { %8345 = vmatpush3.bf16.msra.mxu0 %v9204_v25  ;;  %v1511_v25 = vrot.slane %v1495_v14, %v9844_v41  ;;  %v9293_v14 = vld [vmem:[%s11881_s1 + $0x840] sm:$0xff]  }
  0xac   :  { %8346 = vmatprep.subr.bf16.mxu0 %v9207_v28  ;;  %v9259_v28 = vld [vmem:[%s11881_s1 + $0x6b8] sm:$0xff]  }
  0xad   :  { %8367 = vmatpush3.bf16.msra.mxu1 %v9206_v27  ;;  %v1535_v27 = vcombine.high %v1525_v22, %v1525_v22 }
  0xae   :  { %8368 = vmatprep.subr.bf16.mxu1 %v9209_v30  ;;  %v9262_v30 = vld [vmem:[%s11881_s1 + $0x7c0] sm:$0xff]  }
  0xaf   :  { %8347 = vmatpush3.bf16.msra.mxu0 %v9208_v29  ;;  %v1532_v29 = vrot.slane %v1504_v23, %v9844_v41  ;;  %v9301_v23 = vld [vmem:[%s11881_s1 + $0x850] sm:$0xff]  }
  0xb0   :  { %8348 = vmatprep.subr.bf16.mxu0 %v9211_v32  ;;  %v1533_v32 = vcombine.high %v1511_v25, %v1511_v25 }
  0xb1   :  { %8369 = vmatpush3.bf16.msra.mxu1 %v9210_v31  ;;  %v9261_v31 = vld [vmem:[%s11881_s1 + $0x700] sm:$0xff]  }
  0xb2   :  { %8370 = vmatprep.subr.bf16.mxu1 %v9213_v34  ;;  %v9263_v34 = vld [vmem:[%s11881_s1 + $0x780] sm:$0xff]  }
  0xb3   :  { %8349 = vmatpush3.bf16.msra.mxu0 %v9212_v33  ;;  %v9264_v33 = vld [vmem:[%s11881_s1 + $0x748] sm:$0xff]  }
  0xb4   :  { %8350 = vmatprep.subr.bf16.mxu0 %v9215_v36  ;;  %v9266_v36 = vld [vmem:[%s11881_s1 + $0x7c8] sm:$0xff]  }
  0xb5   :  { %8371 = vmatpush3.bf16.msra.mxu1 %v9214_v35  ;;  %v1536_v35 = vcombine.high %v1532_v29, %v1532_v29 }
  0xb6   :  { %8372 = vmatprep.subr.bf16.mxu1 %v9217_v38  ;;  %v9268_v38 = vld [vmem:[%s11881_s1 + $0x750] sm:$0xff]  }
  0xb7   :  { %8351 = vmatpush3.bf16.msra.mxu0 %v9216_v37  ;;  %v9265_v37 = vld [vmem:[%s11881_s1 + $0x708] sm:$0xff]  }
  0xb8   :  { %8352 = vmatprep.subr.bf16.mxu0 %v9219_v40  ;;  %v9270_v40 = vld [vmem:[%s11881_s1 + $0x7d0] sm:$0xff]  }
  0xb9   :  { %8373 = vmatpush3.bf16.msra.mxu1 %v9218_v39  ;;  %v9267_v39 = vld [vmem:[%s11881_s1 + $0x788] sm:$0xff]  }
  0xba   :  { %8374 = vmatprep.subr.bf16.mxu1 %v9221_v43  ;;  %v9272_v43 = vld [vmem:[%s11881_s1 + $0x758] sm:$0xff]  }
  0xbb   :  { %8353 = vmatpush3.bf16.msra.mxu0 %v9220_v42  ;;  %v9269_v42 = vld [vmem:[%s11881_s1 + $0x710] sm:$0xff]  }
  0xbc   :  { %8354 = vmatprep.subr.bf16.mxu0 %v9223_v45  ;;  %v9273_v45 = vld [vmem:[%s11881_s1 + $0x718] sm:$0xff]  }
  0xbd   :  { %8375 = vmatpush3.bf16.msra.mxu1 %v9222_v44  ;;  %v9271_v44 = vld [vmem:[%s11881_s1 + $0x790] sm:$0xff]  }
  0xbe   :  { %8376 = vmatprep.subr.bf16.mxu1 %v9225_v47  ;;  %v9275_v47 = vld [vmem:[%s11881_s1 + $0x798] sm:$0xff]  }
  0xbf   :  { %8355 = vmatpush3.bf16.msra.mxu0 %v9224_v46  ;;  %v9274_v46 = vld [vmem:[%s11881_s1 + $0x7d8] sm:$0xff]  }
  0xc0   :  { %8384 = vmatprep.subr.bf16.mxu0 %v9228_v50  ;;  %v9278_v50 = vld [vmem:[%s11881_s1 + $0x7e0] sm:$0xff]  }
  0xc1   :  { %8377 = vmatpush3.bf16.msra.mxu1 %v9227_v48  ;;  %v9276_v48 = vld [vmem:[%s11881_s1 + $0x760] sm:$0xff]  }
  0xc2   :  { %6247 = vmatmul.mubr.bf16.vlgmr.msra.gmra.mrb[20].mxu0 %v1469_v49  ;;  %8406 = vmatprep.subr.bf16.mxu1 %v9230_v52  ;;  %v9277_v49 = vld [vmem:[%s11881_s1 + $0x720] sm:$0xff]   ;;  %v9280_v52 = vld [vmem:[%s11881_s1 + $0x768] sm:$0xff]  }
  0xc3   :  { %8385 = vmatpush3.bf16.msra.mxu0 %v9229_v51  ;;  %6326 = vmatprep.mubr.bf16.mxu0 %v1525_v22  ;;  %v9279_v51 = vld [vmem:[%s11881_s1 + $0x7a0] sm:$0xff]   ;;  %v9300_v22 = vld [vmem:[%s11881_s1 + $0x888] sm:$0xff]  }
  0xc4   :  { %6287 = vmatmul.mubr.bf16.vlgmr.msra.gmra.mrb[20].mxu1 %v1485_v54  ;;  %8386 = vmatprep.subr.bf16.mxu0 %v9232_v55  ;;  %v9282_v54 = vld [vmem:[%s11881_s1 + $0x7e8] sm:$0xff]  }
  0xc5   :  { %8407 = vmatpush3.bf16.msra.mxu1 %v9231_v53  ;;  %6366 = vmatprep.mubr.bf16.mxu1 %v1535_v27  ;;  %v9281_v53 = vld [vmem:[%s11881_s1 + $0x728] sm:$0xff]   ;;  %v9305_v27 = vld [vmem:[%s11881_s1 + $0x858] sm:$0xff]  }
  0xc6   :  { %8408 = vmatprep.subr.bf16.mxu1 %v9234_v57  ;;  %v9283_v55 = vld [vmem:[%s11881_s1 + $0x7a8] sm:$0xff]   ;;  %v9284_v57 = vld [vmem:[%s11881_s1 + $0x770] sm:$0xff]  }
  0xc7   :  { %8387 = vmatpush3.bf16.msra.mxu0 %v9233_v56  ;;  %v7470_v56 = vld [vmem:[%s11882_s2] ss:$0 sm:$0xff] }
  0xc8   :  { %8388 = vmatprep.subr.bf16.mxu0 %v9236_v59  ;;  %v9285_v59 = vld [vmem:[%s11881_s1 + $0x730] sm:$0xff]  }
  0xc9   :  { %8409 = vmatpush3.bf16.msra.mxu1 %v9235_v58 }
  0xca   :  { %8410 = vmatprep.subr.bf16.mxu1 %v9238_v61  ;;  %v9286_v61 = vld [vmem:[%s11881_s1 + $0x7f0] sm:$0xff]  }
  0xcb   :  { %8389 = vmatpush3.bf16.msra.mxu0 %v9237_v60 }
  0xcc   :  { %8390 = vmatprep.subr.bf16.mxu0 %v9240_v63 }
  0xcd   :  { %8411 = vmatpush3.bf16.msra.mxu1 %v9239_v62 }
  0xce   :  { %8412 = vmatprep.subr.bf16.mxu1 %v9242_v1  ;;  %v9287_v1 = vld [vmem:[%s11881_s1 + $0x7b0] sm:$0xff]  }
  0xcf   :  { %8391 = vmatpush3.bf16.msra.mxu0 %v9241_v0 }
  0xd0   :  { %8392 = vmatprep.subr.bf16.mxu0 %v9244_v3 }
  0xd1   :  { %8413 = vmatpush3.bf16.msra.mxu1 %v9243_v2  ;;  %v9288_v2 = vld [vmem:[%s11881_s1 + $0x778] sm:$0xff]  }
  0xd2   :  { %8414 = vmatprep.subr.bf16.mxu1 %v9246_v5 }
  0xd3   :  { %8393 = vmatpush3.bf16.msra.mxu0 %v9245_v4 }
  0xd4   :  { %8394 = vmatprep.subr.bf16.mxu0 %v9248_v7  ;;  %v9289_v7 = vld [vmem:[%s11881_s1 + $0x738] sm:$0xff]  }
  0xd5   :  { %8415 = vmatpush3.bf16.msra.mxu1 %v9247_v6 }
  0xd6   :  { %8416 = vmatprep.subr.bf16.mxu1 %v9250_v9  ;;  %v9290_v9 = vld [vmem:[%s11881_s1 + $0x7f8] sm:$0xff]  }
  0xd7   :  { %8395 = vmatpush3.bf16.msra.mxu0 %v9249_v8 }
  0xd8   :  { %8396 = vmatprep.subr.bf16.mxu0 %v9252_v11 }
  0xd9   :  { %8417 = vmatpush3.bf16.msra.mxu1 %v9251_v10 }
  0xda   :  { %8418 = vmatprep.subr.bf16.mxu1 %v9254_v13  ;;  %v1518_v13 = vrot.slane %v10448_v19, %v9844_v41  ;;  %v9297_v19 = vld [vmem:[%s11881_s1 + $0x848] sm:$0xff]  }
  0xdb   :  { %8397 = vmatpush3.bf16.msra.mxu0 %v9253_v16  ;;  %v9295_v16 = vld [vmem:[%s11881_s1 + $0x8c0] sm:$0xff]  }
  0xdc   :  { %8398 = vmatprep.subr.bf16.mxu0 %v9256_v17  ;;  %v9296_v17 = vld [vmem:[%s11881_s1 + $0x880] sm:$0xff]   ;;  %v1534_v18 = vcombine.high %v1518_v13, %v1518_v13 }
  0xdd   :  { %8419 = vmatpush3.bf16.msra.mxu1 %v9255_v20  ;;  %v9298_v20 = vld [vmem:[%s11881_s1 + $0x808] sm:$0xff]  }
  0xde   :  { %8420 = vmatprep.subr.bf16.mxu1 %v9258_v21  ;;  %v9299_v21 = vld [vmem:[%s11881_s1 + $0x8c8] sm:$0xff]  }
  0xdf   :  { %8399 = vmatpush3.bf16.msra.mxu0 %v9257_v24  ;;  %v9302_v24 = vld [vmem:[%s11881_s1 + $0x810] sm:$0xff]  }
  0xe0   :  { %8428 = vmatprep.subr.bf16.mxu0 %v9260_v26  ;;  %v9304_v26 = vld [vmem:[%s11881_s1 + $0x890] sm:$0xff]  }
  0xe1   :  { %8421 = vmatpush3.bf16.msra.mxu1 %v9259_v28  ;;  %v9306_v28 = vld [vmem:[%s11881_s1 + $0x818] sm:$0xff]  }
  0xe2   :  { %6327 = vmatmul.mubr.bf16.vlgmr.msra.gmra.mrb[24].mxu0 %v1511_v25  ;;  %8450 = vmatprep.subr.bf16.mxu1 %v9262_v30  ;;  %v9303_v25 = vld [vmem:[%s11881_s1 + $0x8d0] sm:$0xff]   ;;  %v9308_v30 = vld [vmem:[%s11881_s1 + $0x898] sm:$0xff]  }
  0xe3   :  { %8429 = vmatpush3.bf16.msra.mxu0 %v9261_v31  ;;  %6406 = vmatprep.mubr.bf16.mxu0 %v1532_v29  ;;  %v9307_v29 = vld [vmem:[%s11881_s1 + $0x8d8] sm:$0xff]   ;;  %v9309_v31 = vld [vmem:[%s11881_s1 + $0x860] sm:$0xff]  }
  0xe4   :  { %6367 = vmatmul.mubr.bf16.vlgmr.msra.gmra.mrb[24].mxu1 %v1533_v32  ;;  %8430 = vmatprep.subr.bf16.mxu0 %v9264_v33  ;;  %v9310_v32 = vld [vmem:[%s11881_s1 + $0x820] sm:$0xff]  }
  0xe5   :  { %8451 = vmatpush3.bf16.msra.mxu1 %v9263_v34  ;;  %6446 = vmatprep.mubr.bf16.mxu1 %v1536_v35  ;;  %v9311_v33 = vld [vmem:[%s11881_s1 + $0x8e0] sm:$0xff]   ;;  %v9313_v35 = vld [vmem:[%s11881_s1 + $0x868] sm:$0xff]  }
  0xe6   :  { %8452 = vmatprep.subr.bf16.mxu1 %v9266_v36  ;;  %v9312_v34 = vld [vmem:[%s11881_s1 + $0x8a0] sm:$0xff]   ;;  %v9314_v36 = vld [vmem:[%s11881_s1 + $0x828] sm:$0xff]  }
  0xe7   :  { %8431 = vmatpush3.bf16.msra.mxu0 %v9265_v37  ;;  %v9315_v37 = vld [vmem:[%s11881_s1 + $0x8e8] sm:$0xff]  }
  0xe8   :  { %8432 = vmatprep.subr.bf16.mxu0 %v9268_v38  ;;  %v9316_v38 = vld [vmem:[%s11881_s1 + $0x8a8] sm:$0xff]  }
  0xe9   :  { %8453 = vmatpush3.bf16.msra.mxu1 %v9267_v39  ;;  %v9317_v39 = vld [vmem:[%s11881_s1 + $0x870] sm:$0xff]  }
  0xea   :  { %8454 = vmatprep.subr.bf16.mxu1 %v9270_v40 }
  0xeb   :  { %8433 = vmatpush3.bf16.msra.mxu0 %v9269_v42  ;;  %v9318_v42 = vld [vmem:[%s11881_s1 + $0x830] sm:$0xff]  }
  0xec   :  { %8434 = vmatprep.subr.bf16.mxu0 %v9272_v43  ;;  %v9319_v43 = vld [vmem:[%s11881_s1 + $0x8f0] sm:$0xff]  }
  0xed   :  { %8455 = vmatpush3.bf16.msra.mxu1 %v9271_v44 }
  0xee   :  { %8456 = vmatprep.subr.bf16.mxu1 %v9274_v46 }
  0xef   :  { %8435 = vmatpush3.bf16.msra.mxu0 %v9273_v45  ;;  %v20_v45 = vld [vmem:[%s11880_s0 + $0x20] sm:$0xff] }
  0xf0   :  { %8436 = vmatprep.subr.bf16.mxu0 %v9276_v48 }
  0xf1   :  { %8457 = vmatpush3.bf16.msra.mxu1 %v9275_v47 }
  0xf2   :  { %8458 = vmatprep.subr.bf16.mxu1 %v9278_v50  ;;  %v9321_v50 = vld [vmem:[%s11881_s1 + $0x878] sm:$0xff]  }
  0xf3   :  { %8437 = vmatpush3.bf16.msra.mxu0 %v9277_v49  ;;  %v9320_v49 = vld [vmem:[%s11881_s1 + $0x8b0] sm:$0xff]  }
  0xf4   :  { %8438 = vmatprep.subr.bf16.mxu0 %v9280_v52  ;;  %v1537_v52 = vcombine.high %v20_v45, %v20_v45 }
  0xf5   :  { %v8136_v58 = vpop.f32.mrb[0].mxu0  ;;  %8459 = vmatpush3.bf16.msra.mxu1 %v9279_v51  ;;  %v1544_v51 = vrot.slane %v20_v45, %v9844_v41 }
  0xf6   :  { %v8137_v60 = vpop.f32.mrb[1].mxu0  ;;  %8460 = vmatprep.subr.bf16.mxu1 %v9282_v54 }
  0xf7   :  { %v8138_v62 = vadd.f32 %v8137_v60, %v8136_v58  ;;  %v8139_v63 = vpop.f32.mrb[2].mxu0  ;;  %v8158_v0 = vpop.f32.mrb[0].mxu1  ;;  %8439 = vmatpush3.bf16.msra.mxu0 %v9281_v53  ;;  %v1552_v58 = vcombine.high %v1544_v51, %v1544_v51  ;;  %v9323_v60 = vld [vmem:[%s11881_s1 + $0x8f8] sm:$0xff]  }
  0xf8   :  { %v8140_v3 = vpop.f32.mrb[3].mxu0  ;;  %v8159_v4 = vpop.f32.mrb[1].mxu1  ;;  %8440 = vmatprep.subr.bf16.mxu0 %v9284_v57  ;;  %v9322_v57 = vld [vmem:[%s11881_s1 + $0x838] sm:$0xff]  }
  0xf9   :  { %v5849_v5 = vadd.f32 %v8138_v62, %v7470_v56  ;;  %v8160_v6 = vadd.f32 %v8159_v4, %v8158_v0  ;;  %8461 = vmatpush3.bf16.msra.mxu1 %v9283_v55  ;;  %v8161_v8 = vpop.f32.mrb[2].mxu1  ;;  %v10669_v62 = vrot.slane %v1537_v52, %v9844_v41  ;;  %v1574_v0 = vrot.slane %v1552_v58, %v9844_v41  ;;  %v9325_v3 = vld [vmem:[%s11881_s1 + $0x940] sm:$0xff]   ;;  %v9357_v52 = vld [vmem:[%s11881_s1 + $0x9b8] sm:$0xff]  }
  0xfa   :  { %8462 = vmatprep.subr.bf16.mxu1 %v9286_v61  ;;  %v8162_v10 = vpop.f32.mrb[3].mxu1 }
  0xfb   :  { %v10563_v11 = vadd.f32 %v8160_v6, %v5849_v5  ;;  %8441 = vmatpush3.bf16.msra.mxu0 %v9285_v59  ;;  %v1553_v4 = vcombine.high %v10669_v62, %v10669_v62  ;;  %v1584_v5 = vcombine.high %v1574_v0, %v1574_v0  ;;  %v9326_v6 = vld [vmem:[%s11881_s1 + $0x900] sm:$0xff]  }
  0xfc   :  { %8442 = vmatprep.subr.bf16.mxu0 %v9288_v2  ;;  %v1560_v2 = vrot.slane %v1544_v51, %v9844_v41 }
  0xfd   :  { %8463 = vmatpush3.bf16.msra.mxu1 %v9287_v1  ;;  %v9324_v1 = vld [vmem:[%s11881_s1 + $0x8b8] sm:$0xff]   ;;  %v1581_v8 = vrot.slane %v1553_v4, %v9844_v41 }
  0xfe   :  { %8464 = vmatprep.subr.bf16.mxu1 %v9290_v9  ;;  %v9328_v9 = vld [vmem:[%s11881_s1 + $0x980] sm:$0xff]   ;;  %v1582_v10 = vcombine.high %v1560_v2, %v1560_v2  ;;  %v9371_v4 = vld [vmem:[%s11881_s1 + $0xa18] sm:$0xff]  }
  0xff   :  { %8443 = vmatpush3.bf16.msra.mxu0 %v9289_v7  ;;  %v9327_v7 = vld [vmem:[%s11881_s1 + $0x9c0] sm:$0xff]  }
 0x100   :  { %8472 = vmatprep.subr.bf16.mxu0 %v9293_v14  ;;  %v9331_v14 = vld [vmem:[%s11881_s1 + $0x9c8] sm:$0xff]  }
 0x101   :  { %8465 = vmatpush3.bf16.msra.mxu1 %v9292_v12  ;;  %v9330_v12 = vld [vmem:[%s11881_s1 + $0x908] sm:$0xff]  }
 0x102   :  { %6407 = vmatmul.mubr.bf16.vlgmr.msra.gmra.mrb[28].mxu0 %v1518_v13  ;;  %8494 = vmatprep.subr.bf16.mxu1 %v9295_v16  ;;  %v1585_v13 = vcombine.high %v1581_v8, %v1581_v8  ;;  %v9333_v16 = vld [vmem:[%s11881_s1 + $0x950] sm:$0xff]  }
 0x103   :  { %8473 = vmatpush3.bf16.msra.mxu0 %v9294_v15  ;;  %6486 = vmatprep.mubr.bf16.mxu0 %v1574_v0  ;;  %v9332_v15 = vld [vmem:[%s11881_s1 + $0x988] sm:$0xff]   ;;  %v9367_v0 = vld [vmem:[%s11881_s1 + $0xa10] sm:$0xff]  }
 0x104   :  { %6447 = vmatmul.mubr.bf16.vlgmr.msra.gmra.mrb[28].mxu1 %v1534_v18  ;;  %8474 = vmatprep.subr.bf16.mxu0 %v9297_v19  ;;  %v9335_v18 = vld [vmem:[%s11881_s1 + $0x9d0] sm:$0xff]  }
 0x105   :  { %8495 = vmatpush3.bf16.msra.mxu1 %v9296_v17  ;;  %6526 = vmatprep.mubr.bf16.mxu1 %v1584_v5  ;;  %v9334_v17 = vld [vmem:[%s11881_s1 + $0x910] sm:$0xff]   ;;  %v9372_v5 = vld [vmem:[%s11881_s1 + $0xad8] sm:$0xff]  }
 0x106   :  { %8496 = vmatprep.subr.bf16.mxu1 %v9299_v21  ;;  %v9336_v19 = vld [vmem:[%s11881_s1 + $0x990] sm:$0xff]   ;;  %v9338_v21 = vld [vmem:[%s11881_s1 + $0x918] sm:$0xff]  }
 0x107   :  { %8475 = vmatpush3.bf16.msra.mxu0 %v9298_v20  ;;  %v9337_v20 = vld [vmem:[%s11881_s1 + $0x958] sm:$0xff]  }
 0x108   :  { %8476 = vmatprep.subr.bf16.mxu0 %v9301_v23  ;;  %v9340_v23 = vld [vmem:[%s11881_s1 + $0x998] sm:$0xff]  }
 0x109   :  { %8497 = vmatpush3.bf16.msra.mxu1 %v9300_v22  ;;  %v9339_v22 = vld [vmem:[%s11881_s1 + $0x9d8] sm:$0xff]  }
 0x10a   :  { %8498 = vmatprep.subr.bf16.mxu1 %v9303_v25  ;;  %v9342_v25 = vld [vmem:[%s11881_s1 + $0x920] sm:$0xff]  }
 0x10b   :  { %8477 = vmatpush3.bf16.msra.mxu0 %v9302_v24  ;;  %v9341_v24 = vld [vmem:[%s11881_s1 + $0x960] sm:$0xff]  }
 0x10c   :  { %8478 = vmatprep.subr.bf16.mxu0 %v9305_v27  ;;  %v9344_v27 = vld [vmem:[%s11881_s1 + $0x9a0] sm:$0xff]  }
 0x10d   :  { %8499 = vmatpush3.bf16.msra.mxu1 %v9304_v26  ;;  %v9343_v26 = vld [vmem:[%s11881_s1 + $0x9e0] sm:$0xff]  }
 0x10e   :  { %8500 = vmatprep.subr.bf16.mxu1 %v9307_v29  ;;  %v9346_v29 = vld [vmem:[%s11881_s1 + $0x928] sm:$0xff]  }
 0x10f   :  { %8479 = vmatpush3.bf16.msra.mxu0 %v9306_v28  ;;  %v9345_v28 = vld [vmem:[%s11881_s1 + $0x968] sm:$0xff]  }
 0x110   :  { %8480 = vmatprep.subr.bf16.mxu0 %v9309_v31  ;;  %v9348_v31 = vld [vmem:[%s11881_s1 + $0x9a8] sm:$0xff]  }
 0x111   :  { %8501 = vmatpush3.bf16.msra.mxu1 %v9308_v30  ;;  %v9347_v30 = vld [vmem:[%s11881_s1 + $0x9e8] sm:$0xff]  }
 0x112   :  { %8502 = vmatprep.subr.bf16.mxu1 %v9311_v33 }
 0x113   :  { %8481 = vmatpush3.bf16.msra.mxu0 %v9310_v32  ;;  %v9349_v32 = vld [vmem:[%s11881_s1 + $0x970] sm:$0xff]  }
 0x114   :  { %8482 = vmatprep.subr.bf16.mxu0 %v9313_v35 }
 0x115   :  { %v8180_v40 = vpop.f32.mrb[4].mxu0  ;;  %8503 = vmatpush3.bf16.msra.mxu1 %v9312_v34  ;;  %v9350_v34 = vld [vmem:[%s11881_s1 + $0x930] sm:$0xff]  }
 0x116   :  { %v8181_v44 = vpop.f32.mrb[5].mxu0  ;;  %8504 = vmatprep.subr.bf16.mxu1 %v9315_v37 }
 0x117   :  { %v8182_v46 = vadd.f32 %v8181_v44, %v8180_v40  ;;  %v8183_v47 = vpop.f32.mrb[6].mxu0  ;;  %v8202_v48 = vpop.f32.mrb[4].mxu1  ;;  %8483 = vmatpush3.bf16.msra.mxu0 %v9314_v36  ;;  %v9351_v36 = vld [vmem:[%s11881_s1 + $0x9f0] sm:$0xff]  }
 0x118   :  { %v8184_v53 = vpop.f32.mrb[7].mxu0  ;;  %v8203_v54 = vpop.f32.mrb[5].mxu1  ;;  %8484 = vmatprep.subr.bf16.mxu0 %v9317_v39  ;;  %v9352_v40 = vld [vmem:[%s11881_s1 + $0x9b0] sm:$0xff]   ;;  %v9354_v47 = vld [vmem:[%s11881_s1 + $0x938] sm:$0xff]  }
 0x119   :  { %v5929_v55 = vadd.f32 %v8182_v46, %v10563_v11  ;;  %v8204_v56 = vadd.f32 %v8203_v54, %v8202_v48  ;;  %8505 = vmatpush3.bf16.msra.mxu1 %v9316_v38  ;;  %v8205_v59 = vpop.f32.mrb[6].mxu1  ;;  %v9329_v11 = vld [vmem:[%s11881_s1 + $0x948] sm:$0xff]   ;;  %v1567_v53 = vrot.slane %v10669_v62, %v9844_v41  ;;  %v9358_v54 = vld [vmem:[%s11881_s1 + $0xa40] sm:$0xff]  }
 0x11a   :  { %8506 = vmatprep.subr.bf16.mxu1 %v9319_v43  ;;  %v8206_v61 = vpop.f32.mrb[7].mxu1  ;;  %v9362_v59 = vld [vmem:[%s11881_s1 + $0xa48] sm:$0xff]  }
 0x11b   :  { %v10671_v63 = vadd.f32 %v8204_v56, %v5929_v55  ;;  %8485 = vmatpush3.bf16.msra.mxu0 %v9318_v42  ;;  %v9353_v42 = vld [vmem:[%s11881_s1 + $0x978] sm:$0xff]   ;;  %v9359_v55 = vld [vmem:[%s11881_s1 + $0xa00] sm:$0xff]   ;;  %v1583_v58 = vcombine.high %v1567_v53, %v1567_v53  ;;  %v9364_v61 = vld [vmem:[%s11881_s1 + $0xac8] sm:$0xff]  }
 0x11c   :  { %8486 = vmatprep.subr.bf16.mxu0 %v9321_v50  ;;  %v9360_v56 = vld [vmem:[%s11881_s1 + $0xac0] sm:$0xff]   ;;  %v9365_v62 = vld [vmem:[%s11881_s1 + $0xa88] sm:$0xff]  }
 0x11d   :  { %8507 = vmatpush3.bf16.msra.mxu1 %v9320_v49  ;;  %v9355_v49 = vld [vmem:[%s11881_s1 + $0x9f8] sm:$0xff]  }
 0x11e   :  { %8508 = vmatprep.subr.bf16.mxu1 %v9323_v60  ;;  %v9363_v60 = vld [vmem:[%s11881_s1 + $0xa08] sm:$0xff]  }
 0x11f   :  { %8487 = vmatpush3.bf16.msra.mxu0 %v9322_v57  ;;  %v9361_v57 = vld [vmem:[%s11881_s1 + $0xa80] sm:$0xff]  }
 0x120   :  { %8516 = vmatprep.subr.bf16.mxu0 %v9325_v3  ;;  %v9370_v3 = vld [vmem:[%s11881_s1 + $0xa58] sm:$0xff]  }
 0x121   :  { %8509 = vmatpush3.bf16.msra.mxu1 %v9324_v1  ;;  %v9368_v1 = vld [vmem:[%s11881_s1 + $0xad0] sm:$0xff]  }
 0x122   :  { %6487 = vmatmul.mubr.bf16.vlgmr.msra.gmra.mrb[32].mxu0 %v1560_v2  ;;  %8538 = vmatprep.subr.bf16.mxu1 %v9327_v7  ;;  %v9369_v2 = vld [vmem:[%s11881_s1 + $0xa90] sm:$0xff]   ;;  %v9374_v7 = vld [vmem:[%s11881_s1 + $0xa60] sm:$0xff]  }
 0x123   :  { %8517 = vmatpush3.bf16.msra.mxu0 %v9326_v6  ;;  %6566 = vmatprep.mubr.bf16.mxu0 %v1581_v8  ;;  %v9373_v6 = vld [vmem:[%s11881_s1 + $0xa98] sm:$0xff]   ;;  %v9375_v8 = vld [vmem:[%s11881_s1 + $0xa20] sm:$0xff]  }
 0x124   :  { %6527 = vmatmul.mubr.bf16.vlgmr.msra.gmra.mrb[32].mxu1 %v1582_v10  ;;  %8518 = vmatprep.subr.bf16.mxu0 %v9329_v11  ;;  %v9377_v10 = vld [vmem:[%s11881_s1 + $0xaa0] sm:$0xff]   ;;  %v9378_v11 = vld [vmem:[%s11881_s1 + $0xa68] sm:$0xff]  }
 0x125   :  { %8539 = vmatpush3.bf16.msra.mxu1 %v9328_v9  ;;  %6606 = vmatprep.mubr.bf16.mxu1 %v1585_v13  ;;  %v9376_v9 = vld [vmem:[%s11881_s1 + $0xae0] sm:$0xff]   ;;  %v9380_v13 = vld [vmem:[%s11881_s1 + $0xae8] sm:$0xff]  }
 0x126   :  { %8540 = vmatprep.subr.bf16.mxu1 %v9331_v14  ;;  %v9381_v14 = vld [vmem:[%s11881_s1 + $0xaa8] sm:$0xff]  }
 0x127   :  { %8519 = vmatpush3.bf16.msra.mxu0 %v9330_v12  ;;  %v9379_v12 = vld [vmem:[%s11881_s1 + $0xa28] sm:$0xff]  }
 0x128   :  { %8520 = vmatprep.subr.bf16.mxu0 %v9333_v16 }
 0x129   :  { %8541 = vmatpush3.bf16.msra.mxu1 %v9332_v15  ;;  %v9382_v15 = vld [vmem:[%s11881_s1 + $0xa70] sm:$0xff]  }
 0x12a   :  { %8542 = vmatprep.subr.bf16.mxu1 %v9335_v18 }
 0x12b   :  { %8521 = vmatpush3.bf16.msra.mxu0 %v9334_v17  ;;  %v9383_v17 = vld [vmem:[%s11881_s1 + $0xa30] sm:$0xff]  }
 0x12c   :  { %8522 = vmatprep.subr.bf16.mxu0 %v9337_v20 }
 0x12d   :  { %8543 = vmatpush3.bf16.msra.mxu1 %v9336_v19  ;;  %v9384_v19 = vld [vmem:[%s11881_s1 + $0xaf0] sm:$0xff]  }
 0x12e   :  { %8544 = vmatprep.subr.bf16.mxu1 %v9339_v22 }
 0x12f   :  { %8523 = vmatpush3.bf16.msra.mxu0 %v9338_v21 }
 0x130   :  { %8524 = vmatprep.subr.bf16.mxu0 %v9341_v24  ;;  %v9386_v24 = vld [vmem:[%s11881_s1 + $0xa78] sm:$0xff]  }
 0x131   :  { %8545 = vmatpush3.bf16.msra.mxu1 %v9340_v23  ;;  %v9385_v23 = vld [vmem:[%s11881_s1 + $0xab0] sm:$0xff]  }
 0x132   :  { %8546 = vmatprep.subr.bf16.mxu1 %v9343_v26 }
 0x133   :  { %8525 = vmatpush3.bf16.msra.mxu0 %v9342_v25  ;;  %v21_v25 = vld [vmem:[%s11880_s0 + $0x28] sm:$0xff] }
 0x134   :  { %8526 = vmatprep.subr.bf16.mxu0 %v9345_v28  ;;  %v1593_v28 = vrot.slane %v21_v25, %v9844_v41 }
 0x135   :  { %v8224_v33 = vpop.f32.mrb[8].mxu0  ;;  %8547 = vmatpush3.bf16.msra.mxu1 %v9344_v27 }
 0x136   :  { %v8225_v35 = vpop.f32.mrb[9].mxu0  ;;  %8548 = vmatprep.subr.bf16.mxu1 %v9347_v30 }
 0x137   :  { %v8226_v37 = vadd.f32 %v8225_v35, %v8224_v33  ;;  %v8227_v38 = vpop.f32.mrb[10].mxu0  ;;  %v8246_v39 = vpop.f32.mrb[8].mxu1  ;;  %8527 = vmatpush3.bf16.msra.mxu0 %v9346_v29  ;;  %v1586_v29 = vcombine.high %v21_v25, %v21_v25  ;;  %v1601_v35 = vcombine.high %v1593_v28, %v1593_v28 }
 0x138   :  { %v8228_v43 = vpop.f32.mrb[11].mxu0  ;;  %v8247_v44 = vpop.f32.mrb[9].mxu1  ;;  %8528 = vmatprep.subr.bf16.mxu0 %v9349_v32  ;;  %v9387_v32 = vld [vmem:[%s11881_s1 + $0xa38] sm:$0xff]  }
 0x139   :  { %v6009_v45 = vadd.f32 %v8226_v37, %v10671_v63  ;;  %v8248_v46 = vadd.f32 %v8247_v44, %v8246_v39  ;;  %8549 = vmatpush3.bf16.msra.mxu1 %v9348_v31  ;;  %v8249_v48 = vpop.f32.mrb[10].mxu1  ;;  %v9366_v63 = vld [vmem:[%s11881_s1 + $0xa50] sm:$0xff]   ;;  %v10881_v37 = vrot.slane %v1586_v29, %v9844_v41  ;;  %v9389_v39 = vld [vmem:[%s11881_s1 + $0xab8] sm:$0xff]   ;;  %v9390_v43 = vld [vmem:[%s11881_s1 + $0xb40] sm:$0xff]  }
 0x13a   :  { %8550 = vmatprep.subr.bf16.mxu1 %v9351_v36  ;;  %v8250_v50 = vpop.f32.mrb[11].mxu1  ;;  %v9423_v29 = vld [vmem:[%s11881_s1 + $0xc40] sm:$0xff]  }
 0x13b   :  { %v10775_v51 = vadd.f32 %v8248_v46, %v6009_v45  ;;  %8529 = vmatpush3.bf16.msra.mxu0 %v9350_v34  ;;  %v9388_v34 = vld [vmem:[%s11881_s1 + $0xaf8] sm:$0xff]   ;;  %v1602_v44 = vcombine.high %v10881_v37, %v10881_v37  ;;  %v9391_v45 = vld [vmem:[%s11881_s1 + $0xb00] sm:$0xff]  }
 0x13c   :  { %8530 = vmatprep.subr.bf16.mxu0 %v9353_v42  ;;  %v1609_v42 = vrot.slane %v1593_v28, %v9844_v41  ;;  %v1616_v28 = vrot.slane %v10881_v37, %v9844_v41  ;;  %v9430_v37 = vld [vmem:[%s11881_s1 + $0xc88] sm:$0xff]  }
 0x13d   :  { %8551 = vmatpush3.bf16.msra.mxu1 %v9352_v40  ;;  %v1623_v40 = vrot.slane %v1601_v35, %v9844_v41  ;;  %v1630_v48 = vrot.slane %v1602_v44, %v9844_v41  ;;  %v9428_v35 = vld [vmem:[%s11881_s1 + $0xc08] sm:$0xff]   ;;  %v9436_v44 = vld [vmem:[%s11881_s1 + $0xc18] sm:$0xff]  }
 0x13e   :  { %8552 = vmatprep.subr.bf16.mxu1 %v9355_v49  ;;  %v9393_v49 = vld [vmem:[%s11881_s1 + $0xb80] sm:$0xff]   ;;  %v1631_v50 = vcombine.high %v1609_v42, %v1609_v42 }
 0x13f   :  { %8531 = vmatpush3.bf16.msra.mxu0 %v9354_v47  ;;  %v1633_v46 = vcombine.high %v1623_v40, %v1623_v40  ;;  %v9392_v47 = vld [vmem:[%s11881_s1 + $0xbc0] sm:$0xff]  }
 0x140   :  { %8560 = vmatprep.subr.bf16.mxu0 %v9358_v54  ;;  %v9396_v54 = vld [vmem:[%s11881_s1 + $0xbc8] sm:$0xff]  }
 0x141   :  { %8553 = vmatpush3.bf16.msra.mxu1 %v9357_v52  ;;  %v9395_v52 = vld [vmem:[%s11881_s1 + $0xb08] sm:$0xff]  }
 0x142   :  { %6567 = vmatmul.mubr.bf16.vlgmr.msra.gmra.mrb[36].mxu0 %v1567_v53  ;;  %8582 = vmatprep.subr.bf16.mxu1 %v9360_v56  ;;  %v1634_v53 = vcombine.high %v1630_v48, %v1630_v48  ;;  %v9398_v56 = vld [vmem:[%s11881_s1 + $0xb50] sm:$0xff]  }
 0x143   :  { %8561 = vmatpush3.bf16.msra.mxu0 %v9359_v55  ;;  %6646 = vmatprep.mubr.bf16.mxu0 %v1623_v40  ;;  %v9397_v55 = vld [vmem:[%s11881_s1 + $0xb88] sm:$0xff]   ;;  %v9433_v40 = vld [vmem:[%s11881_s1 + $0xcd0] sm:$0xff]  }
 0x144   :  { %6607 = vmatmul.mubr.bf16.vlgmr.msra.gmra.mrb[36].mxu1 %v1583_v58  ;;  %8562 = vmatprep.subr.bf16.mxu0 %v9362_v59  ;;  %v9400_v58 = vld [vmem:[%s11881_s1 + $0xbd0] sm:$0xff]  }
 0x145   :  { %8583 = vmatpush3.bf16.msra.mxu1 %v9361_v57  ;;  %6686 = vmatprep.mubr.bf16.mxu1 %v1633_v46  ;;  %v9399_v57 = vld [vmem:[%s11881_s1 + $0xb10] sm:$0xff]   ;;  %v9438_v46 = vld [vmem:[%s11881_s1 + $0xc98] sm:$0xff]  }
 0x146   :  { %8584 = vmatprep.subr.bf16.mxu1 %v9364_v61  ;;  %v9401_v59 = vld [vmem:[%s11881_s1 + $0xb90] sm:$0xff]   ;;  %v9403_v61 = vld [vmem:[%s11881_s1 + $0xb18] sm:$0xff]  }
 0x147   :  { %8563 = vmatpush3.bf16.msra.mxu0 %v9363_v60  ;;  %v9402_v60 = vld [vmem:[%s11881_s1 + $0xb58] sm:$0xff]  }
 0x148   :  { %8564 = vmatprep.subr.bf16.mxu0 %v9366_v63  ;;  %v9405_v63 = vld [vmem:[%s11881_s1 + $0xb98] sm:$0xff]  }
 0x149   :  { %8585 = vmatpush3.bf16.msra.mxu1 %v9365_v62  ;;  %v9404_v62 = vld [vmem:[%s11881_s1 + $0xbd8] sm:$0xff]  }
 0x14a   :  { %8586 = vmatprep.subr.bf16.mxu1 %v9368_v1  ;;  %v9407_v1 = vld [vmem:[%s11881_s1 + $0xb20] sm:$0xff]  }
 0x14b   :  { %8565 = vmatpush3.bf16.msra.mxu0 %v9367_v0  ;;  %v9406_v0 = vld [vmem:[%s11881_s1 + $0xb60] sm:$0xff]  }
 0x14c   :  { %8566 = vmatprep.subr.bf16.mxu0 %v9370_v3  ;;  %v9409_v3 = vld [vmem:[%s11881_s1 + $0xba0] sm:$0xff]  }
 0x14d   :  { %8587 = vmatpush3.bf16.msra.mxu1 %v9369_v2  ;;  %v9408_v2 = vld [vmem:[%s11881_s1 + $0xbe0] sm:$0xff]  }
 0x14e   :  { %8588 = vmatprep.subr.bf16.mxu1 %v9372_v5  ;;  %v9411_v5 = vld [vmem:[%s11881_s1 + $0xb28] sm:$0xff]  }
 0x14f   :  { %8567 = vmatpush3.bf16.msra.mxu0 %v9371_v4  ;;  %v9410_v4 = vld [vmem:[%s11881_s1 + $0xb68] sm:$0xff]  }
 0x150   :  { %8568 = vmatprep.subr.bf16.mxu0 %v9374_v7  ;;  %v9413_v7 = vld [vmem:[%s11881_s1 + $0xba8] sm:$0xff]  }
 0x151   :  { %8589 = vmatpush3.bf16.msra.mxu1 %v9373_v6  ;;  %v9412_v6 = vld [vmem:[%s11881_s1 + $0xbe8] sm:$0xff]  }
 0x152   :  { %8590 = vmatprep.subr.bf16.mxu1 %v9376_v9 }
 0x153   :  { %8569 = vmatpush3.bf16.msra.mxu0 %v9375_v8  ;;  %v9414_v8 = vld [vmem:[%s11881_s1 + $0xb70] sm:$0xff]  }
 0x154   :  { %8570 = vmatprep.subr.bf16.mxu0 %v9378_v11 }
 0x155   :  { %v8268_v16 = vpop.f32.mrb[12].mxu0  ;;  %8591 = vmatpush3.bf16.msra.mxu1 %v9377_v10  ;;  %v9415_v10 = vld [vmem:[%s11881_s1 + $0xb30] sm:$0xff]  }
 0x156   :  { %v8269_v18 = vpop.f32.mrb[13].mxu0  ;;  %8592 = vmatprep.subr.bf16.mxu1 %v9380_v13 }
 0x157   :  { %v8270_v20 = vadd.f32 %v8269_v18, %v8268_v16  ;;  %v8271_v21 = vpop.f32.mrb[14].mxu0  ;;  %v8290_v22 = vpop.f32.mrb[12].mxu1  ;;  %8571 = vmatpush3.bf16.msra.mxu0 %v9379_v12  ;;  %v9416_v12 = vld [vmem:[%s11881_s1 + $0xbf0] sm:$0xff]  }
 0x158   :  { %v8272_v26 = vpop.f32.mrb[15].mxu0  ;;  %v8291_v27 = vpop.f32.mrb[13].mxu1  ;;  %8572 = vmatprep.subr.bf16.mxu0 %v9382_v15  ;;  %v9417_v16 = vld [vmem:[%s11881_s1 + $0xbb0] sm:$0xff]  }
 0x159   :  { %v6089_v30 = vadd.f32 %v8270_v20, %v10775_v51  ;;  %v8292_v31 = vadd.f32 %v8291_v27, %v8290_v22  ;;  %8593 = vmatpush3.bf16.msra.mxu1 %v9381_v14  ;;  %v8293_v33 = vpop.f32.mrb[14].mxu1  ;;  %v9394_v51 = vld [vmem:[%s11881_s1 + $0xb48] sm:$0xff]   ;;  %v9419_v22 = vld [vmem:[%s11881_s1 + $0xb38] sm:$0xff]  }
 0x15a   :  { %8594 = vmatprep.subr.bf16.mxu1 %v9384_v19  ;;  %v8294_v36 = vpop.f32.mrb[15].mxu1  ;;  %v9422_v27 = vld [vmem:[%s11881_s1 + $0xbb8] sm:$0xff]   ;;  %v1632_v33 = vcombine.high %v1616_v28, %v1616_v28 }
 0x15b   :  { %v10883_v38 = vadd.f32 %v8292_v31, %v6089_v30  ;;  %8573 = vmatpush3.bf16.msra.mxu0 %v9383_v17  ;;  %v9418_v17 = vld [vmem:[%s11881_s1 + $0xb78] sm:$0xff]   ;;  %v9424_v30 = vld [vmem:[%s11881_s1 + $0xc00] sm:$0xff]   ;;  %v9429_v36 = vld [vmem:[%s11881_s1 + $0xcc8] sm:$0xff]  }
 0x15c   :  { %8574 = vmatprep.subr.bf16.mxu0 %v9386_v24  ;;  %v9420_v24 = vld [vmem:[%s11881_s1 + $0xbf8] sm:$0xff]   ;;  %v9425_v31 = vld [vmem:[%s11881_s1 + $0xcc0] sm:$0xff]  }
 0x15d   :  { %8595 = vmatpush3.bf16.msra.mxu1 %v9385_v23 }
 0x15e   :  { %8596 = vmatprep.subr.bf16.mxu1 %v9388_v34  ;;  %v9427_v34 = vld [vmem:[%s11881_s1 + $0xc48] sm:$0xff]  }
 0x15f   :  { %8575 = vmatpush3.bf16.msra.mxu0 %v9387_v32  ;;  %v9426_v32 = vld [vmem:[%s11881_s1 + $0xc80] sm:$0xff]  }
 0x160   :  { %8604 = vmatprep.subr.bf16.mxu0 %v9390_v43  ;;  %v9435_v43 = vld [vmem:[%s11881_s1 + $0xc58] sm:$0xff]  }
 0x161   :  { %8597 = vmatpush3.bf16.msra.mxu1 %v9389_v39  ;;  %v9432_v39 = vld [vmem:[%s11881_s1 + $0xc10] sm:$0xff]  }
 0x162   :  { %6647 = vmatmul.mubr.bf16.vlgmr.msra.gmra.mrb[40].mxu0 %v1609_v42  ;;  %8626 = vmatprep.subr.bf16.mxu1 %v9392_v47  ;;  %v9434_v42 = vld [vmem:[%s11881_s1 + $0xc90] sm:$0xff]   ;;  %v9439_v47 = vld [vmem:[%s11881_s1 + $0xc60] sm:$0xff]  }
 0x163   :  { %8605 = vmatpush3.bf16.msra.mxu0 %v9391_v45  ;;  %6726 = vmatprep.mubr.bf16.mxu0 %v1630_v48  ;;  %v9437_v45 = vld [vmem:[%s11881_s1 + $0xcd8] sm:$0xff]   ;;  %v9440_v48 = vld [vmem:[%s11881_s1 + $0xc20] sm:$0xff]  }
 0x164   :  { %6687 = vmatmul.mubr.bf16.vlgmr.msra.gmra.mrb[40].mxu1 %v1631_v50  ;;  %8606 = vmatprep.subr.bf16.mxu0 %v9394_v51  ;;  %v9442_v50 = vld [vmem:[%s11881_s1 + $0xca0] sm:$0xff]   ;;  %v9443_v51 = vld [vmem:[%s11881_s1 + $0xc68] sm:$0xff]  }
 0x165   :  { %8627 = vmatpush3.bf16.msra.mxu1 %v9393_v49  ;;  %6766 = vmatprep.mubr.bf16.mxu1 %v1634_v53  ;;  %v9441_v49 = vld [vmem:[%s11881_s1 + $0xce0] sm:$0xff]   ;;  %v9445_v53 = vld [vmem:[%s11881_s1 + $0xce8] sm:$0xff]  }
 0x166   :  { %8628 = vmatprep.subr.bf16.mxu1 %v9396_v54  ;;  %v9446_v54 = vld [vmem:[%s11881_s1 + $0xca8] sm:$0xff]  }
 0x167   :  { %8607 = vmatpush3.bf16.msra.mxu0 %v9395_v52  ;;  %v9444_v52 = vld [vmem:[%s11881_s1 + $0xc28] sm:$0xff]  }
 0x168   :  { %8608 = vmatprep.subr.bf16.mxu0 %v9398_v56 }
 0x169   :  { %8629 = vmatpush3.bf16.msra.mxu1 %v9397_v55  ;;  %v9447_v55 = vld [vmem:[%s11881_s1 + $0xc70] sm:$0xff]  }
 0x16a   :  { %8630 = vmatprep.subr.bf16.mxu1 %v9400_v58 }
 0x16b   :  { %8609 = vmatpush3.bf16.msra.mxu0 %v9399_v57  ;;  %v9448_v57 = vld [vmem:[%s11881_s1 + $0xc30] sm:$0xff]  }
 0x16c   :  { %8610 = vmatprep.subr.bf16.mxu0 %v9402_v60 }
 0x16d   :  { %8631 = vmatpush3.bf16.msra.mxu1 %v9401_v59  ;;  %v9449_v59 = vld [vmem:[%s11881_s1 + $0xcf0] sm:$0xff]  }
 0x16e   :  { %8632 = vmatprep.subr.bf16.mxu1 %v9404_v62 }
 0x16f   :  { %8611 = vmatpush3.bf16.msra.mxu0 %v9403_v61 }
 0x170   :  { %8612 = vmatprep.subr.bf16.mxu0 %v9406_v0 }
 0x171   :  { %8633 = vmatpush3.bf16.msra.mxu1 %v9405_v63  ;;  %v9450_v63 = vld [vmem:[%s11881_s1 + $0xcb0] sm:$0xff]  }
 0x172   :  { %8634 = vmatprep.subr.bf16.mxu1 %v9408_v2  ;;  %v9451_v2 = vld [vmem:[%s11881_s1 + $0xc78] sm:$0xff]  }
 0x173   :  { %8613 = vmatpush3.bf16.msra.mxu0 %v9407_v1 }
 0x174   :  { %8614 = vmatprep.subr.bf16.mxu0 %v9410_v4 }
 0x175   :  { %v8312_v9 = vpop.f32.mrb[16].mxu0  ;;  %8635 = vmatpush3.bf16.msra.mxu1 %v9409_v3  ;;  %v22_v3 = vld [vmem:[%s11880_s0 + $0x30] sm:$0xff] }
 0x176   :  { %v8313_v11 = vpop.f32.mrb[17].mxu0  ;;  %8636 = vmatprep.subr.bf16.mxu1 %v9412_v6  ;;  %v9452_v6 = vld [vmem:[%s11881_s1 + $0xc38] sm:$0xff]  }
 0x177   :  { %v8314_v13 = vadd.f32 %v8313_v11, %v8312_v9  ;;  %v8315_v14 = vpop.f32.mrb[18].mxu0  ;;  %v8334_v15 = vpop.f32.mrb[16].mxu1  ;;  %8615 = vmatpush3.bf16.msra.mxu0 %v9411_v5  ;;  %v1635_v9 = vcombine.high %v22_v3, %v22_v3 }
 0x178   :  { %v8316_v18 = vpop.f32.mrb[19].mxu0  ;;  %v8335_v19 = vpop.f32.mrb[17].mxu1  ;;  %8616 = vmatprep.subr.bf16.mxu0 %v9414_v8  ;;  %v9454_v14 = vld [vmem:[%s11881_s1 + $0xcb8] sm:$0xff]  }
 0x179   :  { %v6169_v20 = vadd.f32 %v8314_v13, %v10883_v38  ;;  %v8336_v21 = vadd.f32 %v8335_v19, %v8334_v15  ;;  %8637 = vmatpush3.bf16.msra.mxu1 %v9413_v7  ;;  %v8337_v23 = vpop.f32.mrb[18].mxu1  ;;  %v9431_v38 = vld [vmem:[%s11881_s1 + $0xc50] sm:$0xff]   ;;  %v1642_v7 = vrot.slane %v22_v3, %v9844_v41  ;;  %v11098_v15 = vrot.slane %v1635_v9, %v9844_v41  ;;  %v9456_v19 = vld [vmem:[%s11881_s1 + $0xd00] sm:$0xff]   ;;  %v9487_v3 = vld [vmem:[%s11881_s1 + $0xdb8] sm:$0xff]  }
 0x17a   :  { %8638 = vmatprep.subr.bf16.mxu1 %v9416_v12  ;;  %v8338_v25 = vpop.f32.mrb[19].mxu1  ;;  %v9458_v23 = vld [vmem:[%s11881_s1 + $0xd80] sm:$0xff]  }
 0x17b   :  { %v10987_v26 = vadd.f32 %v8336_v21, %v6169_v20  ;;  %8617 = vmatpush3.bf16.msra.mxu0 %v9415_v10  ;;  %v9453_v10 = vld [vmem:[%s11881_s1 + $0xcf8] sm:$0xff]   ;;  %v1650_v13 = vcombine.high %v1642_v7, %v1642_v7  ;;  %v1651_v20 = vcombine.high %v11098_v15, %v11098_v15  ;;  %v9457_v21 = vld [vmem:[%s11881_s1 + $0xdc0] sm:$0xff]  }
 0x17c   :  { %8618 = vmatprep.subr.bf16.mxu0 %v9418_v17  ;;  %v9455_v17 = vld [vmem:[%s11881_s1 + $0xd40] sm:$0xff]  }
 0x17d   :  { %8639 = vmatpush3.bf16.msra.mxu1 %v9417_v16  ;;  %v1658_v16 = vrot.slane %v1642_v7, %v9844_v41  ;;  %v1672_v18 = vrot.slane %v1650_v13, %v9844_v41  ;;  %v9490_v7 = vld [vmem:[%s11881_s1 + $0xec0] sm:$0xff]   ;;  %v9495_v13 = vld [vmem:[%s11881_s1 + $0xe88] sm:$0xff]  }
 0x17e   :  { %8640 = vmatprep.subr.bf16.mxu1 %v9420_v24  ;;  %v1679_v24 = vrot.slane %v1651_v20, %v9844_v41  ;;  %v9502_v20 = vld [vmem:[%s11881_s1 + $0xed8] sm:$0xff]  }
 0x17f   :  { %8619 = vmatpush3.bf16.msra.mxu0 %v9419_v22  ;;  %v1682_v22 = vcombine.high %v1672_v18, %v1672_v18  ;;  %v1680_v25 = vcombine.high %v1658_v16, %v1658_v16 }
 0x180   :  { %8648 = vmatprep.subr.bf16.mxu0 %v9423_v29  ;;  %v9461_v29 = vld [vmem:[%s11881_s1 + $0xdc8] sm:$0xff]  }
 0x181   :  { %8641 = vmatpush3.bf16.msra.mxu1 %v9422_v27  ;;  %v9460_v27 = vld [vmem:[%s11881_s1 + $0xd08] sm:$0xff]  }
 0x182   :  { %6727 = vmatmul.mubr.bf16.vlgmr.msra.gmra.mrb[44].mxu0 %v1616_v28  ;;  %8670 = vmatprep.subr.bf16.mxu1 %v9425_v31  ;;  %v1683_v28 = vcombine.high %v1679_v24, %v1679_v24  ;;  %v9463_v31 = vld [vmem:[%s11881_s1 + $0xd50] sm:$0xff]  }
 0x183   :  { %8649 = vmatpush3.bf16.msra.mxu0 %v9424_v30  ;;  %6806 = vmatprep.mubr.bf16.mxu0 %v1672_v18  ;;  %v9462_v30 = vld [vmem:[%s11881_s1 + $0xd88] sm:$0xff]   ;;  %v9500_v18 = vld [vmem:[%s11881_s1 + $0xe58] sm:$0xff]  }
 0x184   :  { %6767 = vmatmul.mubr.bf16.vlgmr.msra.gmra.mrb[44].mxu1 %v1632_v33  ;;  %8650 = vmatprep.subr.bf16.mxu0 %v9427_v34  ;;  %v9465_v33 = vld [vmem:[%s11881_s1 + $0xdd0] sm:$0xff]  }
 0x185   :  { %8671 = vmatpush3.bf16.msra.mxu1 %v9426_v32  ;;  %6846 = vmatprep.mubr.bf16.mxu1 %v1682_v22  ;;  %v9464_v32 = vld [vmem:[%s11881_s1 + $0xd10] sm:$0xff]   ;;  %v9504_v22 = vld [vmem:[%s11881_s1 + $0xe60] sm:$0xff]  }
 0x186   :  { %8672 = vmatprep.subr.bf16.mxu1 %v9429_v36  ;;  %v9466_v34 = vld [vmem:[%s11881_s1 + $0xd90] sm:$0xff]   ;;  %v9468_v36 = vld [vmem:[%s11881_s1 + $0xd18] sm:$0xff]  }
 0x187   :  { %8651 = vmatpush3.bf16.msra.mxu0 %v9428_v35  ;;  %v9467_v35 = vld [vmem:[%s11881_s1 + $0xd58] sm:$0xff]  }
 0x188   :  { %8652 = vmatprep.subr.bf16.mxu0 %v9431_v38  ;;  %v9470_v38 = vld [vmem:[%s11881_s1 + $0xd98] sm:$0xff]  }
 0x189   :  { %8673 = vmatpush3.bf16.msra.mxu1 %v9430_v37  ;;  %v9469_v37 = vld [vmem:[%s11881_s1 + $0xdd8] sm:$0xff]  }
 0x18a   :  { %8674 = vmatprep.subr.bf16.mxu1 %v9433_v40  ;;  %v9472_v40 = vld [vmem:[%s11881_s1 + $0xd20] sm:$0xff]  }
 0x18b   :  { %8653 = vmatpush3.bf16.msra.mxu0 %v9432_v39  ;;  %v9471_v39 = vld [vmem:[%s11881_s1 + $0xd60] sm:$0xff]  }
 0x18c   :  { %8654 = vmatprep.subr.bf16.mxu0 %v9435_v43  ;;  %v9474_v43 = vld [vmem:[%s11881_s1 + $0xda0] sm:$0xff]  }
 0x18d   :  { %8675 = vmatpush3.bf16.msra.mxu1 %v9434_v42  ;;  %v9473_v42 = vld [vmem:[%s11881_s1 + $0xde0] sm:$0xff]  }
 0x18e   :  { %8676 = vmatprep.subr.bf16.mxu1 %v9437_v45  ;;  %v9476_v45 = vld [vmem:[%s11881_s1 + $0xd28] sm:$0xff]  }
 0x18f   :  { %8655 = vmatpush3.bf16.msra.mxu0 %v9436_v44  ;;  %v9475_v44 = vld [vmem:[%s11881_s1 + $0xd68] sm:$0xff]  }
 0x190   :  { %8656 = vmatprep.subr.bf16.mxu0 %v9439_v47  ;;  %v9478_v47 = vld [vmem:[%s11881_s1 + $0xda8] sm:$0xff]  }
 0x191   :  { %8677 = vmatpush3.bf16.msra.mxu1 %v9438_v46  ;;  %v9477_v46 = vld [vmem:[%s11881_s1 + $0xde8] sm:$0xff]  }
 0x192   :  { %8678 = vmatprep.subr.bf16.mxu1 %v9441_v49 }
 0x193   :  { %8657 = vmatpush3.bf16.msra.mxu0 %v9440_v48  ;;  %v9479_v48 = vld [vmem:[%s11881_s1 + $0xd70] sm:$0xff]  }
 0x194   :  { %8658 = vmatprep.subr.bf16.mxu0 %v9443_v51 }
 0x195   :  { %v8356_v56 = vpop.f32.mrb[20].mxu0  ;;  %8679 = vmatpush3.bf16.msra.mxu1 %v9442_v50  ;;  %v9480_v50 = vld [vmem:[%s11881_s1 + $0xd30] sm:$0xff]  }
 0x196   :  { %v8357_v58 = vpop.f32.mrb[21].mxu0  ;;  %8680 = vmatprep.subr.bf16.mxu1 %v9445_v53 }
 0x197   :  { %v8358_v60 = vadd.f32 %v8357_v58, %v8356_v56  ;;  %v8359_v61 = vpop.f32.mrb[22].mxu0  ;;  %v8378_v62 = vpop.f32.mrb[20].mxu1  ;;  %8659 = vmatpush3.bf16.msra.mxu0 %v9444_v52  ;;  %v9481_v52 = vld [vmem:[%s11881_s1 + $0xdf0] sm:$0xff]  }
 0x198   :  { %v8360_v0 = vpop.f32.mrb[23].mxu0  ;;  %v8379_v1 = vpop.f32.mrb[21].mxu1  ;;  %8660 = vmatprep.subr.bf16.mxu0 %v9447_v55  ;;  %v9482_v56 = vld [vmem:[%s11881_s1 + $0xdb0] sm:$0xff]  }
 0x199   :  { %v6249_v4 = vadd.f32 %v8358_v60, %v10987_v26  ;;  %v8380_v5 = vadd.f32 %v8379_v1, %v8378_v62  ;;  %8681 = vmatpush3.bf16.msra.mxu1 %v9446_v54  ;;  %v8381_v8 = vpop.f32.mrb[22].mxu1  ;;  %v9459_v26 = vld [vmem:[%s11881_s1 + $0xd48] sm:$0xff]   ;;  %v9484_v62 = vld [vmem:[%s11881_s1 + $0xd38] sm:$0xff]  }
 0x19a   :  { %8682 = vmatprep.subr.bf16.mxu1 %v9449_v59  ;;  %v8382_v11 = vpop.f32.mrb[23].mxu1  ;;  %v9485_v0 = vld [vmem:[%s11881_s1 + $0xdf8] sm:$0xff]   ;;  %v9491_v8 = vld [vmem:[%s11881_s1 + $0xe80] sm:$0xff]  }
 0x19b   :  { %v11092_v12 = vadd.f32 %v8380_v5, %v6249_v4  ;;  %8661 = vmatpush3.bf16.msra.mxu0 %v9448_v57  ;;  %v9483_v57 = vld [vmem:[%s11881_s1 + $0xd78] sm:$0xff]   ;;  %v1665_v4 = vrot.slane %v11098_v15, %v9844_v41  ;;  %v9488_v5 = vld [vmem:[%s11881_s1 + $0xe40] sm:$0xff]   ;;  %v9493_v11 = vld [vmem:[%s11881_s1 + $0xe08] sm:$0xff]  }
 0x19c   :  { %8662 = vmatprep.subr.bf16.mxu0 %v9451_v2  ;;  %v9497_v15 = vld [vmem:[%s11881_s1 + $0xe10] sm:$0xff]  }
 0x19d   :  { %8683 = vmatpush3.bf16.msra.mxu1 %v9450_v63  ;;  %v1681_v9 = vcombine.high %v1665_v4, %v1665_v4 }
 0x19e   :  { %8684 = vmatprep.subr.bf16.mxu1 %v9453_v10  ;;  %v9492_v10 = vld [vmem:[%s11881_s1 + $0xe48] sm:$0xff]  }
 0x19f   :  { %8663 = vmatpush3.bf16.msra.mxu0 %v9452_v6  ;;  %v9489_v6 = vld [vmem:[%s11881_s1 + $0xe00] sm:$0xff]  }
 0x1a0   :  { %8692 = vmatprep.subr.bf16.mxu0 %v9455_v17  ;;  %v9499_v17 = vld [vmem:[%s11881_s1 + $0xe90] sm:$0xff]  }
 0x1a1   :  { %8685 = vmatpush3.bf16.msra.mxu1 %v9454_v14  ;;  %v9496_v14 = vld [vmem:[%s11881_s1 + $0xe50] sm:$0xff]  }
 0x1a2   :  { %6807 = vmatmul.mubr.bf16.vlgmr.msra.gmra.mrb[48].mxu0 %v1658_v16  ;;  %8714 = vmatprep.subr.bf16.mxu1 %v9457_v21  ;;  %v9498_v16 = vld [vmem:[%s11881_s1 + $0xed0] sm:$0xff]   ;;  %v9503_v21 = vld [vmem:[%s11881_s1 + $0xe98] sm:$0xff]  }
 0x1a3   :  { %8693 = vmatpush3.bf16.msra.mxu0 %v9456_v19  ;;  %6886 = vmatprep.mubr.bf16.mxu0 %v1679_v24  ;;  %v9501_v19 = vld [vmem:[%s11881_s1 + $0xe18] sm:$0xff]   ;;  %v9506_v24 = vld [vmem:[%s11881_s1 + $0xee0] sm:$0xff]  }
 0x1a4   :  { %6847 = vmatmul.mubr.bf16.vlgmr.msra.gmra.mrb[48].mxu1 %v1680_v25  ;;  %8694 = vmatprep.subr.bf16.mxu0 %v9459_v26  ;;  %v9507_v25 = vld [vmem:[%s11881_s1 + $0xea0] sm:$0xff]   ;;  %v9508_v26 = vld [vmem:[%s11881_s1 + $0xe68] sm:$0xff]  }
 0x1a5   :  { %8715 = vmatpush3.bf16.msra.mxu1 %v9458_v23  ;;  %6926 = vmatprep.mubr.bf16.mxu1 %v1683_v28  ;;  %v9505_v23 = vld [vmem:[%s11881_s1 + $0xe20] sm:$0xff]   ;;  %v9510_v28 = vld [vmem:[%s11881_s1 + $0xee8] sm:$0xff]  }
 0x1a6   :  { %8716 = vmatprep.subr.bf16.mxu1 %v9461_v29  ;;  %v9511_v29 = vld [vmem:[%s11881_s1 + $0xea8] sm:$0xff]  }
 0x1a7   :  { %8695 = vmatpush3.bf16.msra.mxu0 %v9460_v27  ;;  %v9509_v27 = vld [vmem:[%s11881_s1 + $0xe28] sm:$0xff]  }
 0x1a8   :  { %8696 = vmatprep.subr.bf16.mxu0 %v9463_v31 }
 0x1a9   :  { %8717 = vmatpush3.bf16.msra.mxu1 %v9462_v30  ;;  %v9512_v30 = vld [vmem:[%s11881_s1 + $0xe70] sm:$0xff]  }
 0x1aa   :  { %8718 = vmatprep.subr.bf16.mxu1 %v9465_v33 }
 0x1ab   :  { %8697 = vmatpush3.bf16.msra.mxu0 %v9464_v32  ;;  %v9513_v32 = vld [vmem:[%s11881_s1 + $0xe30] sm:$0xff]  }
 0x1ac   :  { %8698 = vmatprep.subr.bf16.mxu0 %v9467_v35 }
 0x1ad   :  { %8719 = vmatpush3.bf16.msra.mxu1 %v9466_v34  ;;  %v9514_v34 = vld [vmem:[%s11881_s1 + $0xef0] sm:$0xff]  }
 0x1ae   :  { %8720 = vmatprep.subr.bf16.mxu1 %v9469_v37 }
 0x1af   :  { %8699 = vmatpush3.bf16.msra.mxu0 %v9468_v36 }
 0x1b0   :  { %8700 = vmatprep.subr.bf16.mxu0 %v9471_v39 }
 0x1b1   :  { %8721 = vmatpush3.bf16.msra.mxu1 %v9470_v38 }
 0x1b2   :  { %8722 = vmatprep.subr.bf16.mxu1 %v9473_v42  ;;  %v9516_v42 = vld [vmem:[%s11881_s1 + $0xe78] sm:$0xff]  }
 0x1b3   :  { %8701 = vmatpush3.bf16.msra.mxu0 %v9472_v40  ;;  %v9515_v40 = vld [vmem:[%s11881_s1 + $0xeb0] sm:$0xff]  }
 0x1b4   :  { %8702 = vmatprep.subr.bf16.mxu0 %v9475_v44 }
 0x1b5   :  { %v8400_v49 = vpop.f32.mrb[24].mxu0  ;;  %8723 = vmatpush3.bf16.msra.mxu1 %v9474_v43 }
 0x1b6   :  { %v8401_v51 = vpop.f32.mrb[25].mxu0  ;;  %8724 = vmatprep.subr.bf16.mxu1 %v9477_v46  ;;  %v23_v46 = vld [vmem:[%s11880_s0 + $0x38] sm:$0xff] }
 0x1b7   :  { %v8402_v53 = vadd.f32 %v8401_v51, %v8400_v49  ;;  %v8403_v54 = vpop.f32.mrb[26].mxu0  ;;  %v8422_v55 = vpop.f32.mrb[24].mxu1  ;;  %8703 = vmatpush3.bf16.msra.mxu0 %v9476_v45  ;;  %v9517_v45 = vld [vmem:[%s11881_s1 + $0xe38] sm:$0xff]   ;;  %v1691_v49 = vrot.slane %v23_v46, %v9844_v41  ;;  %v1684_v51 = vcombine.high %v23_v46, %v23_v46  ;;  %v9554_v46 = vld [vmem:[%s11881_s1 + $0x1000] sm:$0xff]  }
 0x1b8   :  { %v8404_v58 = vpop.f32.mrb[27].mxu0  ;;  %v8423_v59 = vpop.f32.mrb[25].mxu1  ;;  %8704 = vmatprep.subr.bf16.mxu0 %v9479_v48  ;;  %v9518_v48 = vld [vmem:[%s11881_s1 + $0xef8] sm:$0xff]  }
 0x1b9   :  { %v6329_v60 = vadd.f32 %v8402_v53, %v11092_v12  ;;  %v8424_v61 = vadd.f32 %v8423_v59, %v8422_v55  ;;  %8725 = vmatpush3.bf16.msra.mxu1 %v9478_v47  ;;  %v8425_v63 = vpop.f32.mrb[26].mxu1  ;;  %v9494_v12 = vld [vmem:[%s11881_s1 + $0xec8] sm:$0xff]   ;;  %v9519_v53 = vld [vmem:[%s11881_s1 + $0xeb8] sm:$0xff]   ;;  %v1699_v54 = vcombine.high %v1691_v49, %v1691_v49  ;;  %v1707_v55 = vrot.slane %v1691_v49, %v9844_v41  ;;  %v9521_v58 = vld [vmem:[%s11881_s1 + $0xf00] sm:$0xff]  }
 0x1ba   :  { %8726 = vmatprep.subr.bf16.mxu1 %v9481_v52  ;;  %v8426_v1 = vpop.f32.mrb[27].mxu1 }
 0x1bb   :  { %v11199_v2 = vadd.f32 %v8424_v61, %v6329_v60  ;;  %8705 = vmatpush3.bf16.msra.mxu0 %v9480_v50  ;;  %v1721_v59 = vrot.slane %v1699_v54, %v9844_v41  ;;  %v9522_v60 = vld [vmem:[%s11881_s1 + $0xfc0] sm:$0xff]   ;;  %v9524_v1 = vld [vmem:[%s11881_s1 + $0xf48] sm:$0xff]   ;;  %v9561_v54 = vld [vmem:[%s11881_s1 + $0x1050] sm:$0xff]  }
 0x1bc   :  { %8706 = vmatprep.subr.bf16.mxu0 %v9483_v57  ;;  %v11314_v57 = vrot.slane %v1684_v51, %v9844_v41  ;;  %v9558_v51 = vld [vmem:[%s11881_s1 + $0x1008] sm:$0xff]  }
 0x1bd   :  { %8727 = vmatpush3.bf16.msra.mxu1 %v9482_v56  ;;  %v9520_v56 = vld [vmem:[%s11881_s1 + $0xf40] sm:$0xff]   ;;  %v1731_v63 = vcombine.high %v1721_v59, %v1721_v59 }
 0x1be   :  { %8728 = vmatprep.subr.bf16.mxu1 %v9485_v0  ;;  %v1700_v61 = vcombine.high %v11314_v57, %v11314_v57  ;;  %v1729_v0 = vcombine.high %v1707_v55, %v1707_v55 }
 0x1bf   :  { %8707 = vmatpush3.bf16.msra.mxu0 %v9484_v62  ;;  %v9523_v62 = vld [vmem:[%s11881_s1 + $0xf80] sm:$0xff]  }
 0x1c0   :  { %8736 = vmatprep.subr.bf16.mxu0 %v9488_v5 }
 0x1c1   :  { %8729 = vmatpush3.bf16.msra.mxu1 %v9487_v3  ;;  %v9525_v3 = vld [vmem:[%s11881_s1 + $0xf08] sm:$0xff]  }
 0x1c2   :  { %6887 = vmatmul.mubr.bf16.vlgmr.msra.gmra.mrb[52].mxu0 %v1665_v4  ;;  %8758 = vmatprep.subr.bf16.mxu1 %v9490_v7  ;;  %v9526_v4 = vld [vmem:[%s11881_s1 + $0xfc8] sm:$0xff]   ;;  %v9528_v7 = vld [vmem:[%s11881_s1 + $0xf50] sm:$0xff]  }
 0x1c3   :  { %8737 = vmatpush3.bf16.msra.mxu0 %v9489_v6  ;;  %6966 = vmatprep.mubr.bf16.mxu0 %v1721_v59  ;;  %v9527_v6 = vld [vmem:[%s11881_s1 + $0xf88] sm:$0xff]   ;;  %v9566_v59 = vld [vmem:[%s11881_s1 + $0x1018] sm:$0xff]  }
 0x1c4   :  { %6927 = vmatmul.mubr.bf16.vlgmr.msra.gmra.mrb[52].mxu1 %v1681_v9  ;;  %8738 = vmatprep.subr.bf16.mxu0 %v9492_v10  ;;  %v9530_v9 = vld [vmem:[%s11881_s1 + $0xfd0] sm:$0xff]  }
 0x1c5   :  { %8759 = vmatpush3.bf16.msra.mxu1 %v9491_v8  ;;  %7006 = vmatprep.mubr.bf16.mxu1 %v1731_v63  ;;  %v9529_v8 = vld [vmem:[%s11881_s1 + $0xf10] sm:$0xff]   ;;  %v9570_v63 = vld [vmem:[%s11881_s1 + $0x1020] sm:$0xff]  }
 0x1c6   :  { %8760 = vmatprep.subr.bf16.mxu1 %v9494_v12  ;;  %v9531_v10 = vld [vmem:[%s11881_s1 + $0xf90] sm:$0xff]   ;;  %v9533_v12 = vld [vmem:[%s11881_s1 + $0xf18] sm:$0xff]  }
 0x1c7   :  { %8739 = vmatpush3.bf16.msra.mxu0 %v9493_v11  ;;  %v9532_v11 = vld [vmem:[%s11881_s1 + $0xf58] sm:$0xff]  }
 0x1c8   :  { %8740 = vmatprep.subr.bf16.mxu0 %v9496_v14  ;;  %v9535_v14 = vld [vmem:[%s11881_s1 + $0xf98] sm:$0xff]  }
 0x1c9   :  { %8761 = vmatpush3.bf16.msra.mxu1 %v9495_v13  ;;  %v9534_v13 = vld [vmem:[%s11881_s1 + $0xfd8] sm:$0xff]  }
 0x1ca   :  { %8762 = vmatprep.subr.bf16.mxu1 %v9498_v16  ;;  %v9537_v16 = vld [vmem:[%s11881_s1 + $0xf20] sm:$0xff]  }
 0x1cb   :  { %8741 = vmatpush3.bf16.msra.mxu0 %v9497_v15  ;;  %v9536_v15 = vld [vmem:[%s11881_s1 + $0xf60] sm:$0xff]  }
 0x1cc   :  { %8742 = vmatprep.subr.bf16.mxu0 %v9500_v18  ;;  %v9539_v18 = vld [vmem:[%s11881_s1 + $0xfa0] sm:$0xff]  }
 0x1cd   :  { %8763 = vmatpush3.bf16.msra.mxu1 %v9499_v17  ;;  %v9538_v17 = vld [vmem:[%s11881_s1 + $0xfe0] sm:$0xff]  }
 0x1ce   :  { %8764 = vmatprep.subr.bf16.mxu1 %v9502_v20  ;;  %v9541_v20 = vld [vmem:[%s11881_s1 + $0xf28] sm:$0xff]  }
 0x1cf   :  { %8743 = vmatpush3.bf16.msra.mxu0 %v9501_v19  ;;  %v9540_v19 = vld [vmem:[%s11881_s1 + $0xf68] sm:$0xff]  }
 0x1d0   :  { %8744 = vmatprep.subr.bf16.mxu0 %v9504_v22  ;;  %v9543_v22 = vld [vmem:[%s11881_s1 + $0xfa8] sm:$0xff]  }
 0x1d1   :  { %8765 = vmatpush3.bf16.msra.mxu1 %v9503_v21  ;;  %v9542_v21 = vld [vmem:[%s11881_s1 + $0xfe8] sm:$0xff]  }
 0x1d2   :  { %8766 = vmatprep.subr.bf16.mxu1 %v9506_v24 }
 0x1d3   :  { %8745 = vmatpush3.bf16.msra.mxu0 %v9505_v23  ;;  %v9544_v23 = vld [vmem:[%s11881_s1 + $0xf70] sm:$0xff]  }
 0x1d4   :  { %8746 = vmatprep.subr.bf16.mxu0 %v9508_v26 }
 0x1d5   :  { %v8444_v31 = vpop.f32.mrb[28].mxu0  ;;  %8767 = vmatpush3.bf16.msra.mxu1 %v9507_v25  ;;  %v9545_v25 = vld [vmem:[%s11881_s1 + $0xf30] sm:$0xff]  }
 0x1d6   :  { %v8445_v33 = vpop.f32.mrb[29].mxu0  ;;  %8768 = vmatprep.subr.bf16.mxu1 %v9510_v28 }
 0x1d7   :  { %v8446_v35 = vadd.f32 %v8445_v33, %v8444_v31  ;;  %v8447_v36 = vpop.f32.mrb[30].mxu0  ;;  %v8466_v37 = vpop.f32.mrb[28].mxu1  ;;  %8747 = vmatpush3.bf16.msra.mxu0 %v9509_v27  ;;  %v9546_v27 = vld [vmem:[%s11881_s1 + $0xff0] sm:$0xff]  }
 0x1d8   :  { %v8448_v38 = vpop.f32.mrb[31].mxu0  ;;  %v8467_v39 = vpop.f32.mrb[29].mxu1  ;;  %8748 = vmatprep.subr.bf16.mxu0 %v9512_v30  ;;  %v9547_v31 = vld [vmem:[%s11881_s1 + $0xfb0] sm:$0xff]  }
 0x1d9   :  { %v6409_v43 = vadd.f32 %v8446_v35, %v11199_v2  ;;  %v8468_v44 = vadd.f32 %v8467_v39, %v8466_v37  ;;  %8769 = vmatpush3.bf16.msra.mxu1 %v9511_v29  ;;  %v8469_v47 = vpop.f32.mrb[30].mxu1  ;;  %v1728_v2 = vrot.slane %v1700_v61, %v9844_v41  ;;  %v9549_v37 = vld [vmem:[%s11881_s1 + $0xf38] sm:$0xff]  }
 0x1da   :  { %8770 = vmatprep.subr.bf16.mxu1 %v9514_v34  ;;  %v8470_v50 = vpop.f32.mrb[31].mxu1  ;;  %v9550_v39 = vld [vmem:[%s11881_s1 + $0xff8] sm:$0xff]   ;;  %v9555_v47 = vld [vmem:[%s11881_s1 + $0x10c0] sm:$0xff]  }
 0x1db   :  { %v11304_v52 = vadd.f32 %v8468_v44, %v6409_v43  ;;  %8749 = vmatpush3.bf16.msra.mxu0 %v9513_v32  ;;  %v1732_v5 = vcombine.high %v1728_v2, %v1728_v2  ;;  %v9548_v32 = vld [vmem:[%s11881_s1 + $0xf78] sm:$0xff]   ;;  %v1714_v44 = vrot.slane %v11314_v57, %v9844_v41  ;;  %v9557_v50 = vld [vmem:[%s11881_s1 + $0x1048] sm:$0xff]   ;;  %v9564_v57 = vld [vmem:[%s11881_s1 + $0x1090] sm:$0xff]  }
 0x1dc   :  { %8750 = vmatprep.subr.bf16.mxu0 %v9516_v42  ;;  %v9552_v43 = vld [vmem:[%s11881_s1 + $0xfb8] sm:$0xff]  }
 0x1dd   :  { %8771 = vmatpush3.bf16.msra.mxu1 %v9515_v40  ;;  %v1730_v49 = vcombine.high %v1714_v44, %v1714_v44  ;;  %v9568_v61 = vld [vmem:[%s11881_s1 + $0x1098] sm:$0xff]  }
 0x1de   :  { %8772 = vmatprep.subr.bf16.mxu1 %v9518_v48  ;;  %v9556_v48 = vld [vmem:[%s11881_s1 + $0x1080] sm:$0xff]  }
 0x1df   :  { %8751 = vmatpush3.bf16.msra.mxu0 %v9517_v45  ;;  %v9553_v45 = vld [vmem:[%s11881_s1 + $0x1040] sm:$0xff]  }
 0x1e0   :  { %8780 = vmatprep.subr.bf16.mxu0 %v9520_v56  ;;  %v9563_v56 = vld [vmem:[%s11881_s1 + $0x10d0] sm:$0xff]  }
 0x1e1   :  { %8773 = vmatpush3.bf16.msra.mxu1 %v9519_v53  ;;  %v9560_v53 = vld [vmem:[%s11881_s1 + $0x1088] sm:$0xff]  }
 0x1e2   :  { %6967 = vmatmul.mubr.bf16.vlgmr.msra.gmra.mrb[56].mxu0 %v1707_v55  ;;  %8802 = vmatprep.subr.bf16.mxu1 %v9522_v60  ;;  %v9562_v55 = vld [vmem:[%s11881_s1 + $0x1010] sm:$0xff]   ;;  %v9567_v60 = vld [vmem:[%s11881_s1 + $0x10d8] sm:$0xff]  }
 0x1e3   :  { %8781 = vmatpush3.bf16.msra.mxu0 %v9521_v58  ;;  %7046 = vmatprep.mubr.bf16.mxu0 %v1728_v2  ;;  %v9565_v58 = vld [vmem:[%s11881_s1 + $0x1058] sm:$0xff]   ;;  %v9573_v2 = vld [vmem:[%s11881_s1 + $0x1068] sm:$0xff]  }
 0x1e4   :  { %7007 = vmatmul.mubr.bf16.vlgmr.msra.gmra.mrb[56].mxu1 %v1729_v0  ;;  %8782 = vmatprep.subr.bf16.mxu0 %v9524_v1  ;;  %v9571_v0 = vld [vmem:[%s11881_s1 + $0x10e0] sm:$0xff]  }
 0x1e5   :  { %8803 = vmatpush3.bf16.msra.mxu1 %v9523_v62  ;;  %7086 = vmatprep.mubr.bf16.mxu1 %v1732_v5  ;;  %v9569_v62 = vld [vmem:[%s11881_s1 + $0x1060] sm:$0xff]   ;;  %v9576_v5 = vld [vmem:[%s11881_s1 + $0x10a8] sm:$0xff]  }
 0x1e6   :  { %8804 = vmatprep.subr.bf16.mxu1 %v9526_v4  ;;  %v9572_v1 = vld [vmem:[%s11881_s1 + $0x10a0] sm:$0xff]   ;;  %v9575_v4 = vld [vmem:[%s11881_s1 + $0x10e8] sm:$0xff]  }
 0x1e7   :  { %8783 = vmatpush3.bf16.msra.mxu0 %v9525_v3  ;;  %v9574_v3 = vld [vmem:[%s11881_s1 + $0x1028] sm:$0xff]  }
 0x1e8   :  { %8784 = vmatprep.subr.bf16.mxu0 %v9528_v7 }
 0x1e9   :  { %8805 = vmatpush3.bf16.msra.mxu1 %v9527_v6  ;;  %v9577_v6 = vld [vmem:[%s11881_s1 + $0x1070] sm:$0xff]  }
 0x1ea   :  { %8806 = vmatprep.subr.bf16.mxu1 %v9530_v9 }
 0x1eb   :  { %8785 = vmatpush3.bf16.msra.mxu0 %v9529_v8  ;;  %v9578_v8 = vld [vmem:[%s11881_s1 + $0x1030] sm:$0xff]  }
 0x1ec   :  { %8786 = vmatprep.subr.bf16.mxu0 %v9532_v11 }
 0x1ed   :  { %8807 = vmatpush3.bf16.msra.mxu1 %v9531_v10  ;;  %v9579_v10 = vld [vmem:[%s11881_s1 + $0x10f0] sm:$0xff]  }
 0x1ee   :  { %8808 = vmatprep.subr.bf16.mxu1 %v9534_v13 }
 0x1ef   :  { %8787 = vmatpush3.bf16.msra.mxu0 %v9533_v12 }
 0x1f0   :  { %8788 = vmatprep.subr.bf16.mxu0 %v9536_v15 }
 0x1f1   :  { %8809 = vmatpush3.bf16.msra.mxu1 %v9535_v14 }
 0x1f2   :  { %8810 = vmatprep.subr.bf16.mxu1 %v9538_v17  ;;  %v9581_v17 = vld [vmem:[%s11881_s1 + $0x1078] sm:$0xff]  }
 0x1f3   :  { %8789 = vmatpush3.bf16.msra.mxu0 %v9537_v16  ;;  %v9580_v16 = vld [vmem:[%s11881_s1 + $0x10b0] sm:$0xff]  }
 0x1f4   :  { %8790 = vmatprep.subr.bf16.mxu0 %v9540_v19 }
 0x1f5   :  { %v8488_v24 = vpop.f32.mrb[32].mxu0  ;;  %8811 = vmatpush3.bf16.msra.mxu1 %v9539_v18 }
 0x1f6   :  { %v8489_v26 = vpop.f32.mrb[33].mxu0  ;;  %8812 = vmatprep.subr.bf16.mxu1 %v9542_v21  ;;  %v9583_v21 = vld [vmem:[%s11881_s1 + $0x10f8] sm:$0xff]  }
 0x1f7   :  { %v8490_v28 = vadd.f32 %v8489_v26, %v8488_v24  ;;  %v8491_v29 = vpop.f32.mrb[34].mxu0  ;;  %v8510_v30 = vpop.f32.mrb[32].mxu1  ;;  %8791 = vmatpush3.bf16.msra.mxu0 %v9541_v20  ;;  %v9582_v20 = vld [vmem:[%s11881_s1 + $0x1038] sm:$0xff]  }
 0x1f8   :  { %v8492_v33 = vpop.f32.mrb[35].mxu0  ;;  %v8511_v34 = vpop.f32.mrb[33].mxu1  ;;  %8792 = vmatprep.subr.bf16.mxu0 %v9544_v23  ;;  %v9584_v26 = vld [vmem:[%s11881_s1 + $0x10b8] sm:$0xff]   ;;  %v9585_v29 = vld [vmem:[%s11881_s1 + $0x1140] sm:$0xff]  }
 0x1f9   :  { %v6489_v35 = vadd.f32 %v8490_v28, %v11304_v52  ;;  %v8512_v36 = vadd.f32 %v8511_v34, %v8510_v30  ;;  %8813 = vmatpush3.bf16.msra.mxu1 %v9543_v22  ;;  %v8513_v38 = vpop.f32.mrb[34].mxu1  ;;  %v9559_v52 = vld [vmem:[%s11881_s1 + $0x10c8] sm:$0xff]   ;;  %v24_v22 = vld [vmem:[%s11880_s0 + $0x40] sm:$0xff] }
 0x1fa   :  { %8814 = vmatprep.subr.bf16.mxu1 %v9546_v27  ;;  %v8514_v40 = vpop.f32.mrb[35].mxu1  ;;  %v1733_v28 = vcombine.high %v24_v22, %v24_v22  ;;  %v9587_v34 = vld [vmem:[%s11881_s1 + $0x11c0] sm:$0xff]  }
 0x1fb   :  { %v11411_v42 = vadd.f32 %v8512_v36, %v6489_v35  ;;  %8793 = vmatpush3.bf16.msra.mxu0 %v9545_v25  ;;  %v1740_v25 = vrot.slane %v24_v22, %v9844_v41  ;;  %v9588_v36 = vld [vmem:[%s11881_s1 + $0x1180] sm:$0xff]  }
 0x1fc   :  { %8794 = vmatprep.subr.bf16.mxu0 %v9548_v32  ;;  %v9586_v32 = vld [vmem:[%s11881_s1 + $0x1100] sm:$0xff]   ;;  %v11529_v33 = vrot.slane %v1733_v28, %v9844_v41  ;;  %v9625_v28 = vld [vmem:[%s11881_s1 + $0x1288] sm:$0xff]  }
 0x1fd   :  { %8815 = vmatpush3.bf16.msra.mxu1 %v9547_v31  ;;  %v1748_v30 = vcombine.high %v1740_v25, %v1740_v25  ;;  %v1756_v31 = vrot.slane %v1740_v25, %v9844_v41  ;;  %v9620_v22 = vld [vmem:[%s11881_s1 + $0x12c0] sm:$0xff]   ;;  %v9622_v25 = vld [vmem:[%s11881_s1 + $0x1248] sm:$0xff]  }
 0x1fe   :  { %8816 = vmatprep.subr.bf16.mxu1 %v9550_v39  ;;  %v9589_v39 = vld [vmem:[%s11881_s1 + $0x1148] sm:$0xff]  }
 0x1ff   :  { %8795 = vmatpush3.bf16.msra.mxu0 %v9549_v37  ;;  %v1770_v35 = vrot.slane %v1748_v30, %v9844_v41  ;;  %v1749_v37 = vcombine.high %v11529_v33, %v11529_v33  ;;  %v1778_v38 = vcombine.high %v1756_v31, %v1756_v31  ;;  %v9627_v30 = vld [vmem:[%s11881_s1 + $0x1210] sm:$0xff]  }
 0x200   :  { %8824 = vmatprep.subr.bf16.mxu0 %v9553_v45  ;;  %v9592_v45 = vld [vmem:[%s11881_s1 + $0x1188] sm:$0xff]  }
 0x201   :  { %8817 = vmatpush3.bf16.msra.mxu1 %v9552_v43  ;;  %v1780_v40 = vcombine.high %v1770_v35, %v1770_v35  ;;  %v1777_v43 = vrot.slane %v1749_v37, %v9844_v41  ;;  %v9634_v37 = vld [vmem:[%s11881_s1 + $0x1260] sm:$0xff]  }
 0x202   :  { %7047 = vmatmul.mubr.bf16.vlgmr.msra.gmra.mrb[60].mxu0 %v1714_v44  ;;  %8846 = vmatprep.subr.bf16.mxu1 %v9555_v47  ;;  %v9591_v44 = vld [vmem:[%s11881_s1 + $0x11c8] sm:$0xff]   ;;  %v9593_v47 = vld [vmem:[%s11881_s1 + $0x1150] sm:$0xff]  }
 0x203   :  { %8825 = vmatpush3.bf16.msra.mxu0 %v9554_v46  ;;  %7126 = vmatprep.mubr.bf16.mxu0 %v1770_v35  ;;  %v1781_v46 = vcombine.high %v1777_v43, %v1777_v43  ;;  %v9632_v35 = vld [vmem:[%s11881_s1 + $0x12d8] sm:$0xff]  }
 0x204   :  { %7087 = vmatmul.mubr.bf16.vlgmr.msra.gmra.mrb[60].mxu1 %v1730_v49  ;;  %8826 = vmatprep.subr.bf16.mxu0 %v9557_v50  ;;  %v9595_v49 = vld [vmem:[%s11881_s1 + $0x11d0] sm:$0xff]  }
 0x205   :  { %8847 = vmatpush3.bf16.msra.mxu1 %v9556_v48  ;;  %7166 = vmatprep.mubr.bf16.mxu1 %v1780_v40  ;;  %v9594_v48 = vld [vmem:[%s11881_s1 + $0x1110] sm:$0xff]   ;;  %v9637_v40 = vld [vmem:[%s11881_s1 + $0x12a0] sm:$0xff]  }
 0x206   :  { %8848 = vmatprep.subr.bf16.mxu1 %v9559_v52  ;;  %v9596_v50 = vld [vmem:[%s11881_s1 + $0x1190] sm:$0xff]   ;;  %v9598_v52 = vld [vmem:[%s11881_s1 + $0x1118] sm:$0xff]  }
 0x207   :  { %8827 = vmatpush3.bf16.msra.mxu0 %v9558_v51  ;;  %v9597_v51 = vld [vmem:[%s11881_s1 + $0x1158] sm:$0xff]  }
 0x208   :  { %8828 = vmatprep.subr.bf16.mxu0 %v9561_v54  ;;  %v9600_v54 = vld [vmem:[%s11881_s1 + $0x1198] sm:$0xff]  }
 0x209   :  { %8849 = vmatpush3.bf16.msra.mxu1 %v9560_v53  ;;  %v9599_v53 = vld [vmem:[%s11881_s1 + $0x11d8] sm:$0xff]  }
 0x20a   :  { %8850 = vmatprep.subr.bf16.mxu1 %v9563_v56  ;;  %v9602_v56 = vld [vmem:[%s11881_s1 + $0x1120] sm:$0xff]  }
 0x20b   :  { %8829 = vmatpush3.bf16.msra.mxu0 %v9562_v55  ;;  %v9601_v55 = vld [vmem:[%s11881_s1 + $0x1160] sm:$0xff]  }
 0x20c   :  { %8830 = vmatprep.subr.bf16.mxu0 %v9565_v58  ;;  %v9604_v58 = vld [vmem:[%s11881_s1 + $0x11a0] sm:$0xff]  }
 0x20d   :  { %8851 = vmatpush3.bf16.msra.mxu1 %v9564_v57  ;;  %v9603_v57 = vld [vmem:[%s11881_s1 + $0x11e0] sm:$0xff]  }
 0x20e   :  { %8852 = vmatprep.subr.bf16.mxu1 %v9567_v60  ;;  %v9606_v60 = vld [vmem:[%s11881_s1 + $0x1128] sm:$0xff]  }
 0x20f   :  { %8831 = vmatpush3.bf16.msra.mxu0 %v9566_v59  ;;  %v9605_v59 = vld [vmem:[%s11881_s1 + $0x1168] sm:$0xff]  }
 0x210   :  { %8832 = vmatprep.subr.bf16.mxu0 %v9569_v62  ;;  %v9608_v62 = vld [vmem:[%s11881_s1 + $0x11a8] sm:$0xff]  }
 0x211   :  { %8853 = vmatpush3.bf16.msra.mxu1 %v9568_v61  ;;  %v9607_v61 = vld [vmem:[%s11881_s1 + $0x11e8] sm:$0xff]  }
 0x212   :  { %8854 = vmatprep.subr.bf16.mxu1 %v9571_v0 }
 0x213   :  { %8833 = vmatpush3.bf16.msra.mxu0 %v9570_v63  ;;  %v9609_v63 = vld [vmem:[%s11881_s1 + $0x1170] sm:$0xff]  }
 0x214   :  { %8834 = vmatprep.subr.bf16.mxu0 %v9573_v2 }
 0x215   :  { %v8532_v7 = vpop.f32.mrb[36].mxu0  ;;  %8855 = vmatpush3.bf16.msra.mxu1 %v9572_v1  ;;  %v9610_v1 = vld [vmem:[%s11881_s1 + $0x1130] sm:$0xff]  }
 0x216   :  { %v8533_v9 = vpop.f32.mrb[37].mxu0  ;;  %8856 = vmatprep.subr.bf16.mxu1 %v9575_v4 }
 0x217   :  { %v8534_v11 = vadd.f32 %v8533_v9, %v8532_v7  ;;  %v8535_v12 = vpop.f32.mrb[38].mxu0  ;;  %v8554_v13 = vpop.f32.mrb[36].mxu1  ;;  %8835 = vmatpush3.bf16.msra.mxu0 %v9574_v3  ;;  %v9611_v3 = vld [vmem:[%s11881_s1 + $0x11f0] sm:$0xff]  }
 0x218   :  { %v8536_v14 = vpop.f32.mrb[39].mxu0  ;;  %v8555_v15 = vpop.f32.mrb[37].mxu1  ;;  %8836 = vmatprep.subr.bf16.mxu0 %v9577_v6  ;;  %v9612_v7 = vld [vmem:[%s11881_s1 + $0x11b0] sm:$0xff]  }
 0x219   :  { %v6569_v18 = vadd.f32 %v8534_v11, %v11411_v42  ;;  %v8556_v19 = vadd.f32 %v8555_v15, %v8554_v13  ;;  %8857 = vmatpush3.bf16.msra.mxu1 %v9576_v5  ;;  %v8557_v23 = vpop.f32.mrb[38].mxu1  ;;  %v9590_v42 = vld [vmem:[%s11881_s1 + $0x1108] sm:$0xff]   ;;  %v9614_v13 = vld [vmem:[%s11881_s1 + $0x1138] sm:$0xff]  }
 0x21a   :  { %8858 = vmatprep.subr.bf16.mxu1 %v9579_v10  ;;  %v8558_v27 = vpop.f32.mrb[39].mxu1  ;;  %v9615_v15 = vld [vmem:[%s11881_s1 + $0x11f8] sm:$0xff]   ;;  %v9621_v23 = vld [vmem:[%s11881_s1 + $0x1280] sm:$0xff]  }
 0x21b   :  { %v11515_v24 = vadd.f32 %v8556_v19, %v6569_v18  ;;  %8837 = vmatpush3.bf16.msra.mxu0 %v9578_v8  ;;  %v9613_v8 = vld [vmem:[%s11881_s1 + $0x1178] sm:$0xff]   ;;  %v1763_v19 = vrot.slane %v11529_v33, %v9844_v41  ;;  %v9624_v27 = vld [vmem:[%s11881_s1 + $0x12c8] sm:$0xff]  }
 0x21c   :  { %8838 = vmatprep.subr.bf16.mxu0 %v9581_v17  ;;  %v9617_v18 = vld [vmem:[%s11881_s1 + $0x11b8] sm:$0xff]  }
 0x21d   :  { %8859 = vmatpush3.bf16.msra.mxu1 %v9580_v16  ;;  %v9630_v33 = vld [vmem:[%s11881_s1 + $0x1258] sm:$0xff]  }
 0x21e   :  { %8860 = vmatprep.subr.bf16.mxu1 %v9583_v21  ;;  %v9619_v21 = vld [vmem:[%s11881_s1 + $0x1200] sm:$0xff]  }
 0x21f   :  { %8839 = vmatpush3.bf16.msra.mxu0 %v9582_v20  ;;  %v9618_v20 = vld [vmem:[%s11881_s1 + $0x1240] sm:$0xff]  }
 0x220   :  { %8868 = vmatprep.subr.bf16.mxu0 %v9585_v29  ;;  %v9626_v29 = vld [vmem:[%s11881_s1 + $0x1250] sm:$0xff]  }
 0x221   :  { %8861 = vmatpush3.bf16.msra.mxu1 %v9584_v26  ;;  %v9623_v26 = vld [vmem:[%s11881_s1 + $0x1208] sm:$0xff]  }
 0x222   :  { %7127 = vmatmul.mubr.bf16.vlgmr.msra.gmra.mrb[64].mxu0 %v1756_v31  ;;  %8890 = vmatprep.subr.bf16.mxu1 %v9587_v34  ;;  %v9628_v31 = vld [vmem:[%s11881_s1 + $0x12d0] sm:$0xff]   ;;  %v9631_v34 = vld [vmem:[%s11881_s1 + $0x1218] sm:$0xff]  }
 0x223   :  { %8869 = vmatpush3.bf16.msra.mxu0 %v9586_v32  ;;  %7206 = vmatprep.mubr.bf16.mxu0 %v1777_v43  ;;  %v9629_v32 = vld [vmem:[%s11881_s1 + $0x1290] sm:$0xff]   ;;  %v9639_v43 = vld [vmem:[%s11881_s1 + $0x1228] sm:$0xff]  }
 0x224   :  { %7167 = vmatmul.mubr.bf16.vlgmr.msra.gmra.mrb[64].mxu1 %v1778_v38  ;;  %8870 = vmatprep.subr.bf16.mxu0 %v9589_v39  ;;  %v9635_v38 = vld [vmem:[%s11881_s1 + $0x1220] sm:$0xff]  }
 0x225   :  { %8891 = vmatpush3.bf16.msra.mxu1 %v9588_v36  ;;  %7246 = vmatprep.mubr.bf16.mxu1 %v1781_v46  ;;  %v9633_v36 = vld [vmem:[%s11881_s1 + $0x1298] sm:$0xff]   ;;  %v9636_v39 = vld [vmem:[%s11881_s1 + $0x12e0] sm:$0xff]   ;;  %v9642_v46 = vld [vmem:[%s11881_s1 + $0x1270] sm:$0xff]  }
 0x226   :  { %8892 = vmatprep.subr.bf16.mxu1 %v9591_v44  ;;  %v9640_v44 = vld [vmem:[%s11881_s1 + $0x12e8] sm:$0xff]  }
 0x227   :  { %8871 = vmatpush3.bf16.msra.mxu0 %v9590_v42  ;;  %v9638_v42 = vld [vmem:[%s11881_s1 + $0x1268] sm:$0xff]  }
 0x228   :  { %8872 = vmatprep.subr.bf16.mxu0 %v9593_v47 }
 0x229   :  { %8893 = vmatpush3.bf16.msra.mxu1 %v9592_v45  ;;  %v9641_v45 = vld [vmem:[%s11881_s1 + $0x12a8] sm:$0xff]  }
 0x22a   :  { %8894 = vmatprep.subr.bf16.mxu1 %v9595_v49 }
 0x22b   :  { %8873 = vmatpush3.bf16.msra.mxu0 %v9594_v48  ;;  %v9643_v48 = vld [vmem:[%s11881_s1 + $0x1230] sm:$0xff]  }
 0x22c   :  { %8874 = vmatprep.subr.bf16.mxu0 %v9597_v51 }
 0x22d   :  { %8895 = vmatpush3.bf16.msra.mxu1 %v9596_v50  ;;  %v9644_v50 = vld [vmem:[%s11881_s1 + $0x12f0] sm:$0xff]  }
 0x22e   :  { %8896 = vmatprep.subr.bf16.mxu1 %v9599_v53 }
 0x22f   :  { %8875 = vmatpush3.bf16.msra.mxu0 %v9598_v52 }
 0x230   :  { %8876 = vmatprep.subr.bf16.mxu0 %v9601_v55 }
 0x231   :  { %8897 = vmatpush3.bf16.msra.mxu1 %v9600_v54 }
 0x232   :  { %8898 = vmatprep.subr.bf16.mxu1 %v9603_v57  ;;  %v9646_v57 = vld [vmem:[%s11881_s1 + $0x1278] sm:$0xff]  }
 0x233   :  { %8877 = vmatpush3.bf16.msra.mxu0 %v9602_v56  ;;  %v9645_v56 = vld [vmem:[%s11881_s1 + $0x12b0] sm:$0xff]  }
 0x234   :  { %8878 = vmatprep.subr.bf16.mxu0 %v9605_v59 }
 0x235   :  { %v8576_v0 = vpop.f32.mrb[40].mxu0  ;;  %8899 = vmatpush3.bf16.msra.mxu1 %v9604_v58 }
 0x236   :  { %v8577_v2 = vpop.f32.mrb[41].mxu0  ;;  %8900 = vmatprep.subr.bf16.mxu1 %v9607_v61 }
 0x237   :  { %v8578_v4 = vadd.f32 %v8577_v2, %v8576_v0  ;;  %v8579_v5 = vpop.f32.mrb[42].mxu0  ;;  %v8598_v6 = vpop.f32.mrb[40].mxu1  ;;  %8879 = vmatpush3.bf16.msra.mxu0 %v9606_v60  ;;  %v9647_v60 = vld [vmem:[%s11881_s1 + $0x1238] sm:$0xff]   ;;  %v25_v0 = vld [vmem:[%s11880_s0 + $0x48] sm:$0xff] }
 0x238   :  { %v8580_v9 = vpop.f32.mrb[43].mxu0  ;;  %v8599_v10 = vpop.f32.mrb[41].mxu1  ;;  %8880 = vmatprep.subr.bf16.mxu0 %v9609_v63  ;;  %v9648_v63 = vld [vmem:[%s11881_s1 + $0x12f8] sm:$0xff]   ;;  %v1789_v2 = vrot.slane %v25_v0, %v9844_v41  ;;  %v9650_v5 = vld [vmem:[%s11881_s1 + $0x1340] sm:$0xff]  }
 0x239   :  { %v6649_v11 = vadd.f32 %v8578_v4, %v11515_v24  ;;  %v8600_v12 = vadd.f32 %v8599_v10, %v8598_v6  ;;  %8901 = vmatpush3.bf16.msra.mxu1 %v9608_v62  ;;  %v8601_v14 = vpop.f32.mrb[42].mxu1  ;;  %v1779_v24 = vcombine.high %v1763_v19, %v1763_v19  ;;  %v1782_v4 = vcombine.high %v25_v0, %v25_v0  ;;  %v9652_v9 = vld [vmem:[%s11881_s1 + $0x13c0] sm:$0xff]  }
 0x23a   :  { %8902 = vmatprep.subr.bf16.mxu1 %v9611_v3  ;;  %v8602_v16 = vpop.f32.mrb[43].mxu1  ;;  %v9649_v3 = vld [vmem:[%s11881_s1 + $0x12b8] sm:$0xff]   ;;  %v1797_v6 = vcombine.high %v1789_v2, %v1789_v2  ;;  %v9654_v14 = vld [vmem:[%s11881_s1 + $0x1348] sm:$0xff]  }
 0x23b   :  { %v11623_v17 = vadd.f32 %v8600_v12, %v6649_v11  ;;  %8881 = vmatpush3.bf16.msra.mxu0 %v9610_v1  ;;  %v9651_v11 = vld [vmem:[%s11881_s1 + $0x1300] sm:$0xff]  }
 0x23c   :  { %8882 = vmatprep.subr.bf16.mxu0 %v9613_v8  ;;  %v11738_v8 = vrot.slane %v1782_v4, %v9844_v41  ;;  %v1819_v10 = vrot.slane %v1797_v6, %v9844_v41  ;;  %v9653_v16 = vld [vmem:[%s11881_s1 + $0x1380] sm:$0xff]  }
 0x23d   :  { %8903 = vmatpush3.bf16.msra.mxu1 %v9612_v7  ;;  %v1805_v7 = vrot.slane %v1789_v2, %v9844_v41 }
 0x23e   :  { %8904 = vmatprep.subr.bf16.mxu1 %v9615_v15  ;;  %v1798_v12 = vcombine.high %v11738_v8, %v11738_v8  ;;  %v1829_v15 = vcombine.high %v1819_v10, %v1819_v10 }
 0x23f   :  { %8883 = vmatpush3.bf16.msra.mxu0 %v9614_v13  ;;  %v1827_v13 = vcombine.high %v1805_v7, %v1805_v7 }
 0x240   :  { %8912 = vmatprep.subr.bf16.mxu0 %v9618_v20 }
 0x241   :  { %8905 = vmatpush3.bf16.msra.mxu1 %v9617_v18  ;;  %v9656_v18 = vld [vmem:[%s11881_s1 + $0x13c8] sm:$0xff]  }
 0x242   :  { %7207 = vmatmul.mubr.bf16.vlgmr.msra.gmra.mrb[68].mxu0 %v1763_v19  ;;  %8934 = vmatprep.subr.bf16.mxu1 %v9620_v22  ;;  %v9655_v19 = vld [vmem:[%s11881_s1 + $0x1308] sm:$0xff]  }
 0x243   :  { %8913 = vmatpush3.bf16.msra.mxu0 %v9619_v21  ;;  %7286 = vmatprep.mubr.bf16.mxu0 %v1819_v10  ;;  %v9658_v21 = vld [vmem:[%s11881_s1 + $0x1350] sm:$0xff]   ;;  %v9657_v22 = vld [vmem:[%s11881_s1 + $0x1388] sm:$0xff]  }
 0x244   :  { %7247 = vmatmul.mubr.bf16.vlgmr.msra.gmra.mrb[68].mxu1 %v1779_v24  ;;  %8914 = vmatprep.subr.bf16.mxu0 %v9622_v25  ;;  %v9659_v24 = vld [vmem:[%s11881_s1 + $0x1310] sm:$0xff]   ;;  %v9662_v25 = vld [vmem:[%s11881_s1 + $0x1358] sm:$0xff]  }
 0x245   :  { %8935 = vmatpush3.bf16.msra.mxu1 %v9621_v23  ;;  %7326 = vmatprep.mubr.bf16.mxu1 %v1829_v15  ;;  %v9660_v23 = vld [vmem:[%s11881_s1 + $0x13d0] sm:$0xff]  }
 0x246   :  { %8936 = vmatprep.subr.bf16.mxu1 %v9624_v27  ;;  %v9664_v27 = vld [vmem:[%s11881_s1 + $0x13d8] sm:$0xff]  }
 0x247   :  { %8915 = vmatpush3.bf16.msra.mxu0 %v9623_v26  ;;  %v9661_v26 = vld [vmem:[%s11881_s1 + $0x1390] sm:$0xff]  }
 0x248   :  { %8916 = vmatprep.subr.bf16.mxu0 %v9626_v29  ;;  %v9666_v29 = vld [vmem:[%s11881_s1 + $0x1360] sm:$0xff]  }
 0x249   :  { %8937 = vmatpush3.bf16.msra.mxu1 %v9625_v28  ;;  %v9663_v28 = vld [vmem:[%s11881_s1 + $0x1318] sm:$0xff]  }
 0x24a   :  { %8938 = vmatprep.subr.bf16.mxu1 %v9628_v31  ;;  %v9668_v31 = vld [vmem:[%s11881_s1 + $0x13e0] sm:$0xff]  }
 0x24b   :  { %8917 = vmatpush3.bf16.msra.mxu0 %v9627_v30  ;;  %v9665_v30 = vld [vmem:[%s11881_s1 + $0x1398] sm:$0xff]  }
 0x24c   :  { %8918 = vmatprep.subr.bf16.mxu0 %v9630_v33  ;;  %v9670_v33 = vld [vmem:[%s11881_s1 + $0x1368] sm:$0xff]  }
 0x24d   :  { %8939 = vmatpush3.bf16.msra.mxu1 %v9629_v32  ;;  %v9667_v32 = vld [vmem:[%s11881_s1 + $0x1320] sm:$0xff]  }
 0x24e   :  { %8940 = vmatprep.subr.bf16.mxu1 %v9632_v35  ;;  %v9672_v35 = vld [vmem:[%s11881_s1 + $0x13e8] sm:$0xff]  }
 0x24f   :  { %8919 = vmatpush3.bf16.msra.mxu0 %v9631_v34  ;;  %v9669_v34 = vld [vmem:[%s11881_s1 + $0x13a0] sm:$0xff]  }
 0x250   :  { %8920 = vmatprep.subr.bf16.mxu0 %v9634_v37 }
 0x251   :  { %8941 = vmatpush3.bf16.msra.mxu1 %v9633_v36  ;;  %v9671_v36 = vld [vmem:[%s11881_s1 + $0x1328] sm:$0xff]  }
 0x252   :  { %8942 = vmatprep.subr.bf16.mxu1 %v9636_v39 }
 0x253   :  { %8921 = vmatpush3.bf16.msra.mxu0 %v9635_v38  ;;  %v9674_v38 = vld [vmem:[%s11881_s1 + $0x1370] sm:$0xff]  }
 0x254   :  { %8922 = vmatprep.subr.bf16.mxu0 %v9638_v42 }
 0x255   :  { %v8620_v47 = vpop.f32.mrb[44].mxu0  ;;  %8943 = vmatpush3.bf16.msra.mxu1 %v9637_v40  ;;  %v9673_v40 = vld [vmem:[%s11881_s1 + $0x13a8] sm:$0xff]  }
 0x256   :  { %v8621_v49 = vpop.f32.mrb[45].mxu0  ;;  %8944 = vmatprep.subr.bf16.mxu1 %v9640_v44 }
 0x257   :  { %v8622_v51 = vadd.f32 %v8621_v49, %v8620_v47  ;;  %v8623_v52 = vpop.f32.mrb[46].mxu0  ;;  %v8642_v53 = vpop.f32.mrb[44].mxu1  ;;  %8923 = vmatpush3.bf16.msra.mxu0 %v9639_v43 }
 0x258   :  { %v8624_v54 = vpop.f32.mrb[47].mxu0  ;;  %v8643_v55 = vpop.f32.mrb[45].mxu1  ;;  %8924 = vmatprep.subr.bf16.mxu0 %v9642_v46  ;;  %v9676_v46 = vld [vmem:[%s11881_s1 + $0x13f0] sm:$0xff]  }
 0x259   :  { %v6729_v58 = vadd.f32 %v8622_v51, %v11623_v17  ;;  %v8644_v59 = vadd.f32 %v8643_v55, %v8642_v53  ;;  %8945 = vmatpush3.bf16.msra.mxu1 %v9641_v45  ;;  %v8645_v61 = vpop.f32.mrb[46].mxu1  ;;  %v1826_v17 = vrot.slane %v1798_v12, %v9844_v41  ;;  %v9675_v45 = vld [vmem:[%s11881_s1 + $0x1330] sm:$0xff]   ;;  %v9678_v51 = vld [vmem:[%s11881_s1 + $0x1378] sm:$0xff]  }
 0x25a   :  { %8946 = vmatprep.subr.bf16.mxu1 %v9644_v50  ;;  %v8646_v1 = vpop.f32.mrb[47].mxu1  ;;  %v9677_v53 = vld [vmem:[%s11881_s1 + $0x13b0] sm:$0xff]   ;;  %v9716_v61 = vmov 0.0  }
 0x25b   :  { %v11721_v62 = vadd.f32 %v8644_v59, %v6729_v58  ;;  %8925 = vmatpush3.bf16.msra.mxu0 %v9643_v48  ;;  %v1830_v20 = vcombine.high %v1826_v17, %v1826_v17  ;;  %v1812_v58 = vrot.slane %v11738_v8, %v9844_v41  ;;  %v9682_v59 = vld [vmem:[%s11881_s1 + $0x13b8] sm:$0xff]  }
 0x25c   :  { %8926 = vmatprep.subr.bf16.mxu0 %v9646_v57  ;;  %v9679_v57 = vld [vmem:[%s11881_s1 + $0x1338] sm:$0xff]  }
 0x25d   :  { %8947 = vmatpush3.bf16.msra.mxu1 %v9645_v56  ;;  %v9680_v56 = vld [vmem:[%s11881_s1 + $0x13f8] sm:$0xff]  }
 0x25e   :  { %8948 = vmatprep.subr.bf16.mxu1 %v9648_v63  ;;  %v9684_v63 = vld [vmem:[%s11881_s1 + $0x1408] sm:$0xff]  }
 0x25f   :  { %8927 = vmatpush3.bf16.msra.mxu0 %v9647_v60  ;;  %v9683_v60 = vld [vmem:[%s11881_s1 + $0x1400] sm:$0xff]  }
 0x260   :  { %8956 = vmatprep.subr.bf16.mxu0 %v9650_v5 }
 0x261   :  { %8949 = vmatpush3.bf16.msra.mxu1 %v9649_v3 }
 0x262   :  { %8978 = vmatprep.subr.bf16.mxu1 %v9652_v9  ;;  %7287 = vmatmul.mubr.bf16.vlgmr.msra.gmra.mrb[72].mxu0 %v1805_v7 }
 0x263   :  { %8957 = vmatpush3.bf16.msra.mxu0 %v9651_v11  ;;  %7366 = vmatprep.mubr.bf16.mxu0 %v1826_v17 }
 0x264   :  { %7327 = vmatmul.mubr.bf16.vlgmr.msra.gmra.mrb[72].mxu1 %v1827_v13  ;;  %8958 = vmatprep.subr.bf16.mxu0 %v9654_v14 }
 0x265   :  { %8979 = vmatpush3.bf16.msra.mxu1 %v9653_v16  ;;  %7406 = vmatprep.mubr.bf16.mxu1 %v1830_v20 }
 0x266   :  { %8980 = vmatprep.subr.bf16.mxu1 %v9656_v18 }
 0x267   :  { %8959 = vmatpush3.bf16.msra.mxu0 %v9655_v19 }
 0x268   :  { %8960 = vmatprep.subr.bf16.mxu0 %v9658_v21 }
 0x269   :  { %8981 = vmatpush3.bf16.msra.mxu1 %v9657_v22 }
 0x26a   :  { %8982 = vmatprep.subr.bf16.mxu1 %v9660_v23 }
 0x26b   :  { %8961 = vmatpush3.bf16.msra.mxu0 %v9659_v24 }
 0x26c   :  { %8962 = vmatprep.subr.bf16.mxu0 %v9662_v25 }
 0x26d   :  { %8983 = vmatpush3.bf16.msra.mxu1 %v9661_v26 }
 0x26e   :  { %8984 = vmatprep.subr.bf16.mxu1 %v9664_v27 }
 0x26f   :  { %8963 = vmatpush3.bf16.msra.mxu0 %v9663_v28 }
 0x270   :  { %8964 = vmatprep.subr.bf16.mxu0 %v9666_v29 }
 0x271   :  { %8985 = vmatpush3.bf16.msra.mxu1 %v9665_v30 }
 0x272   :  { %8986 = vmatprep.subr.bf16.mxu1 %v9668_v31 }
 0x273   :  { %8965 = vmatpush3.bf16.msra.mxu0 %v9667_v32 }
 0x274   :  { %8966 = vmatprep.subr.bf16.mxu0 %v9670_v33 }
 0x275   :  { %v8664_v37 = vpop.f32.mrb[48].mxu0  ;;  %8987 = vmatpush3.bf16.msra.mxu1 %v9669_v34 }
 0x276   :  { %v8665_v39 = vpop.f32.mrb[49].mxu0  ;;  %8988 = vmatprep.subr.bf16.mxu1 %v9672_v35 }
 0x277   :  { %v8666_v42 = vadd.f32 %v8665_v39, %v8664_v37  ;;  %v8667_v43 = vpop.f32.mrb[50].mxu0  ;;  %v8686_v44 = vpop.f32.mrb[48].mxu1  ;;  %8967 = vmatpush3.bf16.msra.mxu0 %v9671_v36 }
 0x278   :  { %v8668_v47 = vpop.f32.mrb[51].mxu0  ;;  %v8687_v48 = vpop.f32.mrb[49].mxu1  ;;  %8968 = vmatprep.subr.bf16.mxu0 %v9674_v38 }
 0x279   :  { %v6809_v49 = vadd.f32 %v8666_v42, %v11721_v62  ;;  %v8688_v50 = vadd.f32 %v8687_v48, %v8686_v44  ;;  %v8689_v52 = vpop.f32.mrb[50].mxu1  ;;  %8989 = vmatpush3.bf16.msra.mxu1 %v9673_v40  ;;  %v1828_v62 = vcombine.high %v1812_v58, %v1812_v58 }
 0x27a   :  { %v8690_v54 = vpop.f32.mrb[51].mxu1  ;;  %8990 = vmatprep.subr.bf16.mxu1 %v9676_v46 }
 0x27b   :  { %v6849_v55 = vadd.f32 %v8688_v50, %v6809_v49  ;;  %8969 = vmatpush3.bf16.msra.mxu0 %v9675_v45 }
 0x27c   :  { %8970 = vmatprep.subr.bf16.mxu0 %v9678_v51 }
 0x27d   :  { %8991 = vmatpush3.bf16.msra.mxu1 %v9677_v53 }
 0x27e   :  { %8992 = vmatprep.subr.bf16.mxu1 %v9680_v56 }
 0x27f   :  { %8971 = vmatpush3.bf16.msra.mxu0 %v9679_v57 }
 0x280   :  { %9009 = vmatprep.subr.bf16.mxu0 %v9716_v61 }
 0x281   :  { %8993 = vmatpush3.bf16.msra.mxu1 %v9682_v59 }
 0x282   :  { %7367 = vmatmul.mubr.bf16.vlgmr.msra.gmra.mrb[76].mxu0 %v1812_v58 }
 0x283   :  { %9010 = vmatpush3.bf16.msra.mxu0 %v9683_v60  ;;  %9025 = vmatprep.mubr.msk.bf16.mxu0 %vm9717_vm0, %v9716_v61 }
 0x284   :  { %7407 = vmatmul.mubr.bf16.vlgmr.msra.gmra.mrb[76].mxu1 %v1828_v62  ;;  %9011 = vmatprep.subr.bf16.mxu0 %v9716_v61 }
 0x285   :  { %8 = vsyncpa [#allocation3], 0  ;;  %v9685_v0 = vld [vmem:[%s11881_s1 + $0x1410] sm:$0xff]   ;;  %v9686_v1 = vld [vmem:[%s11881_s1 + $0x1418] sm:$0xff]   ;;  %vm7454_vm1 = vcmask 74752  }
 0x286   :  { %v9687_v2 = vld [vmem:[%s11881_s1 + $0x1420] sm:$0xff]   ;;  %v9688_v3 = vld [vmem:[%s11881_s1 + $0x1428] sm:$0xff]   ;;  %v9689_v11 = vld [vmem:[%s11881_s1 + $0x1430] sm:$0xff]  }
 0x287   :  { %9012 = vmatpush3.bf16.msra.mxu0 %v9684_v63  ;;  %v9690_v17 = vld [vmem:[%s11881_s1 + $0x1438] sm:$0xff]   ;;  %v7471_v18 = vld.sshfl [vmem:[%s11880_s0 + $0x50] sm:$0x1 pattern:$0x75316420]  ;;  %s9718_s0 = smov [#allocation2]  }
 0x288   :  { %9013 = vmatprep.subr.bf16.mxu0 %v9716_v61  ;;  %v1844_v19 = vrot.slane %v7471_v18, %v9844_v41  ;;  %s7462_s1 = sshll.u32 %s9718_s0, 4  ;;  %s7463_s1 = int_to_ptr.vmem [resolvable:$true] %s7462_s1 }
 0x289   :  { %s9691_s7 = scalar_lea.vmem %s7463_s1, 32  ;;  %p9696_p1 = scmp.lt.s32.totalorder %s7463_s1, %s7463_s1 }
 0x28a   :  { %p9692_p0 = scmp.ne.s32.totalorder %s7463_s1, %s9691_s7  ;;  %p9697_p2 = scmp.lt.s32.totalorder %s9691_s7, %s9691_s7 }
 0x28b   :  { %9014 = vmatpush3.bf16.msra.mxu0 %v9685_v0 }
 0x28c   :  { %9015 = vmatprep.subr.bf16.mxu0 %v9716_v61  ;;  %p9698_p3 = por %p9697_p2, %p9696_p1 }
 0x28e   :  { %p9699_p4 = pnand %p9698_p3, %p9692_p0 }
 0x28f   :  { %9016 = vmatpush3.bf16.msra.mxu0 %v9686_v1 }
 0x290   :  { %9017 = vmatprep.subr.bf16.mxu0 %v9716_v61 }
 0x293   :  { %9018 = vmatpush3.bf16.msra.mxu0 %v9687_v2 }
 0x294   :  { %9019 = vmatprep.subr.bf16.mxu0 %v9716_v61 }
 0x295   :  { %v8708_v4 = vpop.f32.mrb[52].mxu0 }
 0x296   :  { %v8709_v5 = vpop.f32.mrb[53].mxu0 }
 0x297   :  { %v8710_v6 = vadd.f32 %v8709_v5, %v8708_v4  ;;  %v8711_v7 = vpop.f32.mrb[54].mxu0  ;;  %v8730_v8 = vpop.f32.mrb[52].mxu1  ;;  %9020 = vmatpush3.bf16.msra.mxu0 %v9688_v3 }
 0x298   :  { %v8712_v9 = vpop.f32.mrb[55].mxu0  ;;  %v8731_v10 = vpop.f32.mrb[53].mxu1  ;;  %9021 = vmatprep.subr.bf16.mxu0 %v9716_v61 }
 0x299   :  { %v6889_v12 = vadd.f32 %v8710_v6, %v6849_v55  ;;  %v8732_v13 = vadd.f32 %v8731_v10, %v8730_v8  ;;  %v8733_v14 = vpop.f32.mrb[54].mxu1 }
 0x29a   :  { %v8734_v15 = vpop.f32.mrb[55].mxu1 }
 0x29b   :  { %v6929_v16 = vadd.f32 %v8732_v13, %v6889_v12  ;;  %9022 = vmatpush3.bf16.msra.mxu0 %v9689_v11 }
 0x29c   :  { %9023 = vmatprep.subr.bf16.mxu0 %v9716_v61 }
 0x29f   :  { %9024 = vmatpush3.bf16.msra.mxu0 %v9690_v17 }
 0x2a2   :  { %9026 = vmatmul.mubr.bf16.vlgmr.msra.gmra.mrb[80].mxu0 %v1844_v19 }
 0x2b5   :  { %v8752_v20 = vpop.f32.mrb[56].mxu0 }
 0x2b6   :  { %v8753_v21 = vpop.f32.mrb[57].mxu0 }
 0x2b7   :  { %v8754_v22 = vadd.f32 %v8753_v21, %v8752_v20  ;;  %v8755_v23 = vpop.f32.mrb[58].mxu0  ;;  %v8774_v24 = vpop.f32.mrb[56].mxu1 }
 0x2b8   :  { %v8756_v25 = vpop.f32.mrb[59].mxu0  ;;  %v8775_v26 = vpop.f32.mrb[57].mxu1 }
 0x2b9   :  { %v6969_v27 = vadd.f32 %v8754_v22, %v6929_v16  ;;  %v8776_v28 = vadd.f32 %v8775_v26, %v8774_v24  ;;  %v8777_v29 = vpop.f32.mrb[58].mxu1 }
 0x2ba   :  { %v8778_v30 = vpop.f32.mrb[59].mxu1 }
 0x2bb   :  { %v7009_v31 = vadd.f32 %v8776_v28, %v6969_v27 }
 0x2d5   :  { %v8796_v32 = vpop.f32.mrb[60].mxu0 }
 0x2d6   :  { %v8797_v33 = vpop.f32.mrb[61].mxu0 }
 0x2d7   :  { %v8798_v34 = vadd.f32 %v8797_v33, %v8796_v32  ;;  %v8799_v35 = vpop.f32.mrb[62].mxu0  ;;  %v8818_v36 = vpop.f32.mrb[60].mxu1 }
 0x2d8   :  { %v8800_v41 = vpop.f32.mrb[63].mxu0  ;;  %v8819_v37 = vpop.f32.mrb[61].mxu1 }
 0x2d9   :  { %v7049_v38 = vadd.f32 %v8798_v34, %v7009_v31  ;;  %v8820_v39 = vadd.f32 %v8819_v37, %v8818_v36  ;;  %v8821_v40 = vpop.f32.mrb[62].mxu1 }
 0x2da   :  { %v8822_v42 = vpop.f32.mrb[63].mxu1 }
 0x2db   :  { %v7089_v43 = vadd.f32 %v8820_v39, %v7049_v38 }
 0x2f5   :  { %v8840_v44 = vpop.f32.mrb[64].mxu0 }
 0x2f6   :  { %v8841_v45 = vpop.f32.mrb[65].mxu0 }
 0x2f7   :  { %v8842_v46 = vadd.f32 %v8841_v45, %v8840_v44  ;;  %v8843_v47 = vpop.f32.mrb[66].mxu0  ;;  %v8862_v48 = vpop.f32.mrb[64].mxu1 }
 0x2f8   :  { %v8844_v49 = vpop.f32.mrb[67].mxu0  ;;  %v8863_v50 = vpop.f32.mrb[65].mxu1 }
 0x2f9   :  { %v7129_v51 = vadd.f32 %v8842_v46, %v7089_v43  ;;  %v8864_v52 = vadd.f32 %v8863_v50, %v8862_v48  ;;  %v8865_v53 = vpop.f32.mrb[66].mxu1 }
 0x2fa   :  { %v8866_v54 = vpop.f32.mrb[67].mxu1 }
 0x2fb   :  { %v7169_v55 = vadd.f32 %v8864_v52, %v7129_v51 }
 0x315   :  { %v8884_v56 = vpop.f32.mrb[68].mxu0 }
 0x316   :  { %v8885_v57 = vpop.f32.mrb[69].mxu0 }
 0x317   :  { %v8886_v58 = vadd.f32 %v8885_v57, %v8884_v56  ;;  %v8887_v59 = vpop.f32.mrb[70].mxu0  ;;  %v8906_v60 = vpop.f32.mrb[68].mxu1 }
 0x318   :  { %v8888_v61 = vpop.f32.mrb[71].mxu0  ;;  %v8907_v62 = vpop.f32.mrb[69].mxu1 }
 0x319   :  { %v7209_v63 = vadd.f32 %v8886_v58, %v7169_v55  ;;  %v8908_v0 = vadd.f32 %v8907_v62, %v8906_v60  ;;  %v8909_v1 = vpop.f32.mrb[70].mxu1 }
 0x31a   :  { %v8910_v2 = vpop.f32.mrb[71].mxu1 }
 0x31b   :  { %v7249_v3 = vadd.f32 %v8908_v0, %v7209_v63 }
 0x335   :  { %v8928_v4 = vpop.f32.mrb[72].mxu0 }
 0x336   :  { %v8929_v5 = vpop.f32.mrb[73].mxu0 }
 0x337   :  { %v8930_v6 = vadd.f32 %v8929_v5, %v8928_v4  ;;  %v8931_v7 = vpop.f32.mrb[74].mxu0  ;;  %v8950_v8 = vpop.f32.mrb[72].mxu1 }
 0x338   :  { %v8932_v9 = vpop.f32.mrb[75].mxu0  ;;  %v8951_v10 = vpop.f32.mrb[73].mxu1 }
 0x339   :  { %v7289_v11 = vadd.f32 %v8930_v6, %v7249_v3  ;;  %v8952_v12 = vadd.f32 %v8951_v10, %v8950_v8  ;;  %v8953_v13 = vpop.f32.mrb[74].mxu1 }
 0x33a   :  { %v8954_v14 = vpop.f32.mrb[75].mxu1 }
 0x33b   :  { %v7329_v15 = vadd.f32 %v8952_v12, %v7289_v11 }
 0x355   :  { %v8972_v16 = vpop.f32.mrb[76].mxu0 }
 0x356   :  { %v8973_v17 = vpop.f32.mrb[77].mxu0 }
 0x357   :  { %v8974_v18 = vadd.f32 %v8973_v17, %v8972_v16  ;;  %v8975_v19 = vpop.f32.mrb[78].mxu0  ;;  %v8994_v20 = vpop.f32.mrb[76].mxu1 }
 0x358   :  { %v8976_v21 = vpop.f32.mrb[79].mxu0  ;;  %v8995_v22 = vpop.f32.mrb[77].mxu1 }
 0x359   :  { %v7369_v23 = vadd.f32 %v8974_v18, %v7329_v15  ;;  %v8996_v24 = vadd.f32 %v8995_v22, %v8994_v20  ;;  %v8997_v25 = vpop.f32.mrb[78].mxu1 }
 0x35a   :  { %v8998_v26 = vpop.f32.mrb[79].mxu1 }
 0x35b   :  { %v7409_v27 = vadd.f32 %v8996_v24, %v7369_v23 }
 0x375   :  { %v7448_v28 = vpop.f32.mrb[80].mxu0 }
 0x376   :  { %v7449_v29 = vadd.f32 %v7448_v28, %v7409_v27  ;;  %v9027_v30 = vpop.f32.mrb[81].mxu0 }
 0x377   :  { %v7451_v31 = vpop.f32.mrb[82].mxu0 }
 0x378   :  { %v9028_v32 = vpop.f32.mrb[83].mxu0  ;;  %7455 = vst.msk [vmem:[#allocation2] sm:$0x3] %vm7454_vm1, %v7449_v29 }
 0x379   :  { %9702 = shalt.err (!%p9699_p4)
}
 0x37a   :  { %s9703_s10 = scalar_lea.hbm %s11883_s3, 32 }
 0x37b   :  { %p9704_p5 = scmp.ne.s32.totalorder %s11883_s3, %s9703_s10  ;;  %p9707_p6 = scmp.lt.u32.totalorder %s9703_s10, %s11883_s3 }
 0x37d   :  { %p9709_p7 = pnand %p9707_p6, %p9704_p5 }
 0x37f   :  { %9712 = shalt.err (!%p9709_p7)
}
 0x380   :  { %7465 = dma.vmem_to_hbm [thread:$0]  %s7463_s1, 32, %s11883_s3, [#allocation3]  }
 0x381   :  { %9713 = dma.done.wait [#allocation3], 32  }
 0x382   :  { %9714 = vsyncadd [#allocation3], 4294967264 }
 0x383   :  { %7469 = vsyncpa [#allocation3], 1 }

</bundles_post_ra>
